<compile_context>
chip_gen: v7x
topology: tpu7x:2x2x1
jax: 0.10.0
libtpu: 0.0.40
codegen_flags: <defaults>
</compile_context>

<pallas_src>
import numpy as np
import jax
import jax.numpy as jnp
from jax.experimental import pallas as pl
from jax.experimental.pallas import tpu as pltpu

KERNEL_NUM = 21
SIGMA = 0.1
EXACT_SIGMA = 0.001
OUT_LAYERS = [10, 5]
EPS = 1e-12  # F.normalize default eps


def _mus_sigmas():
    # mirrors KNRM._get_kernels_layers
    start = -1.0 + 1.0 / (KERNEL_NUM - 1)
    step = 2.0 / (KERNEL_NUM - 1)
    mus = [float(m) for m in np.arange(start, 1, step)]
    sigmas = [SIGMA] * len(mus)
    mus.append(1.0)
    sigmas.append(EXACT_SIGMA)
    return mus, sigmas


def _knrm_kernel(q_ref, d_ref, mus_ref, inv_ref,
                 w1t_ref, b1t_ref, w2t_ref, b2t_ref, w3t_ref, b3t_ref,
                 out_ref):
    q = q_ref[...]          # (BB, Lq, D) f32
    d = d_ref[...]          # (BB, Ld, D) f32

    # F.normalize(x, dim=-1): x / max(||x||_2, eps)
    # (one sqrt + one divide per row, then a cheap VPU multiply)
    q_inv = 1.0 / jnp.maximum(jnp.sqrt(jnp.sum(q * q, axis=-1, keepdims=True)), EPS)
    d_inv = 1.0 / jnp.maximum(jnp.sqrt(jnp.sum(d * d, axis=-1, keepdims=True)), EPS)
    qn = q * q_inv
    dn = d * d_inv

    # Batched matching matrix: einsum('ijk,imk->ijm') -> (BB, Lq, Ld) on the MXU.
    # Contraction is on the shared last (D) axis of both operands -> no .T needed.
    mm = jnp.einsum("bqd,bkd->bqk", qn, dn,
                    preferred_element_type=jnp.float32)

    # All 21 Gaussian kernels in one broadcasted computation:
    #   kv[k, b, q, d] = exp(-(mm[b, q, d] - mu_k)^2 / (2 sigma_k^2))
    diff = mm[None] - mus_ref[...]                 # (K, BB, Lq, Ld)
    kv = jnp.exp(-(diff * diff) * inv_ref[...])    # (K, BB, Lq, Ld)
    s = jnp.sum(kv, axis=-1)                       # (K, BB, Lq)  sum over doc tokens
    feats_t = jnp.sum(jnp.log1p(s), axis=-1)       # (K, BB)      sum over query tokens

    # Tiny MLP (21 -> 10 -> 5 -> 1), ReLU after every Linear.  Transposed
    # orientation: W^T @ feats^T keeps the batch on the lane axis so the
    # output block is lane-dense.
    h = jnp.maximum(jnp.dot(w1t_ref[...], feats_t,
                            preferred_element_type=jnp.float32) + b1t_ref[...], 0.0)
    h = jnp.maximum(jnp.dot(w2t_ref[...], h,
                            preferred_element_type=jnp.float32) + b2t_ref[...], 0.0)
    h = jnp.maximum(jnp.dot(w3t_ref[...], h,
                            preferred_element_type=jnp.float32) + b3t_ref[...], 0.0)
    out_ref[...] = h                               # (1, BB)


def knrm_predict_pallas(q_emb, d_emb, mlp_params, *, block_b=64):
    """KNRM logits for a batch of (query, document) embedding pairs -> (B, 1)."""
    B, Lq, D = q_emb.shape
    Bd, Ld, Dd = d_emb.shape
    assert B == Bd and D == Dd
    w1, b1, w2, b2, w3, b3 = mlp_params

    # Block the batch dimension; pad with zero rows if needed (zero embeddings
    # normalize to zero exactly like the padding token, results are sliced off).
    BB = max(1, min(block_b, B))
    nb = pl.cdiv(B, BB)
    Bp = nb * BB
    if Bp != B:
        q_emb = jnp.pad(q_emb, ((0, Bp - B), (0, 0), (0, 0)))
        d_emb = jnp.pad(d_emb, ((0, Bp - B), (0, 0), (0, 0)))

    mus, sigmas = _mus_sigmas()
    K = len(mus)
    mus_a = jnp.asarray(np.asarray(mus, np.float32).reshape(K, 1, 1, 1))
    inv_a = jnp.asarray(
        (1.0 / (2.0 * np.square(np.asarray(sigmas, np.float64))))
        .astype(np.float32).reshape(K, 1, 1, 1))

    # Transposed MLP weights so the kernel computes W^T @ feats^T (batch on lanes).
    w1t, b1t = w1.T, b1.T      # (10, 21), (10, 1)
    w2t, b2t = w2.T, b2.T      # (5, 10),  (5, 1)
    w3t, b3t = w3.T, b3.T      # (1, 5),   (1, 1)

    out = pl.pallas_call(
        _knrm_kernel,
        out_shape=jax.ShapeDtypeStruct((nb, BB), jnp.float32),
        grid=(nb,),
        in_specs=[
            pl.BlockSpec((BB, Lq, D), lambda b: (b, 0, 0)),
            pl.BlockSpec((BB, Ld, D), lambda b: (b, 0, 0)),
            pl.BlockSpec((K, 1, 1, 1), lambda b: (0, 0, 0, 0)),
            pl.BlockSpec((K, 1, 1, 1), lambda b: (0, 0, 0, 0)),
            pl.BlockSpec(w1t.shape, lambda b: (0, 0)),
            pl.BlockSpec(b1t.shape, lambda b: (0, 0)),
            pl.BlockSpec(w2t.shape, lambda b: (0, 0)),
            pl.BlockSpec(b2t.shape, lambda b: (0, 0)),
            pl.BlockSpec(w3t.shape, lambda b: (0, 0)),
            pl.BlockSpec(b3t.shape, lambda b: (0, 0)),
        ],
        out_specs=pl.BlockSpec((1, BB), lambda b: (b, 0)),
        compiler_params=pltpu.CompilerParams(
            dimension_semantics=("parallel",),        # batch blocks are independent
            vmem_limit_bytes=32 * 1024 * 1024,        # headroom for (K,BB,Lq,Ld) temps
        ),
    )(q_emb, d_emb, mus_a, inv_a, w1t, b1t, w2t, b2t, w3t, b3t)

    return out.reshape(Bp, 1)[:B]


def knrm_forward(emb_matrix, mlp_params, input_1, input_2):
    # Embedding gather stays in plain JAX (torch.nn.Embedding equivalent).
    q1 = emb_matrix[input_1["query"]]
    d1 = emb_matrix[input_1["document"]]
    q2 = emb_matrix[input_2["query"]]
    d2 = emb_matrix[input_2["document"]]

    if q1.shape == q2.shape and d1.shape == d2.shape:
        # Fuse both predict() calls into a single pallas_call over a 2B batch.
        logits = knrm_predict_pallas(jnp.concatenate([q1, q2], axis=0),
                                     jnp.concatenate([d1, d2], axis=0),
                                     mlp_params)
        B = q1.shape[0]
        logits_1, logits_2 = logits[:B], logits[B:]
    else:
        logits_1 = knrm_predict_pallas(q1, d1, mlp_params)
        logits_2 = knrm_predict_pallas(q2, d2, mlp_params)

    return jax.nn.sigmoid(logits_1 - logits_2)


# ------------------------- pure-JAX reference -------------------------
def _predict_ref(emb_matrix, mlp_params, inp):
    w1, b1, w2, b2, w3, b3 = mlp_params
    mus, sigmas = _mus_sigmas()
    q = emb_matrix[inp["query"]]
    d = emb_matrix[inp["document"]]
    qn = q / jnp.maximum(jnp.linalg.norm(q, axis=-1, keepdims=True), EPS)
    dn = d / jnp.maximum(jnp.linalg.norm(d, axis=-1, keepdims=True), EPS)
    mm = jnp.einsum("ijk,imk->ijm", qn, dn)
    feats = []
    for mu, sg in zip(mus, sigmas):
        k = jnp.exp(-jnp.square(mm - mu) / (2.0 * sg * sg))
        feats.append(jnp.sum(jnp.log1p(jnp.sum(k, axis=-1)), axis=-1))
    feats = jnp.stack(feats, axis=1)
    h = jnp.maximum(feats @ w1 + b1, 0.0)
    h = jnp.maximum(h @ w2 + b2, 0.0)
    h = jnp.maximum(h @ w3 + b3, 0.0)
    return h


def knrm_forward_ref(emb_matrix, mlp_params, input_1, input_2):
    l1 = _predict_ref(emb_matrix, mlp_params, input_1)
    l2 = _predict_ref(emb_matrix, mlp_params, input_2)
    return jax.nn.sigmoid(l1 - l2)


# ------------------------------ main ----------------------------------
if __name__ == "__main__":
    B, Lq, Ld, D, VOCAB = 2, 8, 12, 32, 50

    key = jax.random.PRNGKey(0)
    k_emb, k_w1, k_b1, k_w2, k_b2, k_w3, k_b3, kq1, kd1, kq2, kd2 = \
        jax.random.split(key, 11)

    # deterministic embedding matrix; row 0 is the padding vector (zeros)
    emb_matrix = jax.random.normal(k_emb, (VOCAB, D), jnp.float32) * 0.5
    emb_matrix = emb_matrix.at[0].set(0.0)

    # MLP params (x @ W + b convention); sizes = [21, 10, 5, 1]
    def lin(kw, kb, fan_in, fan_out):
        bound = 1.0 / np.sqrt(fan_in)
        w = jax.random.uniform(kw, (fan_in, fan_out), jnp.float32, -bound, bound)
        b = jax.random.uniform(kb, (1, fan_out), jnp.float32, -bound, bound)
        return w, b

    w1, b1 = lin(k_w1, k_b1, KERNEL_NUM, OUT_LAYERS[0])
    w2, b2 = lin(k_w2, k_b2, OUT_LAYERS[0], OUT_LAYERS[1])
    w3, b3 = lin(k_w3, k_b3, OUT_LAYERS[1], 1)
    mlp_params = (w1, b1, w2, b2, w3, b3)

    input_1 = {
        "query": jax.random.randint(kq1, (B, Lq), 0, VOCAB),
        "document": jax.random.randint(kd1, (B, Ld), 0, VOCAB),
    }
    input_2 = {
        "query": jax.random.randint(kq2, (B, Lq), 0, VOCAB),
        "document": jax.random.randint(kd2, (B, Ld), 0, VOCAB),
    }

    out = knrm_forward(emb_matrix, mlp_params, input_1, input_2)
    out = jax.block_until_ready(out)

    ref = knrm_forward_ref(emb_matrix, mlp_params, input_1, input_2)
    np.testing.assert_allclose(np.asarray(out), np.asarray(ref), atol=2e-3, rtol=2e-3)

    print("KERNEL_OK")
</pallas_src>

<mosaic_0001>
module attributes {stable_mosaic.version = 11 : i64} {
  func.func @_knrm_kernel(%arg0: i32, %arg1: memref<4x8x32xf32, #tpu.memory_space<vmem>>, %arg2: memref<4x12x32xf32, #tpu.memory_space<vmem>>, %arg3: memref<21x1x1x1xf32, #tpu.memory_space<vmem>>, %arg4: memref<21x1x1x1xf32, #tpu.memory_space<vmem>>, %arg5: memref<10x21xf32, #tpu.memory_space<vmem>>, %arg6: memref<10x1xf32, #tpu.memory_space<vmem>>, %arg7: memref<5x10xf32, #tpu.memory_space<vmem>>, %arg8: memref<5x1xf32, #tpu.memory_space<vmem>>, %arg9: memref<1x5xf32, #tpu.memory_space<vmem>>, %arg10: memref<1x1xf32, #tpu.memory_space<vmem>>, %arg11: memref<1x4xf32, #tpu.memory_space<vmem>>) attributes {dimension_semantics = [#tpu.dimension_semantics<parallel>], iteration_bounds = array<i64: 1>, scalar_prefetch = 0 : i64, scratch_operands = 0 : i64, tpu.core_type = #tpu.core_type<tc>, window_params = [{transform_indices = @transform_0, window_bounds = array<i64: 4, 8, 32>}, {transform_indices = @transform_1, window_bounds = array<i64: 4, 12, 32>}, {pipeline_mode = #tpu.pipeline_mode<synchronous>, transform_indices = @transform_2, window_bounds = array<i64: 21, 1, 1, 1>}, {pipeline_mode = #tpu.pipeline_mode<synchronous>, transform_indices = @transform_3, window_bounds = array<i64: 21, 1, 1, 1>}, {pipeline_mode = #tpu.pipeline_mode<synchronous>, transform_indices = @transform_4, window_bounds = array<i64: 10, 21>}, {pipeline_mode = #tpu.pipeline_mode<synchronous>, transform_indices = @transform_5, window_bounds = array<i64: 10, 1>}, {pipeline_mode = #tpu.pipeline_mode<synchronous>, transform_indices = @transform_6, window_bounds = array<i64: 5, 10>}, {pipeline_mode = #tpu.pipeline_mode<synchronous>, transform_indices = @transform_7, window_bounds = array<i64: 5, 1>}, {pipeline_mode = #tpu.pipeline_mode<synchronous>, transform_indices = @transform_8, window_bounds = array<i64: 1, 5>}, {pipeline_mode = #tpu.pipeline_mode<synchronous>, transform_indices = @transform_9, window_bounds = array<i64: 1, 1>}, {transform_indices = @transform_10, window_bounds = array<i64: 1, 4>}]} {
    %c0 = arith.constant 0 : index
    %c0_0 = arith.constant 0 : index
    %c0_1 = arith.constant 0 : index
    %0 = vector.load %arg1[%c0, %c0_0, %c0_1] : memref<4x8x32xf32, #tpu.memory_space<vmem>>, vector<4x8x32xf32>
    %c0_2 = arith.constant 0 : index
    %c0_3 = arith.constant 0 : index
    %c0_4 = arith.constant 0 : index
    %1 = vector.load %arg2[%c0_2, %c0_3, %c0_4] : memref<4x12x32xf32, #tpu.memory_space<vmem>>, vector<4x12x32xf32>
    %2 = arith.mulf %0, %0 : vector<4x8x32xf32>
    %cst = arith.constant dense<0.000000e+00> : vector<4x8xf32>
    %3 = vector.multi_reduction <add>, %2, %cst [2] : vector<4x8x32xf32> to vector<4x8xf32>
    %4 = vector.shape_cast %3 : vector<4x8xf32> to vector<4x8x1xf32>
    %5 = math.sqrt %4 : vector<4x8x1xf32>
    %cst_5 = arith.constant 9.99999996E-13 : f32
    %6 = vector.broadcast %cst_5 : f32 to vector<4x8x1xf32>
    %7 = arith.maximumf %5, %6 : vector<4x8x1xf32>
    %cst_6 = arith.constant 1.000000e+00 : f32
    %8 = vector.broadcast %cst_6 : f32 to vector<4x8x1xf32>
    %9 = arith.divf %8, %7 : vector<4x8x1xf32>
    %10 = arith.mulf %1, %1 : vector<4x12x32xf32>
    %cst_7 = arith.constant dense<0.000000e+00> : vector<4x12xf32>
    %11 = vector.multi_reduction <add>, %10, %cst_7 [2] : vector<4x12x32xf32> to vector<4x12xf32>
    %12 = vector.shape_cast %11 : vector<4x12xf32> to vector<4x12x1xf32>
    %13 = math.sqrt %12 : vector<4x12x1xf32>
    %cst_8 = arith.constant 9.99999996E-13 : f32
    %14 = vector.broadcast %cst_8 : f32 to vector<4x12x1xf32>
    %15 = arith.maximumf %13, %14 : vector<4x12x1xf32>
    %cst_9 = arith.constant 1.000000e+00 : f32
    %16 = vector.broadcast %cst_9 : f32 to vector<4x12x1xf32>
    %17 = arith.divf %16, %15 : vector<4x12x1xf32>
    %18 = vector.broadcast %9 : vector<4x8x1xf32> to vector<4x8x32xf32>
    %19 = arith.mulf %0, %18 : vector<4x8x32xf32>
    %20 = vector.broadcast %17 : vector<4x12x1xf32> to vector<4x12x32xf32>
    %21 = arith.mulf %1, %20 : vector<4x12x32xf32>
    "tpu.trace_start"() <{level = 10 : i32, message = "bqd,bkd->bqk"}> : () -> ()
    %cst_10 = arith.constant dense<0.000000e+00> : vector<4x8x12xf32>
    %22 = tpu.matmul %19, %21, %cst_10 {dimension_numbers = #tpu.dot_dimension_numbers<[2], [2], [1], [1], [0, 0, 0, 1, 1, 1], [0], [0]>} : vector<4x8x32xf32>, vector<4x12x32xf32>, vector<4x8x12xf32> -> vector<4x8x12xf32>
    "tpu.trace_stop"() : () -> ()
    %23 = vector.shape_cast %22 : vector<4x8x12xf32> to vector<1x4x8x12xf32>
    %c0_11 = arith.constant 0 : index
    %c0_12 = arith.constant 0 : index
    %c0_13 = arith.constant 0 : index
    %c0_14 = arith.constant 0 : index
    %24 = vector.load %arg3[%c0_11, %c0_12, %c0_13, %c0_14] : memref<21x1x1x1xf32, #tpu.memory_space<vmem>>, vector<21x1x1x1xf32>
    %25 = vector.broadcast %23 : vector<1x4x8x12xf32> to vector<21x4x8x12xf32>
    %26 = vector.broadcast %24 : vector<21x1x1x1xf32> to vector<21x4x8x12xf32>
    %27 = arith.subf %25, %26 : vector<21x4x8x12xf32>
    %28 = arith.mulf %27, %27 : vector<21x4x8x12xf32>
    %cst_15 = arith.constant 0.000000e+00 : f32
    %29 = vector.broadcast %cst_15 : f32 to vector<21x4x8x12xf32>
    %30 = arith.subf %29, %28 : vector<21x4x8x12xf32>
    %c0_16 = arith.constant 0 : index
    %c0_17 = arith.constant 0 : index
    %c0_18 = arith.constant 0 : index
    %c0_19 = arith.constant 0 : index
    %31 = vector.load %arg4[%c0_16, %c0_17, %c0_18, %c0_19] : memref<21x1x1x1xf32, #tpu.memory_space<vmem>>, vector<21x1x1x1xf32>
    %32 = vector.broadcast %31 : vector<21x1x1x1xf32> to vector<21x4x8x12xf32>
    %33 = arith.mulf %30, %32 : vector<21x4x8x12xf32>
    %34 = math.exp %33 : vector<21x4x8x12xf32>
    %cst_20 = arith.constant dense<0.000000e+00> : vector<21x4x8xf32>
    %35 = vector.multi_reduction <add>, %34, %cst_20 [3] : vector<21x4x8x12xf32> to vector<21x4x8xf32>
    %36 = math.log1p %35 : vector<21x4x8xf32>
    %cst_21 = arith.constant dense<0.000000e+00> : vector<21x4xf32>
    %37 = vector.multi_reduction <add>, %36, %cst_21 [2] : vector<21x4x8xf32> to vector<21x4xf32>
    %c0_22 = arith.constant 0 : index
    %c0_23 = arith.constant 0 : index
    %38 = vector.load %arg5[%c0_22, %c0_23] : memref<10x21xf32, #tpu.memory_space<vmem>>, vector<10x21xf32>
    %cst_24 = arith.constant dense<0.000000e+00> : vector<10x4xf32>
    %39 = tpu.matmul %38, %37, %cst_24 {dimension_numbers = #tpu.dot_dimension_numbers<[1], [0], [0], [1], [0, 0, 1, 1], [], []>} : vector<10x21xf32>, vector<21x4xf32>, vector<10x4xf32> -> vector<10x4xf32>
    %c0_25 = arith.constant 0 : index
    %c0_26 = arith.constant 0 : index
    %40 = vector.load %arg6[%c0_25, %c0_26] : memref<10x1xf32, #tpu.memory_space<vmem>>, vector<10x1xf32>
    %41 = vector.broadcast %40 : vector<10x1xf32> to vector<10x4xf32>
    %42 = arith.addf %39, %41 : vector<10x4xf32>
    %cst_27 = arith.constant 0.000000e+00 : f32
    %43 = vector.broadcast %cst_27 : f32 to vector<10x4xf32>
    %44 = arith.maximumf %42, %43 : vector<10x4xf32>
    %c0_28 = arith.constant 0 : index
    %c0_29 = arith.constant 0 : index
    %45 = vector.load %arg7[%c0_28, %c0_29] : memref<5x10xf32, #tpu.memory_space<vmem>>, vector<5x10xf32>
    %cst_30 = arith.constant dense<0.000000e+00> : vector<5x4xf32>
    %46 = tpu.matmul %45, %44, %cst_30 {dimension_numbers = #tpu.dot_dimension_numbers<[1], [0], [0], [1], [0, 0, 1, 1], [], []>} : vector<5x10xf32>, vector<10x4xf32>, vector<5x4xf32> -> vector<5x4xf32>
    %c0_31 = arith.constant 0 : index
    %c0_32 = arith.constant 0 : index
    %47 = vector.load %arg8[%c0_31, %c0_32] : memref<5x1xf32, #tpu.memory_space<vmem>>, vector<5x1xf32>
    %48 = vector.broadcast %47 : vector<5x1xf32> to vector<5x4xf32>
    %49 = arith.addf %46, %48 : vector<5x4xf32>
    %cst_33 = arith.constant 0.000000e+00 : f32
    %50 = vector.broadcast %cst_33 : f32 to vector<5x4xf32>
    %51 = arith.maximumf %49, %50 : vector<5x4xf32>
    %c0_34 = arith.constant 0 : index
    %c0_35 = arith.constant 0 : index
    %52 = vector.load %arg9[%c0_34, %c0_35] : memref<1x5xf32, #tpu.memory_space<vmem>>, vector<1x5xf32>
    %cst_36 = arith.constant dense<0.000000e+00> : vector<1x4xf32>
    %53 = tpu.matmul %52, %51, %cst_36 {dimension_numbers = #tpu.dot_dimension_numbers<[1], [0], [0], [1], [0, 0, 1, 1], [], []>} : vector<1x5xf32>, vector<5x4xf32>, vector<1x4xf32> -> vector<1x4xf32>
    %c0_37 = arith.constant 0 : index
    %c0_38 = arith.constant 0 : index
    %54 = vector.load %arg10[%c0_37, %c0_38] : memref<1x1xf32, #tpu.memory_space<vmem>>, vector<1x1xf32>
    %55 = vector.broadcast %54 : vector<1x1xf32> to vector<1x4xf32>
    %56 = arith.addf %53, %55 : vector<1x4xf32>
    %cst_39 = arith.constant 0.000000e+00 : f32
    %57 = vector.broadcast %cst_39 : f32 to vector<1x4xf32>
    %58 = arith.maximumf %56, %57 : vector<1x4xf32>
    %c0_40 = arith.constant 0 : index
    %c0_41 = arith.constant 0 : index
    %59 = vector.load %arg11[%c0_40, %c0_41] : memref<1x4xf32, #tpu.memory_space<vmem>>, vector<1x4xf32>
    tpu.vector_store %arg11[%c0_40, %c0_41], %58 {strides = array<i32>} : memref<1x4xf32, #tpu.memory_space<vmem>>, vector<1x4xf32>,
    return
  }
  func.func @transform_0(%arg0: i32) -> (i32, i32, i32) {
    %c0_i32 = arith.constant 0 : i32
    %c0_i32_0 = arith.constant 0 : i32
    %c0_i32_1 = arith.constant 0 : i32
    return %arg0, %c0_i32, %c0_i32_0 : i32, i32, i32
  }
  func.func @transform_1(%arg0: i32) -> (i32, i32, i32) {
    %c0_i32 = arith.constant 0 : i32
    %c0_i32_0 = arith.constant 0 : i32
    %c0_i32_1 = arith.constant 0 : i32
    return %arg0, %c0_i32, %c0_i32_0 : i32, i32, i32
  }
  func.func @transform_2(%arg0: i32) -> (i32, i32, i32, i32) {
    %c0_i32 = arith.constant 0 : i32
    %c0_i32_0 = arith.constant 0 : i32
    %c0_i32_1 = arith.constant 0 : i32
    %c0_i32_2 = arith.constant 0 : i32
    %c0_i32_3 = arith.constant 0 : i32
    return %c0_i32, %c0_i32_0, %c0_i32_1, %c0_i32_2 : i32, i32, i32, i32
  }
  func.func @transform_3(%arg0: i32) -> (i32, i32, i32, i32) {
    %c0_i32 = arith.constant 0 : i32
    %c0_i32_0 = arith.constant 0 : i32
    %c0_i32_1 = arith.constant 0 : i32
    %c0_i32_2 = arith.constant 0 : i32
    %c0_i32_3 = arith.constant 0 : i32
    return %c0_i32, %c0_i32_0, %c0_i32_1, %c0_i32_2 : i32, i32, i32, i32
  }
  func.func @transform_4(%arg0: i32) -> (i32, i32) {
    %c0_i32 = arith.constant 0 : i32
    %c0_i32_0 = arith.constant 0 : i32
    %c0_i32_1 = arith.constant 0 : i32
    return %c0_i32, %c0_i32_0 : i32, i32
  }
  func.func @transform_5(%arg0: i32) -> (i32, i32) {
    %c0_i32 = arith.constant 0 : i32
    %c0_i32_0 = arith.constant 0 : i32
    %c0_i32_1 = arith.constant 0 : i32
    return %c0_i32, %c0_i32_0 : i32, i32
  }
  func.func @transform_6(%arg0: i32) -> (i32, i32) {
    %c0_i32 = arith.constant 0 : i32
    %c0_i32_0 = arith.constant 0 : i32
    %c0_i32_1 = arith.constant 0 : i32
    return %c0_i32, %c0_i32_0 : i32, i32
  }
  func.func @transform_7(%arg0: i32) -> (i32, i32) {
    %c0_i32 = arith.constant 0 : i32
    %c0_i32_0 = arith.constant 0 : i32
    %c0_i32_1 = arith.constant 0 : i32
    return %c0_i32, %c0_i32_0 : i32, i32
  }
  func.func @transform_8(%arg0: i32) -> (i32, i32) {
    %c0_i32 = arith.constant 0 : i32
    %c0_i32_0 = arith.constant 0 : i32
    %c0_i32_1 = arith.constant 0 : i32
    return %c0_i32, %c0_i32_0 : i32, i32
  }
  func.func @transform_9(%arg0: i32) -> (i32, i32) {
    %c0_i32 = arith.constant 0 : i32
    %c0_i32_0 = arith.constant 0 : i32
    %c0_i32_1 = arith.constant 0 : i32
    return %c0_i32, %c0_i32_0 : i32, i32
  }
  func.func @transform_10(%arg0: i32) -> (i32, i32) {
    %c0_i32 = arith.constant 0 : i32
    %c0_i32_0 = arith.constant 0 : i32
    return %arg0, %c0_i32 : i32, i32
  }
}

</mosaic_0001>

<bundles_post_ra>
// kernel: tpu_custom_call.1
= control target key start
LH: loop header
LB: loop body
LE: loop exit
PB: predicated region body
PF: predicated region fallthrough
CT: control target
= control target key end

     0   :  { %s6671_s0 = inlined_call_operand.vmem [shape: f32[4,8,32], index: 0, kind: input, shape index: {}]   ;;  %s6672_s1 = inlined_call_operand.vmem [shape: f32[4,12,32], index: 1, kind: input, shape index: {}]   ;;  %s6673_s2 = inlined_call_operand.vmem [shape: f32[21,1,1,1], index: 2, kind: input, shape index: {}]   ;;  %s6674_s3 = inlined_call_operand.vmem [shape: f32[21,1,1,1], index: 3, kind: input, shape index: {}]   ;;  %s6675_s4 = inlined_call_operand.vmem [shape: f32[10,21], index: 4, kind: input, shape index: {}]   ;;  %s6676_s5 = inlined_call_operand.vmem [shape: f32[10,1], index: 5, kind: input, shape index: {}]   ;;  %s6677_s6 = inlined_call_operand.vmem [shape: f32[5,10], index: 6, kind: input, shape index: {}]   ;;  %s6678_s7 = inlined_call_operand.vmem [shape: f32[5,1], index: 7, kind: input, shape index: {}]   ;;  %s6679_s8 = inlined_call_operand.vmem [shape: f32[1,5], index: 8, kind: input, shape index: {}]   ;;  %s6680_s9 = inlined_call_operand.<no memory space> [shape: f32[1,1], index: 9, kind: input, shape index: {}]   ;;  %s6681_s10 = inlined_call_operand.hbm [shape: f32[1,4], index: 10, kind: output, shape index: {}]  }
   0x1   :  { %v15_v0 = vstv %s6680_s9 }
   0x2   :  { %16 = vst [vmem:[#allocation2] sm:$0x1] %v15_v0 }
   0x3   :  { %v4114_v1 = vld [vmem:[%s6672_s1 + $0x10] sm:$0xff]  ;;  %vm54_vm0 = vcmask 261120   ;;  %v4119_v2 = vld [vmem:[%s6672_s1] sm:$0xff]  ;;  %v4124_v3 = vld [vmem:[%s6672_s1 + $0x18] sm:$0xf]  ;;  %vm118_vm1 = vcmask 257024  }
   0x4   :  { %v109_v4 = vmul.f32 %v4114_v1, %v4114_v1  ;;  %v107_v5 = vmul.f32 %v4119_v2, %v4119_v2  ;;  %v110_v6 = vmul.f32 %v4124_v3, %v4124_v3  ;;  %v4135_v7 = vld [vmem:[%s6672_s1 + $0x8] sm:$0xf]  ;;  %v4147_v10 = vld [vmem:[%s6672_s1 + $0x20] sm:$0xff]  ;;  %v4047_v11 = vmov 0  }
   0x5   :  { %v108_v8 = vmul.f32 %v4135_v7, %v4135_v7  ;;  %v4142_v9 = vld [vmem:[%s6672_s1 + $0x28] sm:$0xf]  ;;  %3638 = vset.pattern.permute.xlu1 %v4047_v11  ;;  %3637 = vset.pattern.permute.xlu0 %v4047_v11 }
   0x6   :  { %v122_v12 = vsel %vm54_vm0, %v109_v4, 0.0  ;;  %v115_v13 = vsel %vm54_vm0, %v107_v5, 0.0 }
   0x7   :  { %123 = vadd.xlane.f32.xlu1 %v122_v12  ;;  %116 = vadd.xlane.f32.xlu0 %v115_v13 }
   0x8   :  { %17 = vsyncpa [#allocation4], 0  ;;  %v125_v14 = vsel %vm118_vm1, %v110_v6, 0.0  ;;  %v119_v15 = vsel %vm118_vm1, %v108_v8, 0.0  ;;  %v112_v16 = vmul.f32 %v4142_v9, %v4142_v9  ;;  %v111_v17 = vmul.f32 %v4147_v10, %v4147_v10  ;;  %v4160_v18 = vld [vmem:[%s6672_s1 + $0x38] sm:$0xf] }
   0x9   :  { %v4165_v19 = vld [vmem:[%s6672_s1 + $0x30] sm:$0xff]  ;;  %v114_v22 = vmul.f32 %v4160_v18, %v4160_v18  ;;  %v4176_v24 = vld [vmem:[%s6671_s0 + $0x8] sm:$0xff]  ;;  %v4181_v25 = vld [vmem:[%s6671_s0] sm:$0xff]  ;;  %v4048_v43 = vmov 0.0|0.0   ;;  %vm6704_vm2 = vmmov 0   ;;  %v6682_v46 = vmov 0.0  }
   0xa   :  { %v131_v20 = vsel %vm118_vm1, %v112_v16, 0.0  ;;  %v128_v21 = vsel %vm54_vm0, %v111_v17, 0.0  ;;  %v113_v23 = vmul.f32 %v4165_v19, %v4165_v19  ;;  %v51_v28 = vmul.f32 %v4176_v24, %v4176_v24  ;;  %v4192_v30 = vld [vmem:[%s6671_s0 + $0x18] sm:$0xff]  ;;  %v4197_v31 = vld [vmem:[%s6671_s0 + $0x10] sm:$0xff]  ;;  %v3488_v38 = vld [vmem:[%s6673_s2 + $0x1] ss:$0 sm:$0xff]  ;;  %3607 = vmatprep.subr.bf16.mxu0 %v4048_v43  ;;  %3611 = vmatprep.subr.bf16.mxu1 %v4048_v43 }
   0xb   :  { %126 = vadd.xlane.f32.xlu1 %v125_v14  ;;  %120 = vadd.xlane.f32.xlu0 %v119_v15  ;;  %v137_v26 = vsel %vm118_vm1, %v114_v22, 0.0  ;;  %v50_v29 = vmul.f32 %v4181_v25, %v4181_v25  ;;  %v53_v34 = vmul.f32 %v4192_v30, %v4192_v30  ;;  %v52_v35 = vmul.f32 %v4197_v31, %v4197_v31  ;;  %v3495_v39 = vld [vmem:[%s6673_s2 + $0x8] ss:$0 sm:$0xff]  ;;  %v3496_v40 = vld [vmem:[%s6673_s2 + $0x9] ss:$0 sm:$0xff] }
   0xc   :  { %v134_v27 = vsel %vm54_vm0, %v113_v23, 0.0  ;;  %v58_v32 = vsel %vm54_vm0, %v51_v28, 0.0  ;;  %v3489_v41 = vld [vmem:[%s6673_s2 + $0x2] ss:$0 sm:$0xff]  ;;  %v3497_v42 = vld [vmem:[%s6673_s2 + $0xa] ss:$0 sm:$0xff]  ;;  %3562 = vmatprep.mubr.msk.f32.mxu0 %vm6704_vm2, %v6682_v46  ;;  %3569 = vmatprep.mubr.msk.f32.mxu1 %vm6704_vm2, %v6682_v46 }
   0xd   :  { %v55_v33 = vsel %vm54_vm0, %v50_v29, 0.0  ;;  %v64_v36 = vsel %vm54_vm0, %v53_v34, 0.0  ;;  %v61_v37 = vsel %vm54_vm0, %v52_v35, 0.0  ;;  %v3490_v44 = vld [vmem:[%s6673_s2 + $0x3] ss:$0 sm:$0xff] }
   0xe   :  { %v3498_v45 = vld [vmem:[%s6673_s2 + $0xb] ss:$0 sm:$0xff]  ;;  %v3491_v47 = vld [vmem:[%s6673_s2 + $0x4] ss:$0 sm:$0xff]  ;;  %v3487_v48 = vld [vmem:[%s6673_s2] ss:$0 sm:$0xff] }
   0xf   :  { %132 = vadd.xlane.f32.xlu1 %v131_v20  ;;  %129 = vadd.xlane.f32.xlu0 %v128_v21  ;;  %v3492_v49 = vld [vmem:[%s6673_s2 + $0x5] ss:$0 sm:$0xff]  ;;  %v3493_v50 = vld [vmem:[%s6673_s2 + $0x6] ss:$0 sm:$0xff]  ;;  %v3499_v51 = vld [vmem:[%s6673_s2 + $0xc] ss:$0 sm:$0xff] }
  0x10   :  { %v3494_v52 = vld [vmem:[%s6673_s2 + $0x7] ss:$0 sm:$0xff]  ;;  %v3500_v53 = vld [vmem:[%s6673_s2 + $0xd] ss:$0 sm:$0xff]  ;;  %v3508_v54 = vld [vmem:[%s6674_s3] ss:$0 sm:$0xff] }
  0x11   :  { %v3501_v55 = vld [vmem:[%s6673_s2 + $0xe] ss:$0 sm:$0xff]  ;;  %v3516_v56 = vld [vmem:[%s6674_s3 + $0x8] ss:$0 sm:$0xff]  ;;  %v3502_v57 = vld [vmem:[%s6673_s2 + $0xf] ss:$0 sm:$0xff] }
  0x12   :  { %v3510_v58 = vld [vmem:[%s6674_s3 + $0x2] ss:$0 sm:$0xff]  ;;  %v3509_v59 = vld [vmem:[%s6674_s3 + $0x1] ss:$0 sm:$0xff]  ;;  %v3511_v60 = vld [vmem:[%s6674_s3 + $0x3] ss:$0 sm:$0xff] }
  0x13   :  { %138 = vadd.xlane.f32.xlu1 %v137_v26  ;;  %135 = vadd.xlane.f32.xlu0 %v134_v27  ;;  %v3517_v61 = vld [vmem:[%s6674_s3 + $0x9] ss:$0 sm:$0xff]  ;;  %v3503_v62 = vld [vmem:[%s6673_s2 + $0x10] ss:$0 sm:$0xff]  ;;  %v3518_v63 = vld [vmem:[%s6674_s3 + $0xa] ss:$0 sm:$0xff] }
  0x14   :  { %v3512_v0 = vld [vmem:[%s6674_s3 + $0x4] ss:$0 sm:$0xff]  ;;  %v3519_v4 = vld [vmem:[%s6674_s3 + $0xb] ss:$0 sm:$0xff]  ;;  %v3505_v5 = vld [vmem:[%s6673_s2 + $0x12] ss:$0 sm:$0xff] }
  0x15   :  { %v3504_v6 = vld [vmem:[%s6673_s2 + $0x11] ss:$0 sm:$0xff]  ;;  %v3521_v8 = vld [vmem:[%s6674_s3 + $0xd] ss:$0 sm:$0xff]  ;;  %v3520_v11 = vld [vmem:[%s6674_s3 + $0xc] ss:$0 sm:$0xff] }
  0x16   :  { %v3514_v12 = vld [vmem:[%s6674_s3 + $0x6] ss:$0 sm:$0xff]  ;;  %v3513_v13 = vld [vmem:[%s6674_s3 + $0x5] ss:$0 sm:$0xff]  ;;  %v3507_v14 = vld [vmem:[%s6673_s2 + $0x14] ss:$0 sm:$0xff] }
  0x17   :  { %59 = vadd.xlane.f32.xlu1 %v58_v32  ;;  %56 = vadd.xlane.f32.xlu0 %v55_v33  ;;  %v3506_v15 = vld [vmem:[%s6673_s2 + $0x13] ss:$0 sm:$0xff]  ;;  %v3523_v16 = vld [vmem:[%s6674_s3 + $0xf] ss:$0 sm:$0xff]  ;;  %v3522_v17 = vld [vmem:[%s6674_s3 + $0xe] ss:$0 sm:$0xff] }
  0x18   :  { %v3525_v20 = vld [vmem:[%s6674_s3 + $0x11] ss:$0 sm:$0xff]  ;;  %v3515_v21 = vld [vmem:[%s6674_s3 + $0x7] ss:$0 sm:$0xff]  ;;  %v3527_v22 = vld [vmem:[%s6674_s3 + $0x13] ss:$0 sm:$0xff] }
  0x19   :  { %v3524_v23 = vld [vmem:[%s6674_s3 + $0x10] ss:$0 sm:$0xff]  ;;  %v3526_v26 = vld [vmem:[%s6674_s3 + $0x12] ss:$0 sm:$0xff]  ;;  %v3528_v27 = vld [vmem:[%s6674_s3 + $0x14] ss:$0 sm:$0xff] }
  0x1b   :  { %65 = vadd.xlane.f32.xlu1 %v64_v36  ;;  %62 = vadd.xlane.f32.xlu0 %v61_v37 }
  0x2c   :  { %679 = vperm.xlu1 %3638, %v3488_v38  }
  0x30   :  { %707 = vperm.xlu1 %3638, %v3495_v39  }
  0x31   :  { %675 = vperm.xlu0 %3637, %v3487_v48  }
  0x34   :  { %711 = vperm.xlu1 %3638, %v3496_v40  }
  0x35   :  { %723 = vperm.xlu0 %3637, %v3499_v51  }
  0x38   :  { %683 = vperm.xlu1 %3638, %v3489_v41  }
  0x39   :  { %727 = vperm.xlu0 %3637, %v3500_v53  }
  0x3c   :  { %715 = vperm.xlu1 %3638, %v3497_v42  }
  0x3d   :  { %731 = vperm.xlu0 %3637, %v3501_v55  }
  0x40   :  { %687 = vperm.xlu1 %3638, %v3490_v44  }
  0x41   :  { %735 = vperm.xlu0 %3637, %v3502_v57  }
  0x44   :  { %719 = vperm.xlu1 %3638, %v3498_v45  }
  0x45   :  { %1141 = vperm.xlu0 %3637, %v3509_v59  }
  0x48   :  { %691 = vperm.xlu1 %3638, %v3491_v47  }
  0x49   :  { %1173 = vperm.xlu0 %3637, %v3517_v61  }
  0x4c   :  { %695 = vperm.xlu1 %3638, %v3492_v49  }
  0x4d   :  { %1177 = vperm.xlu0 %3637, %v3518_v63  }
  0x50   :  { %699 = vperm.xlu1 %3638, %v3493_v50  }
  0x51   :  { %1181 = vperm.xlu0 %3637, %v3519_v4  }
  0x54   :  { %703 = vperm.xlu1 %3638, %v3494_v52  }
  0x55   :  { %743 = vperm.xlu0 %3637, %v3504_v6  }
  0x58   :  { %1137 = vperm.xlu1 %3638, %v3508_v54  }
  0x59   :  { %1185 = vperm.xlu0 %3637, %v3520_v11  }
  0x5c   :  { %1169 = vperm.xlu1 %3638, %v3516_v56  }
  0x5d   :  { %1157 = vperm.xlu0 %3637, %v3513_v13  }
  0x60   :  { %1145 = vperm.xlu1 %3638, %v3510_v58  }
  0x61   :  { %751 = vperm.xlu0 %3637, %v3506_v15  }
  0x64   :  { %1149 = vperm.xlu1 %3638, %v3511_v60  }
  0x65   :  { %1193 = vperm.xlu0 %3637, %v3522_v17  }
  0x68   :  { %739 = vperm.xlu1 %3638, %v3503_v62  }
  0x69   :  { %1165 = vperm.xlu0 %3637, %v3515_v21  }
  0x6c   :  { %1153 = vperm.xlu1 %3638, %v3512_v0  }
  0x6d   :  { %1201 = vperm.xlu0 %3637, %v3524_v23  }
  0x70   :  { %747 = vperm.xlu1 %3638, %v3505_v5  }
  0x71   :  { %1209 = vperm.xlu0 %3637, %v3526_v26  }
  0x74   :  { %1189 = vperm.xlu1 %3638, %v3521_v8  }
  0x75   :  { %1217 = vperm.xlu0 %3637, %v3528_v27  }
  0x78   :  { %1161 = vperm.xlu1 %3638, %v3514_v12  }
  0x7c   :  { %755 = vperm.xlu1 %3638, %v3507_v14  }
  0x80   :  { %1197 = vperm.xlu1 %3638, %v3523_v16  }
  0x84   :  { %1205 = vperm.xlu1 %3638, %v3525_v20  }
  0x88   :  { %1213 = vperm.xlu1 %3638, %v3527_v22  }
  0x94   :  { %v124_v28 = vpop.xlane.xlu1 %123  ;;  %v117_v29 = vpop.xlane.xlu0 %116 }
  0x95   :  { %3639 = vrsqrt.f32 %v124_v28  ;;  %vm156_vm3 = vcmp.eq.f32.partialorder %v124_v28, inf  ;;  %vm158_vm4 = vcmp.eq.f32.partialorder %v124_v28, 0.0  ;;  %v159_v37 = vand.u32 2147483648, %v124_v28 }
  0x96   :  { %3641 = vrsqrt.f32 %v117_v29  ;;  %vm142_vm5 = vcmp.eq.f32.partialorder %v117_v29, inf  ;;  %vm144_vm6 = vcmp.eq.f32.partialorder %v117_v29, 0.0  ;;  %v145_v40 = vand.u32 2147483648, %v117_v29 }
  0x98   :  { %v4339_v32 = vpop.xlane.xlu1 %126  ;;  %v4341_v33 = vpop.xlane.xlu0 %120 }
  0x99   :  { %3643 = vrsqrt.f32 %v4339_v32  ;;  %vm163_vm7 = vcmp.eq.f32.partialorder %v4339_v32, inf  ;;  %vm165_vm8 = vcmp.eq.f32.partialorder %v4339_v32, 0.0  ;;  %v166_v45 = vand.u32 2147483648, %v4339_v32 }
  0x9a   :  { %3645 = vrsqrt.f32 %v4341_v33  ;;  %vm149_vm9 = vcmp.eq.f32.partialorder %v4341_v33, inf  ;;  %vm151_vm10 = vcmp.eq.f32.partialorder %v4341_v33, 0.0  ;;  %v152_v49 = vand.u32 2147483648, %v4341_v33 }
  0x9c   :  { %v4345_v34 = vpop.xlane.xlu1 %132  ;;  %v4347_v35 = vpop.xlane.xlu0 %129 }
  0x9d   :  { %3647 = vrsqrt.f32 %v4345_v34  ;;  %vm177_vm11 = vcmp.eq.f32.partialorder %v4345_v34, inf  ;;  %vm179_vm12 = vcmp.eq.f32.partialorder %v4345_v34, 0.0  ;;  %v180_v50 = vand.u32 2147483648, %v4345_v34 }
  0x9e   :  { %3649 = vrsqrt.f32 %v4347_v35  ;;  %vm170_vm13 = vcmp.eq.f32.partialorder %v4347_v35, inf  ;;  %vm172_vm14 = vcmp.eq.f32.partialorder %v4347_v35, 0.0  ;;  %v173_v57 = vand.u32 2147483648, %v4347_v35 }
  0x9f   :  { %v3640_v36 = vpop.eup %3639 }
  0xa0   :  { %v3642_v38 = vpop.eup %3641  ;;  %v155_v39 = vmul.f32 %v3640_v36, %v124_v28  ;;  %v4352_v41 = vpop.xlane.xlu1 %138 }
  0xa1   :  { %v4354_v42 = vpop.xlane.xlu0 %135  ;;  %v141_v44 = vmul.f32 %v3642_v38, %v117_v29  ;;  %3651 = vrsqrt.f32 %v4352_v41  ;;  %vm191_vm15 = vcmp.eq.f32.partialorder %v4352_v41, inf  ;;  %vm193_vm1 = vcmp.eq.f32.partialorder %v4352_v41, 0.0 }
  0xa2   :  { %v157_v47 = vsel %vm156_vm3, %v124_v28, %v155_v39  ;;  %3653 = vrsqrt.f32 %v4354_v42  ;;  %v194_v59 = vand.u32 2147483648, %v4352_v41  ;;  %vm184_vm3 = vcmp.eq.f32.partialorder %v4354_v42, inf }
  0xa3   :  { %v3644_v48 = vpop.eup %3643  ;;  %v143_v52 = vsel %vm142_vm5, %v117_v29, %v141_v44  ;;  %v160_v58 = vsel %vm158_vm4, %v159_v37, %v157_v47  ;;  %vm186_vm4 = vcmp.eq.f32.partialorder %v4354_v42, 0.0  ;;  %v187_v5 = vand.u32 2147483648, %v4354_v42 }
  0xa4   :  { %v3646_v51 = vpop.eup %3645  ;;  %v162_v53 = vmul.f32 %v3644_v48, %v4339_v32  ;;  %v4370_v54 = vpop.xlane.xlu1 %59  ;;  %v146_v63 = vsel %vm144_vm6, %v145_v40, %v143_v52  ;;  %v198_v11 = vmax.f32 %v160_v58, 1e-12 }
  0xa5   :  { %v4372_v55 = vpop.xlane.xlu0 %56  ;;  %v148_v56 = vmul.f32 %v3646_v51, %v4341_v33  ;;  %3655 = vrsqrt.f32 %v4370_v54  ;;  %vm76_vm5 = vcmp.eq.f32.partialorder %v4370_v54, inf  ;;  %v196_v15 = vmax.f32 %v146_v63, 1e-12 }
  0xa6   :  { %3657 = vrsqrt.f32 %v4372_v55  ;;  %v164_v61 = vsel %vm163_vm7, %v4339_v32, %v162_v53  ;;  %vm78_vm6 = vcmp.eq.f32.partialorder %v4370_v54, 0.0  ;;  %v79_v22 = vand.u32 2147483648, %v4370_v54 }
  0xa7   :  { %v3648_v60 = vpop.eup %3647  ;;  %v150_v62 = vsel %vm149_vm9, %v4341_v33, %v148_v56  ;;  %v167_v16 = vsel %vm165_vm8, %v166_v45, %v164_v61  ;;  %vm69_vm7 = vcmp.eq.f32.partialorder %v4372_v55, inf  ;;  %vm71_vm8 = vcmp.eq.f32.partialorder %v4372_v55, 0.0 }
  0xa8   :  { %v3650_v0 = vpop.eup %3649  ;;  %v176_v4 = vmul.f32 %v3648_v60, %v4345_v34  ;;  %v4393_v6 = vpop.xlane.xlu1 %65  ;;  %v153_v13 = vsel %vm151_vm10, %v152_v49, %v150_v62  ;;  %v199_v32 = vmax.f32 %v167_v16, 1e-12  ;;  %v72_v36 = vand.u32 2147483648, %v4372_v55 }
  0xa9   :  { %v4395_v8 = vpop.xlane.xlu0 %62  ;;  %v169_v12 = vmul.f32 %v3650_v0, %v4347_v35  ;;  %3659 = vrsqrt.f32 %v4393_v6  ;;  %v197_v28 = vmax.f32 %v153_v13, 1e-12  ;;  %vm90_vm9 = vcmp.eq.f32.partialorder %v4393_v6, inf }
  0xaa   :  { %v178_v14 = vsel %vm177_vm11, %v4345_v34, %v176_v4  ;;  %3661 = vrsqrt.f32 %v4395_v8  ;;  %vm92_vm10 = vcmp.eq.f32.partialorder %v4393_v6, 0.0  ;;  %vm83_vm11 = vcmp.eq.f32.partialorder %v4395_v8, inf }
  0xab   :  { %v3652_v17 = vpop.eup %3651  ;;  %v181_v20 = vsel %vm179_vm12, %v180_v50, %v178_v14  ;;  %v171_v21 = vsel %vm170_vm13, %v4347_v35, %v169_v12  ;;  %3663 = vrcp.f32 %v198_v11  ;;  %v93_v50 = vand.u32 2147483648, %v4393_v6  ;;  %vm4464_vm13 = vmpackc.low %vm54_vm0, %vm54_vm0 }
  0xac   :  { %v3654_v23 = vpop.eup %3653  ;;  %v174_v26 = vsel %vm172_vm14, %v173_v57, %v171_v21  ;;  %v190_v27 = vmul.f32 %v3652_v17, %v4352_v41  ;;  %v201_v33 = vmax.f32 %v181_v20, 1e-12  ;;  %3665 = vrcp.f32 %v196_v15 }
  0xad   :  { %v183_v29 = vmul.f32 %v3654_v23, %v4354_v42  ;;  %v200_v37 = vmax.f32 %v174_v26, 1e-12  ;;  %3667 = vrcp.f32 %v197_v28  ;;  %v86_v53 = vand.u32 2147483648, %v4395_v8 }
  0xae   :  { %v192_v34 = vsel %vm191_vm15, %v4352_v41, %v190_v27  ;;  %3669 = vrcp.f32 %v199_v32  ;;  %vm85_vm12 = vcmp.eq.f32.partialorder %v4395_v8, 0.0 }
  0xaf   :  { %v3656_v35 = vpop.eup %3655  ;;  %v195_v38 = vsel %vm193_vm1, %v194_v59, %v192_v34  ;;  %v185_v39 = vsel %vm184_vm3, %v4354_v42, %v183_v29  ;;  %3671 = vrcp.f32 %v201_v33 }
  0xb0   :  { %v3658_v40 = vpop.eup %3657  ;;  %v203_v44 = vmax.f32 %v195_v38, 1e-12  ;;  %v188_v45 = vsel %vm186_vm4, %v187_v5, %v185_v39  ;;  %v75_v47 = vmul.f32 %v3656_v35, %v4370_v54  ;;  %3673 = vrcp.f32 %v200_v37  ;;  %v4513_v37 = vpop.permute.xlu0 %675 }
  0xb1   :  { %v202_v48 = vmax.f32 %v188_v45, 1e-12  ;;  %v68_v49 = vmul.f32 %v3658_v40, %v4372_v55 }
  0xb2   :  { %v77_v41 = vsel %vm76_vm5, %v4370_v54, %v75_v47  ;;  %3675 = vrcp.f32 %v203_v44 }
  0xb3   :  { %v3660_v42 = vpop.eup %3659  ;;  %v80_v51 = vsel %vm78_vm6, %v79_v22, %v77_v41  ;;  %v70_v52 = vsel %vm69_vm7, %v4372_v55, %v68_v49  ;;  %3677 = vrcp.f32 %v202_v48 }
  0xb4   :  { %v3662_v56 = vpop.eup %3661  ;;  %v96_v57 = vmax.f32 %v80_v51, 1e-12  ;;  %v73_v58 = vsel %vm71_vm8, %v72_v36, %v70_v52  ;;  %v89_v59 = vmul.f32 %v3660_v42, %v4393_v6  ;;  %v4517_v39 = vpop.permute.xlu0 %723 }
  0xb5   :  { %v95_v60 = vmax.f32 %v73_v58, 1e-12  ;;  %v82_v61 = vmul.f32 %v3662_v56, %v4395_v8  ;;  %v3664_v62 = vpop.eup %3663 }
  0xb6   :  { %v91_v54 = vsel %vm90_vm9, %v4393_v6, %v89_v59  ;;  %3679 = vrcp.f32 %v96_v57  ;;  %v3666_v0 = vpop.eup %3665 }
  0xb7   :  { %v94_v63 = vsel %vm92_vm10, %v93_v50, %v91_v54  ;;  %v84_v55 = vsel %vm83_vm11, %v4395_v8, %v82_v61  ;;  %3681 = vrcp.f32 %v95_v60  ;;  %v3668_v11 = vpop.eup %3667  ;;  %v224_v14 = vmul.f32 %v3666_v0, %v4119_v2 }
  0xb8   :  { %v87_v4 = vsel %vm85_vm12, %v86_v53, %v84_v55  ;;  %v98_v12 = vmax.f32 %v94_v63, 1e-12  ;;  %v3670_v13 = vpop.eup %3669  ;;  %v225_v15 = vmul.f32 %v3668_v11, %v4135_v7  ;;  %v226_v8 = vmul.f32 %v3664_v62, %v4114_v1  ;;  %v4521_v44 = vpop.permute.xlu0 %727 }
  0xb9   :  { %v97_v5 = vmax.f32 %v87_v4, 1e-12  ;;  %v3672_v16 = vpop.eup %3671  ;;  %v227_v17 = vmul.f32 %v3670_v13, %v4124_v3 }
  0xba   :  { %v3674_v20 = vpop.eup %3673  ;;  %v3608_v21 = vpack.c.bf16 %v225_v15, %v224_v14  ;;  %v229_v3 = vmul.f32 %v3672_v16, %v4142_v9 }
  0xbb   :  { %3683 = vrcp.f32 %v97_v5  ;;  %v3612_v23 = vpack.c.bf16 %v227_v17, %v226_v8  ;;  %v228_v1 = vmul.f32 %v3674_v20, %v4147_v10 }
  0xbc   :  { %v3676_v22 = vpop.eup %3675  ;;  %3685 = vrcp.f32 %v98_v12  ;;  %3610 = vmatpush3.bf16.xpose.msk.msra.mxu0 %vm4464_vm13, %v3608_v21  ;;  %v4525_v47 = vpop.permute.xlu0 %731 }
  0xbd   :  { %v3678_v2 = vpop.eup %3677  ;;  %3614 = vmatpush3.bf16.xpose.msk.msra.mxu1 %vm4464_vm13, %v3612_v23  ;;  %3615 = vmatprep.subr.bf16.mxu0 %v4048_v43  ;;  %v231_v29 = vmul.f32 %v3676_v22, %v4160_v18  ;;  %v3616_v33 = vpack.c.bf16 %v229_v3, %v228_v1 }
  0xbe   :  { %3619 = vmatprep.subr.bf16.mxu1 %v4048_v43  ;;  %v230_v28 = vmul.f32 %v3678_v2, %v4165_v19  ;;  %v4499_v19 = vpop.permute.xlu1 %679 }
  0xc0   :  { %v3680_v7 = vpop.eup %3679  ;;  %v3620_v34 = vpack.c.bf16 %v231_v29, %v230_v28  ;;  %v4529_v49 = vpop.permute.xlu0 %735 }
  0xc1   :  { %v3682_v26 = vpop.eup %3681  ;;  %v221_v32 = vmul.f32 %v3680_v7, %v4176_v24 }
  0xc2   :  { %v220_v27 = vmul.f32 %v3682_v26, %v4181_v25  ;;  %v4501_v24 = vpop.permute.xlu1 %707 }
  0xc4   :  { %3563 = vmatmul.mubr.msk.f32.vlgmr.msra.gmra.mrb[0].mxu0 %vm54_vm0, %v220_v27  ;;  %3570 = vmatmul.mubr.msk.f32.vlgmr.msra.gmra.mrb[0].mxu1 %vm54_vm0, %v221_v32  ;;  %v4533_v50 = vpop.permute.xlu0 %1141 }
  0xc5   :  { %v3684_v36 = vpop.eup %3683  ;;  %3618 = vmatpush3.bf16.xpose.msk.msra.mxu0 %vm4464_vm13, %v3616_v33  ;;  %3622 = vmatpush3.bf16.xpose.msk.msra.mxu1 %vm4464_vm13, %v3620_v34 }
  0xc6   :  { %v3686_v10 = vpop.eup %3685  ;;  %3583 = vmatprep.mubr.msk.f32.mxu1 %vm6704_vm2, %v6682_v46  ;;  %3576 = vmatprep.mubr.msk.f32.mxu0 %vm6704_vm2, %v6682_v46  ;;  %v222_v9 = vmul.f32 %v3684_v36, %v4197_v31  ;;  %v4503_v25 = vpop.permute.xlu1 %711 }
  0xc7   :  { %3627 = vmatprep.subr.bf16.mxu1 %v4048_v43  ;;  %v223_v18 = vmul.f32 %v3686_v10, %v4192_v30 }
  0xc8   :  { %v4557_v17 = vpop.permute.xlu0 %1173 }
  0xca   :  { %v4505_v35 = vpop.permute.xlu1 %683 }
  0xcc   :  { %3577 = vmatmul.mubr.msk.f32.vlgmr.msra.gmra.mrb[2].mxu0 %vm54_vm0, %v222_v9  ;;  %3584 = vmatmul.mubr.msk.f32.vlgmr.msra.gmra.mrb[2].mxu1 %vm54_vm0, %v223_v18  ;;  %vm1472_vm0 = vcmask 97280  }
  0xcd   :  { %3599 = vmatprep.mubr.msk.f32.mxu1 %vm6704_vm2, %v6682_v46 }
  0xce   :  { %v4507_v43 = vpop.permute.xlu1 %715 }
  0xd2   :  { %v4509_v31 = vpop.permute.xlu1 %687 }
  0xd6   :  { %v4511_v30 = vpop.permute.xlu1 %719 }
  0xda   :  { %v4515_v38 = vpop.permute.xlu1 %691 }
  0xde   :  { %v4519_v40 = vpop.permute.xlu1 %695 }
  0xe2   :  { %v4523_v45 = vpop.permute.xlu1 %699 }
  0xe6   :  { %v4527_v48 = vpop.permute.xlu1 %703 }
  0xea   :  { %v4531_v41 = vpop.permute.xlu1 %1137 }
  0xee   :  { %v4555_v5 = vpop.permute.xlu1 %1169 }
  0xf2   :  { %v4574_v9 = vpop.permute.xlu1 %1145 }
 0x197   :  { %v4535_v42 = vpop.f32.mrb[0].mxu0  ;;  %v4537_v51 = vpop.f32.mrb[0].mxu1 }
 0x198   :  { %v3564_v52 = vpop.f32.mrb[1].mxu0  ;;  %v758_v53 = vsub.f32 %v4535_v42, %v4513_v37  ;;  %v762_v56 = vsub.f32 %v4535_v42, %v4499_v19  ;;  %v790_v57 = vsub.f32 %v4535_v42, %v4501_v24  ;;  %v794_v58 = vsub.f32 %v4535_v42, %v4503_v25  ;;  %v3571_v59 = vpop.f32.mrb[1].mxu1 }
 0x199   :  { %v759_v60 = vsub.f32 %v4537_v51, %v4513_v37  ;;  %v763_v61 = vsub.f32 %v4537_v51, %v4499_v19  ;;  %v791_v54 = vsub.f32 %v4537_v51, %v4501_v24  ;;  %v795_v62 = vsub.f32 %v4537_v51, %v4503_v25 }
 0x19a   :  { %v842_v63 = vmul.f32 %v758_v53, %v758_v53  ;;  %v846_v55 = vmul.f32 %v762_v56, %v762_v56  ;;  %v874_v0 = vmul.f32 %v790_v57, %v790_v57  ;;  %v878_v4 = vmul.f32 %v794_v58, %v794_v58 }
 0x19b   :  { %v843_v11 = vmul.f32 %v759_v60, %v759_v60  ;;  %v847_v12 = vmul.f32 %v763_v61, %v763_v61  ;;  %v875_v13 = vmul.f32 %v791_v54, %v791_v54  ;;  %v879_v14 = vmul.f32 %v795_v62, %v795_v62  ;;  %v4579_v60 = vpop.permute.xlu0 %1177 }
 0x19c   :  { %v926_v15 = vsub.f32 0.0, %v842_v63  ;;  %v930_v16 = vsub.f32 0.0, %v846_v55  ;;  %v958_v6 = vsub.f32 0.0, %v874_v0  ;;  %v962_v8 = vsub.f32 0.0, %v878_v4 }
 0x19d   :  { %v927_v20 = vsub.f32 0.0, %v843_v11  ;;  %v931_v21 = vsub.f32 0.0, %v847_v12  ;;  %v959_v22 = vsub.f32 0.0, %v875_v13  ;;  %v963_v26 = vsub.f32 0.0, %v879_v14 }
 0x19e   :  { %v1220_v23 = vmul.f32 %v4531_v41, %v926_v15  ;;  %v1224_v2 = vmul.f32 %v4533_v50, %v930_v16  ;;  %v1252_v7 = vmul.f32 %v4555_v5, %v958_v6  ;;  %v1256_v33 = vmul.f32 %v4557_v17, %v962_v8  ;;  %v4587_v6 = vpop.permute.xlu1 %1149 }
 0x19f   :  { %v4562_v1 = vpop.f32.mrb[2].mxu0  ;;  %v1221_v3 = vmul.f32 %v4531_v41, %v927_v20  ;;  %v1225_v27 = vmul.f32 %v4533_v50, %v931_v21  ;;  %v1253_v28 = vmul.f32 %v4555_v5, %v959_v22  ;;  %v4567_v29 = vpop.f32.mrb[2].mxu1  ;;  %v767_v34 = vsub.f32 %v4537_v51, %v4505_v35 }
 0x1a0   :  { %v1304_v32 = vmul.f32 1.442695, %v1220_v23  ;;  %v766_v36 = vsub.f32 %v4535_v42, %v4505_v35  ;;  %v3578_v10 = vpop.f32.mrb[3].mxu0  ;;  %v1312_v53 = vmul.f32 1.442695, %v1224_v2  ;;  %v799_v56 = vsub.f32 %v4537_v51, %v4507_v43  ;;  %v3585_v63 = vpop.f32.mrb[3].mxu1 }
 0x1a1   :  { %v1306_v18 = vmul.f32 1.442695, %v1221_v3  ;;  %v1314_v52 = vmul.f32 1.442695, %v1225_v27  ;;  %v1370_v57 = vmul.f32 1.442695, %v1253_v28  ;;  %v1257_v59 = vmul.f32 %v4557_v17, %v963_v26  ;;  %v4591_v2 = vpop.permute.xlu0 %1181 }
 0x1a2   :  { %3687 = vpow2.f32 %v1304_v32  ;;  %v1368_v58 = vmul.f32 1.442695, %v1252_v7  ;;  %v851_v61 = vmul.f32 %v767_v34, %v767_v34  ;;  %v850_v54 = vmul.f32 %v766_v36, %v766_v36 }
 0x1a3   :  { %3689 = vpow2.f32 %v1306_v18  ;;  %v883_v62 = vmul.f32 %v799_v56, %v799_v56  ;;  %v798_v55 = vsub.f32 %v4535_v42, %v4507_v43  ;;  %v770_v0 = vsub.f32 %v4535_v42, %v4509_v31 }
 0x1a4   :  { %3691 = vpow2.f32 %v1314_v52  ;;  %v771_v4 = vsub.f32 %v4537_v51, %v4509_v31  ;;  %v935_v11 = vsub.f32 0.0, %v851_v61  ;;  %v934_v12 = vsub.f32 0.0, %v850_v54 }
 0x1a5   :  { %3693 = vpow2.f32 %v1312_v53  ;;  %v967_v13 = vsub.f32 0.0, %v883_v62  ;;  %v1378_v14 = vmul.f32 1.442695, %v1257_v59  ;;  %v882_v15 = vmul.f32 %v798_v55, %v798_v55  ;;  %v4603_v53 = vpop.permute.xlu1 %739  ;;  %v4607_v55 = vpop.permute.xlu0 %743 }
 0x1a6   :  { %v854_v16 = vmul.f32 %v770_v0, %v770_v0  ;;  %3695 = vpow2.f32 %v1370_v57  ;;  %v1229_v8 = vmul.f32 %v4574_v9, %v935_v11  ;;  %v855_v20 = vmul.f32 %v771_v4, %v771_v4  ;;  %6719 = vst [vmem:[#allocation6_spill] sm:$0xff] %v4603_v53  ;;  %6720 = vst [vmem:[#allocation7_spill] sm:$0xff] %v4607_v55 }
 0x1a7   :  { %v1376_v21 = vmul.f32 1.442695, %v1256_v33  ;;  %v1228_v22 = vmul.f32 %v4574_v9, %v934_v12  ;;  %v966_v23 = vsub.f32 0.0, %v882_v15  ;;  %3697 = vpow2.f32 %v1368_v58 }
 0x1a8   :  { %v1261_v7 = vmul.f32 %v4579_v60, %v967_v13  ;;  %3699 = vpow2.f32 %v1378_v14  ;;  %v1322_v26 = vmul.f32 1.442695, %v1229_v8  ;;  %v938_v3 = vsub.f32 0.0, %v854_v16 }
 0x1a9   :  { %v803_v27 = vsub.f32 %v4537_v51, %v4511_v30  ;;  %v939_v28 = vsub.f32 0.0, %v855_v20  ;;  %v802_v32 = vsub.f32 %v4535_v42, %v4511_v30  ;;  %v775_v33 = vsub.f32 %v4537_v51, %v4515_v38 }
 0x1aa   :  { %v774_v34 = vsub.f32 %v4535_v42, %v4515_v38  ;;  %3701 = vpow2.f32 %v1376_v21  ;;  %v1320_v10 = vmul.f32 1.442695, %v1228_v22  ;;  %v1260_v18 = vmul.f32 %v4579_v60, %v966_v23 }
 0x1ab   :  { %v887_v57 = vmul.f32 %v803_v27, %v803_v27  ;;  %v886_v58 = vmul.f32 %v802_v32, %v802_v32  ;;  %3703 = vpow2.f32 %v1322_v26  ;;  %v859_v54 = vmul.f32 %v775_v33, %v775_v33 }
 0x1ac   :  { %v3688_v36 = vpop.eup %3687  ;;  %v858_v62 = vmul.f32 %v774_v34, %v774_v34  ;;  %v1386_v0 = vmul.f32 1.442695, %v1261_v7  ;;  %v1232_v4 = vmul.f32 %v4587_v6, %v938_v3  ;;  %v1233_v11 = vmul.f32 %v4587_v6, %v939_v28  ;;  %v4618_v3 = vpop.permute.xlu1 %1153 }
 0x1ad   :  { %v3690_v52 = vpop.eup %3689  ;;  %v1473_v56 = vsel %vm1472_vm0, %v3688_v36, 0.0  ;;  %v971_v12 = vsub.f32 0.0, %v887_v57  ;;  %3705 = vpow2.f32 %v1320_v10  ;;  %v1384_v13 = vmul.f32 1.442695, %v1260_v18  ;;  %v4622_v18 = vpop.permute.xlu0 %1185 }
 0x1ae   :  { %v3692_v59 = vpop.eup %3691  ;;  %v1476_v61 = vsel %vm1472_vm0, %v3690_v52, 0.0  ;;  %1474 = vadd.xlane.f32.xlu1 %v1473_v56  ;;  %v970_v14 = vsub.f32 0.0, %v886_v58  ;;  %v943_v8 = vsub.f32 0.0, %v859_v54  ;;  %v942_v20 = vsub.f32 0.0, %v858_v62 }
 0x1af   :  { %v3694_v63 = vpop.eup %3693  ;;  %1477 = vadd.xlane.f32.xlu0 %v1476_v61  ;;  %v1488_v16 = vsel %vm1472_vm0, %v3692_v59, 0.0  ;;  %v807_v21 = vsub.f32 %v4537_v51, %v4517_v39  ;;  %v1265_v23 = vmul.f32 %v4591_v2, %v971_v12  ;;  %v806_v7 = vsub.f32 %v4535_v42, %v4517_v39 }
 0x1b0   :  { %v3696_v15 = vpop.eup %3695  ;;  %v1485_v22 = vsel %vm1472_vm0, %v3694_v63, 0.0  ;;  %3707 = vpow2.f32 %v1386_v0  ;;  %v1328_v27 = vmul.f32 1.442695, %v1232_v4  ;;  %v1330_v28 = vmul.f32 1.442695, %v1233_v11 }
 0x1b1   :  { %v3698_v26 = vpop.eup %3697  ;;  %v891_v32 = vmul.f32 %v807_v21, %v807_v21  ;;  %v1572_v34 = vsel %vm1472_vm0, %v3696_v15, 0.0  ;;  %3709 = vpow2.f32 %v1384_v13  ;;  %v1264_v36 = vmul.f32 %v4591_v2, %v970_v14  ;;  %v4633_v14 = vpop.permute.xlu1 %747 }
 0x1b2   :  { %1489 = vadd.xlane.f32.xlu1 %v1488_v16  ;;  %v3700_v33 = vpop.eup %3699  ;;  %v890_v10 = vmul.f32 %v806_v7, %v806_v7  ;;  %v1237_v52 = vmul.f32 %v4618_v3, %v943_v8  ;;  %v1236_v56 = vmul.f32 %v4618_v3, %v942_v20  ;;  %v779_v57 = vsub.f32 %v4537_v51, %v4519_v40 }
 0x1b3   :  { %1486 = vadd.xlane.f32.xlu0 %v1485_v22  ;;  %v778_v58 = vsub.f32 %v4535_v42, %v4519_v40  ;;  %v1569_v61 = vsel %vm1472_vm0, %v3698_v26, 0.0  ;;  %v1394_v54 = vmul.f32 1.442695, %v1265_v23  ;;  %v975_v62 = vsub.f32 0.0, %v891_v32  ;;  %v4640_v26 = vpop.permute.xlu0 %1157 }
 0x1b4   :  { %v3702_v59 = vpop.eup %3701  ;;  %v811_v63 = vsub.f32 %v4537_v51, %v4521_v44  ;;  %3711 = vpow2.f32 %v1328_v27  ;;  %v974_v0 = vsub.f32 0.0, %v890_v10  ;;  %v863_v4 = vmul.f32 %v779_v57, %v779_v57 }
 0x1b5   :  { %v3704_v11 = vpop.eup %3703  ;;  %3713 = vpow2.f32 %v1330_v28  ;;  %v1392_v12 = vmul.f32 1.442695, %v1264_v36  ;;  %v862_v13 = vmul.f32 %v778_v58, %v778_v58  ;;  %v1584_v15 = vsel %vm1472_vm0, %v3700_v33, 0.0 }
 0x1b6   :  { %1573 = vadd.xlane.f32.xlu1 %v1572_v34  ;;  %v1581_v16 = vsel %vm1472_vm0, %v3702_v59, 0.0  ;;  %v1338_v8 = vmul.f32 1.442695, %v1237_v52  ;;  %v1336_v20 = vmul.f32 1.442695, %v1236_v56  ;;  %3715 = vpow2.f32 %v1394_v54 }
 0x1b7   :  { %1570 = vadd.xlane.f32.xlu0 %v1569_v61  ;;  %v3706_v21 = vpop.eup %3705  ;;  %v1269_v22 = vmul.f32 %v4622_v18, %v975_v62  ;;  %v895_v23 = vmul.f32 %v811_v63, %v811_v63  ;;  %v810_v7 = vsub.f32 %v4535_v42, %v4521_v44  ;;  %v1500_v27 = vsel %vm1472_vm0, %v3704_v11, 0.0  ;;  %v4651_v62 = vpop.permute.xlu1 %1189 }
 0x1b8   :  { %v1268_v28 = vmul.f32 %v4622_v18, %v974_v0  ;;  %v947_v32 = vsub.f32 0.0, %v863_v4  ;;  %3717 = vpow2.f32 %v1392_v12  ;;  %v946_v33 = vsub.f32 0.0, %v862_v13 }
 0x1b9   :  { %v894_v34 = vmul.f32 %v810_v7, %v810_v7  ;;  %v783_v36 = vsub.f32 %v4537_v51, %v4523_v45  ;;  %v1497_v52 = vsel %vm1472_vm0, %v3706_v21, 0.0  ;;  %3719 = vpow2.f32 %v1338_v8 }
 0x1ba   :  { %1585 = vadd.xlane.f32.xlu1 %v1584_v15  ;;  %v3708_v10 = vpop.eup %3707  ;;  %v782_v56 = vsub.f32 %v4535_v42, %v4523_v45  ;;  %v815_v57 = vsub.f32 %v4537_v51, %v4525_v47  ;;  %3721 = vpow2.f32 %v1336_v20  ;;  %v1402_v59 = vmul.f32 1.442695, %v1269_v22  ;;  %v4655_v15 = vpop.permute.xlu0 %751 }
 0x1bb   :  { %1582 = vadd.xlane.f32.xlu0 %v1581_v16  ;;  %v3710_v58 = vpop.eup %3709  ;;  %v979_v61 = vsub.f32 0.0, %v895_v23  ;;  %v867_v54 = vmul.f32 %v783_v36, %v783_v36  ;;  %v1400_v63 = vmul.f32 1.442695, %v1268_v28  ;;  %v1241_v0 = vmul.f32 %v4640_v26, %v947_v32 }
 0x1bc   :  { %v1240_v4 = vmul.f32 %v4640_v26, %v946_v33  ;;  %v978_v11 = vsub.f32 0.0, %v894_v34  ;;  %v866_v12 = vmul.f32 %v782_v56, %v782_v56  ;;  %v1596_v16 = vsel %vm1472_vm0, %v3708_v10, 0.0 }
 0x1bd   :  { %v899_v8 = vmul.f32 %v815_v57, %v815_v57  ;;  %v814_v20 = vsub.f32 %v4535_v42, %v4525_v47  ;;  %v1593_v22 = vsel %vm1472_vm0, %v3710_v58, 0.0  ;;  %3723 = vpow2.f32 %v1402_v59 }
 0x1be   :  { %1501 = vadd.xlane.f32.xlu1 %v1500_v27  ;;  %v3712_v13 = vpop.eup %3711  ;;  %v1273_v23 = vmul.f32 %v4651_v62, %v979_v61  ;;  %v951_v7 = vsub.f32 0.0, %v867_v54  ;;  %3725 = vpow2.f32 %v1400_v63  ;;  %v1346_v27 = vmul.f32 1.442695, %v1241_v0 }
 0x1bf   :  { %1498 = vadd.xlane.f32.xlu0 %v1497_v52  ;;  %v3714_v21 = vpop.eup %3713  ;;  %v787_v28 = vsub.f32 %v4537_v51, %v4527_v48  ;;  %v1344_v33 = vmul.f32 1.442695, %v1240_v4  ;;  %v1272_v34 = vmul.f32 %v4651_v62, %v978_v11  ;;  %v950_v36 = vsub.f32 0.0, %v866_v12  ;;  %v4667_v52 = vpop.permute.xlu1 %1161 }
 0x1c0   :  { %v3716_v32 = vpop.eup %3715  ;;  %v786_v10 = vsub.f32 %v4535_v42, %v4527_v48  ;;  %v1509_v56 = vsel %vm1472_vm0, %v3712_v13, 0.0  ;;  %v1512_v57 = vsel %vm1472_vm0, %v3714_v21, 0.0  ;;  %v983_v58 = vsub.f32 0.0, %v899_v8  ;;  %v4674_v12 = vpop.permute.xlu0 %1193 }
 0x1c1   :  { %v898_v59 = vmul.f32 %v814_v20, %v814_v20  ;;  %v1410_v54 = vmul.f32 1.442695, %v1273_v23  ;;  %v1245_v63 = vmul.f32 %v4667_v52, %v951_v7  ;;  %v871_v0 = vmul.f32 %v787_v28, %v787_v28 }
 0x1c2   :  { %1597 = vadd.xlane.f32.xlu1 %v1596_v16  ;;  %v3718_v61 = vpop.eup %3717  ;;  %v819_v4 = vsub.f32 %v4537_v51, %v4529_v49  ;;  %v1608_v16 = vsel %vm1472_vm0, %v3716_v32, 0.0  ;;  %3727 = vpow2.f32 %v1346_v27  ;;  %v1408_v8 = vmul.f32 1.442695, %v1272_v34 }
 0x1c3   :  { %1594 = vadd.xlane.f32.xlu0 %v1593_v22  ;;  %v3720_v11 = vpop.eup %3719  ;;  %3729 = vpow2.f32 %v1344_v33  ;;  %v1244_v20 = vmul.f32 %v4667_v52, %v950_v36  ;;  %v870_v21 = vmul.f32 %v786_v10, %v786_v10  ;;  %v1605_v22 = vsel %vm1472_vm0, %v3718_v61, 0.0  ;;  %v4682_v27 = vpop.permute.xlu1 %755 }
 0x1c4   :  { %v3722_v13 = vpop.eup %3721  ;;  %v1277_v23 = vmul.f32 %v4674_v12, %v983_v58  ;;  %v982_v7 = vsub.f32 0.0, %v898_v59  ;;  %v818_v28 = vsub.f32 %v4535_v42, %v4529_v49  ;;  %3731 = vpow2.f32 %v1410_v54 }
 0x1c5   :  { %v903_v32 = vmul.f32 %v819_v4, %v819_v4  ;;  %v1524_v33 = vsel %vm1472_vm0, %v3720_v11, 0.0  ;;  %v1521_v34 = vsel %vm1472_vm0, %v3722_v13, 0.0  ;;  %3733 = vpow2.f32 %v1408_v8 }
 0x1c6   :  { %1510 = vadd.xlane.f32.xlu1 %v1509_v56  ;;  %v1354_v56 = vmul.f32 1.442695, %v1245_v63  ;;  %v1352_v10 = vmul.f32 1.442695, %v1244_v20  ;;  %v954_v58 = vsub.f32 0.0, %v870_v21  ;;  %v823_v59 = vsub.f32 %v4537_v51, %v4603_v53 }
 0x1c7   :  { %1513 = vadd.xlane.f32.xlu0 %v1512_v57  ;;  %v955_v57 = vsub.f32 0.0, %v871_v0  ;;  %v3724_v36 = vpop.eup %3723  ;;  %v1418_v54 = vmul.f32 1.442695, %v1277_v23  ;;  %v1276_v63 = vmul.f32 %v4674_v12, %v982_v7  ;;  %v902_v0 = vmul.f32 %v818_v28, %v818_v28 }
 0x1c8   :  { %v3726_v61 = vpop.eup %3725  ;;  %v822_v4 = vsub.f32 %v4535_v42, %v4603_v53  ;;  %3735 = vpow2.f32 %v1354_v56  ;;  %v987_v13 = vsub.f32 0.0, %v903_v32  ;;  %v827_v8 = vsub.f32 %v4537_v51, %v4607_v55 }
 0x1c9   :  { %v826_v20 = vsub.f32 %v4535_v42, %v4607_v55  ;;  %v1620_v21 = vsel %vm1472_vm0, %v3724_v36, 0.0  ;;  %v907_v7 = vmul.f32 %v823_v59, %v823_v59  ;;  %3737 = vpow2.f32 %v1352_v10 }
 0x1ca   :  { %1609 = vadd.xlane.f32.xlu1 %v1608_v16  ;;  %v4688_v16 = vpop.permute.xlu0 %1165  ;;  %v1416_v56 = vmul.f32 1.442695, %v1276_v63  ;;  %v906_v32 = vmul.f32 %v822_v4, %v822_v4  ;;  %3739 = vpow2.f32 %v1418_v54  ;;  %v911_v55 = vmul.f32 %v827_v8, %v827_v8 }
 0x1cb   :  { %1606 = vadd.xlane.f32.xlu0 %v1605_v22  ;;  %6721 = vst [vmem:[#allocation8_spill] sm:$0xff] %v4688_v16  ;;  %v1249_v11 = vmul.f32 %v4688_v16, %v955_v57  ;;  %v1617_v22 = vsel %vm1472_vm0, %v3726_v61, 0.0  ;;  %v1248_v23 = vmul.f32 %v4688_v16, %v954_v58  ;;  %v986_v57 = vsub.f32 0.0, %v902_v0 }
 0x1cc   :  { %v3728_v28 = vpop.eup %3727  ;;  %v910_v36 = vmul.f32 %v826_v20, %v826_v20  ;;  %v991_v16 = vsub.f32 0.0, %v907_v7  ;;  %v831_v10 = vsub.f32 %v4537_v51, %v4633_v14  ;;  %3741 = vpow2.f32 %v1416_v56 }
 0x1cd   :  { %v3730_v46 = vpop.eup %3729  ;;  %v1536_v58 = vsel %vm1472_vm0, %v3728_v28, 0.0  ;;  %v1360_v59 = vmul.f32 1.442695, %v1248_v23  ;;  %v990_v0 = vsub.f32 0.0, %v906_v32  ;;  %v830_v54 = vsub.f32 %v4535_v42, %v4633_v14 }
 0x1ce   :  { %1525 = vadd.xlane.f32.xlu1 %v1524_v33  ;;  %v4701_v33 = vpop.permute.xlu1 %1197  ;;  %v3732_v61 = vpop.eup %3731  ;;  %v995_v8 = vsub.f32 0.0, %v911_v55  ;;  %v915_v28 = vmul.f32 %v831_v10, %v831_v10  ;;  %v834_v56 = vsub.f32 %v4535_v42, %v4655_v15  ;;  %v835_v32 = vsub.f32 %v4537_v51, %v4655_v15 }
 0x1cf   :  { %1522 = vadd.xlane.f32.xlu0 %v1521_v34  ;;  %v1362_v34 = vmul.f32 1.442695, %v1249_v11  ;;  %v1281_v53 = vmul.f32 %v4701_v33, %v987_v13  ;;  %v1280_v63 = vmul.f32 %v4701_v33, %v986_v57  ;;  %v3734_v4 = vpop.eup %3733  ;;  %v1533_v11 = vsel %vm1472_vm0, %v3730_v46, 0.0  ;;  %v4711_v20 = vpop.permute.xlu0 %1201 }
 0x1d0   :  { %v1285_v7 = vmul.f32 %v4711_v20, %v991_v16  ;;  %v914_v55 = vmul.f32 %v830_v54, %v830_v54  ;;  %v918_v54 = vmul.f32 %v834_v56, %v834_v56  ;;  %v764_v56 = vsub.f32 %v4562_v1, %v4499_v19 }
 0x1d1   :  { %3743 = vpow2.f32 %v1362_v34  ;;  %v1426_v13 = vmul.f32 1.442695, %v1281_v53  ;;  %v1424_v46 = vmul.f32 1.442695, %v1280_v63  ;;  %v1284_v53 = vmul.f32 %v4711_v20, %v990_v0 }
 0x1d2   :  { %1621 = vadd.xlane.f32.xlu1 %v1620_v21  ;;  %v1632_v21 = vsel %vm1472_vm0, %v3732_v61, 0.0  ;;  %v3736_v23 = vpop.eup %3735  ;;  %3745 = vpow2.f32 %v1360_v59  ;;  %v4717_v57 = vpop.permute.xlu1 %1205  ;;  %v1629_v34 = vsel %vm1472_vm0, %v3734_v4, 0.0  ;;  %v839_v59 = vsub.f32 %v4537_v51, %v4682_v27 }
 0x1d3   :  { %1618 = vadd.xlane.f32.xlu0 %v1617_v22  ;;  %v994_v22 = vsub.f32 0.0, %v910_v36  ;;  %3747 = vpow2.f32 %v1426_v13  ;;  %v1289_v36 = vmul.f32 %v4717_v57, %v995_v8  ;;  %v3738_v16 = vpop.eup %3737  ;;  %v1548_v61 = vsel %vm1472_vm0, %v3736_v23, 0.0 }
 0x1d4   :  { %v3740_v10 = vpop.eup %3739  ;;  %v1434_v63 = vmul.f32 1.442695, %v1285_v7  ;;  %v999_v0 = vsub.f32 0.0, %v915_v28  ;;  %3749 = vpow2.f32 %v1424_v46  ;;  %v1432_v4 = vmul.f32 1.442695, %v1284_v53 }
 0x1d5   :  { %v998_v13 = vsub.f32 0.0, %v914_v55  ;;  %v919_v8 = vmul.f32 %v835_v32, %v835_v32  ;;  %v1442_v23 = vmul.f32 1.442695, %v1289_v36  ;;  %v1644_v51 = vsel %vm1472_vm0, %v3740_v10, 0.0 }
 0x1d6   :  { %1537 = vadd.xlane.f32.xlu1 %v1536_v58  ;;  %v1288_v58 = vmul.f32 %v4717_v57, %v994_v22  ;;  %v4731_v22 = vpop.permute.xlu0 %1209  ;;  %v923_v28 = vmul.f32 %v839_v59, %v839_v59  ;;  %3751 = vpow2.f32 %v1434_v63  ;;  %v1002_v53 = vsub.f32 0.0, %v918_v54  ;;  %v4741_v59 = vpop.permute.xlu1 %1213 }
 0x1d7   :  { %1534 = vadd.xlane.f32.xlu0 %v1533_v11  ;;  %v838_v11 = vsub.f32 %v4535_v42, %v4682_v27  ;;  %6722 = vst [vmem:[#allocation9_spill] sm:$0xff] %v4731_v22  ;;  %v1293_v46 = vmul.f32 %v4731_v22, %v999_v0  ;;  %3753 = vpow2.f32 %v1432_v4  ;;  %v1292_v32 = vmul.f32 %v4731_v22, %v998_v13 }
 0x1d8   :  { %v1440_v7 = vmul.f32 1.442695, %v1288_v58  ;;  %v1003_v36 = vsub.f32 0.0, %v919_v8  ;;  %3755 = vpow2.f32 %v1442_v23  ;;  %6723 = vst [vmem:[#allocation10_spill] sm:$0xff] %v4741_v59  ;;  %v1007_v63 = vsub.f32 0.0, %v923_v28 }
 0x1d9   :  { %v922_v55 = vmul.f32 %v838_v11, %v838_v11  ;;  %v848_v0 = vmul.f32 %v764_v56, %v764_v56  ;;  %v1450_v11 = vmul.f32 1.442695, %v1293_v46  ;;  %v1296_v4 = vmul.f32 %v4741_v59, %v1002_v53 }
 0x1da   :  { %1633 = vadd.xlane.f32.xlu1 %v1632_v21  ;;  %v1545_v21 = vsel %vm1472_vm0, %v3738_v16, 0.0  ;;  %v760_v16 = vsub.f32 %v4562_v1, %v4513_v37  ;;  %3757 = vpow2.f32 %v1440_v7  ;;  %v796_v8 = vsub.f32 %v4562_v1, %v4503_v25 }
 0x1db   :  { %1630 = vadd.xlane.f32.xlu0 %v1629_v34  ;;  %v3742_v34 = vpop.eup %3741  ;;  %v1006_v13 = vsub.f32 0.0, %v922_v55  ;;  %v761_v28 = vsub.f32 %v4567_v29, %v4513_v37  ;;  %v932_v53 = vsub.f32 0.0, %v848_v0  ;;  %v765_v55 = vsub.f32 %v4567_v29, %v4499_v19 }
 0x1dc   :  { %v3744_v42 = vpop.eup %3743  ;;  %v1641_v58 = vsel %vm1472_vm0, %v3742_v34, 0.0  ;;  %v1297_v34 = vmul.f32 %v4741_v59, %v1003_v36  ;;  %v844_v23 = vmul.f32 %v760_v16, %v760_v16  ;;  %3759 = vpow2.f32 %v1450_v11 }
 0x1dd   :  { %v1560_v10 = vsel %vm1472_vm0, %v3744_v42, 0.0  ;;  %v880_v16 = vmul.f32 %v796_v8, %v796_v8  ;;  %v1226_v0 = vmul.f32 %v4533_v50, %v932_v53  ;;  %v849_v19 = vmul.f32 %v765_v55, %v765_v55 }
 0x1de   :  { %1549 = vadd.xlane.f32.xlu1 %v1548_v61  ;;  %v3746_v61 = vpop.eup %3745  ;;  %v768_v11 = vsub.f32 %v4562_v1, %v4505_v35 }
 0x1df   :  { %1546 = vadd.xlane.f32.xlu0 %v1545_v21  ;;  %v3748_v54 = vpop.eup %3747  ;;  %v1448_v21 = vmul.f32 1.442695, %v1292_v32  ;;  %v1557_v7 = vsel %vm1472_vm0, %v3746_v61, 0.0  ;;  %v1456_v32 = vmul.f32 1.442695, %v1296_v4  ;;  %v964_v8 = vsub.f32 0.0, %v880_v16 }
 0x1e0   :  { %v3750_v56 = vpop.eup %3749  ;;  %v1656_v42 = vsel %vm1472_vm0, %v3748_v54, 0.0  ;;  %v1458_v61 = vmul.f32 1.442695, %v1297_v34  ;;  %v845_v54 = vmul.f32 %v761_v28, %v761_v28  ;;  %v933_v53 = vsub.f32 0.0, %v849_v19 }
 0x1e1   :  { %3761 = vpow2.f32 %v1448_v21  ;;  %v3752_v37 = vpop.eup %3751  ;;  %v793_v21 = vsub.f32 %v4567_v29, %v4501_v24  ;;  %v852_v55 = vmul.f32 %v768_v11, %v768_v11  ;;  %v769_v19 = vsub.f32 %v4567_v29, %v4505_v35 }
 0x1e2   :  { %1645 = vadd.xlane.f32.xlu1 %v1644_v51  ;;  %v792_v51 = vsub.f32 %v4562_v1, %v4501_v24  ;;  %v3754_v22 = vpop.eup %3753  ;;  %3763 = vpow2.f32 %v1456_v32  ;;  %v1258_v32 = vmul.f32 %v4557_v17, %v964_v8 }
 0x1e3   :  { %1642 = vadd.xlane.f32.xlu0 %v1641_v58  ;;  %v4750_v58 = vpop.permute.xlu0 %1217  ;;  %v3756_v4 = vpop.eup %3755  ;;  %3765 = vpow2.f32 %v1458_v61  ;;  %v877_v24 = vmul.f32 %v793_v21, %v793_v21 }
 0x1e4   :  { %v1301_v46 = vmul.f32 %v4750_v58, %v1007_v63  ;;  %v1300_v36 = vmul.f32 %v4750_v58, %v1006_v13  ;;  %v876_v59 = vmul.f32 %v792_v51, %v792_v51  ;;  %v3758_v34 = vpop.eup %3757  ;;  %v1680_v16 = vsel %vm1472_vm0, %v3756_v4, 0.0 }
 0x1e5   :  { %v1380_v11 = vmul.f32 1.442695, %v1258_v32  ;;  %v961_v4 = vsub.f32 0.0, %v877_v24 }
 0x1e6   :  { %1561 = vadd.xlane.f32.xlu1 %v1560_v10  ;;  %v928_v10 = vsub.f32 0.0, %v844_v23  ;;  %v1466_v63 = vmul.f32 1.442695, %v1301_v46  ;;  %v1464_v13 = vmul.f32 1.442695, %v1300_v36  ;;  %v1668_v23 = vsel %vm1472_vm0, %v3752_v37, 0.0 }
 0x1e7   :  { %1558 = vadd.xlane.f32.xlu0 %v1557_v7  ;;  %v1653_v7 = vsel %vm1472_vm0, %v3750_v56, 0.0  ;;  %v960_v28 = vsub.f32 0.0, %v876_v59  ;;  %v1665_v56 = vsel %vm1472_vm0, %v3754_v22, 0.0  ;;  %v1316_v46 = vmul.f32 1.442695, %v1226_v0 }
 0x1e8   :  { %v1222_v51 = vmul.f32 %v4531_v41, %v928_v10  ;;  %3767 = vpow2.f32 %v1466_v63  ;;  %v800_v36 = vsub.f32 %v4562_v1, %v4507_v43  ;;  %v797_v22 = vsub.f32 %v4567_v29, %v4503_v25  ;;  %v3760_v10 = vpop.eup %3759 }
 0x1e9   :  { %3769 = vpow2.f32 %v1464_v13  ;;  %v1254_v59 = vmul.f32 %v4555_v5, %v960_v28  ;;  %v1677_v37 = vsel %vm1472_vm0, %v3758_v34, 0.0  ;;  %v1227_v63 = vmul.f32 %v4533_v50, %v933_v53 }
 0x1ea   :  { %1657 = vadd.xlane.f32.xlu1 %v1656_v42  ;;  %v929_v42 = vsub.f32 0.0, %v845_v54  ;;  %v1308_v61 = vmul.f32 1.442695, %v1222_v51  ;;  %3771 = vpow2.f32 %v1316_v46  ;;  %v936_v0 = vsub.f32 0.0, %v852_v55 }
 0x1eb   :  { %1654 = vadd.xlane.f32.xlu0 %v1653_v7  ;;  %v3762_v54 = vpop.eup %3761  ;;  %v884_v13 = vmul.f32 %v800_v36, %v800_v36  ;;  %v772_v25 = vsub.f32 %v4562_v1, %v4509_v31  ;;  %v1692_v8 = vsel %vm1472_vm0, %v3760_v10, 0.0  ;;  %v1372_v21 = vmul.f32 1.442695, %v1254_v59 }
 0x1ec   :  { %v1223_v7 = vmul.f32 %v4531_v41, %v929_v42  ;;  %3773 = vpow2.f32 %v1308_v61  ;;  %v881_v41 = vmul.f32 %v797_v22, %v797_v22  ;;  %v3764_v34 = vpop.eup %3763  ;;  %v1318_v28 = vmul.f32 1.442695, %v1227_v63 }
 0x1ed   :  { %v3766_v51 = vpop.eup %3765  ;;  %v1230_v35 = vmul.f32 %v4574_v9, %v936_v0  ;;  %v804_v42 = vsub.f32 %v4562_v1, %v4511_v30  ;;  %3775 = vpow2.f32 %v1380_v11  ;;  %v1255_v46 = vmul.f32 %v4555_v5, %v961_v4 }
 0x1ee   :  { %1669 = vadd.xlane.f32.xlu1 %v1668_v23  ;;  %v1689_v23 = vsel %vm1472_vm0, %v3762_v54, 0.0  ;;  %v1310_v50 = vmul.f32 1.442695, %v1223_v7  ;;  %v968_v53 = vsub.f32 0.0, %v884_v13  ;;  %v856_v55 = vmul.f32 %v772_v25, %v772_v25 }
 0x1ef   :  { %1666 = vadd.xlane.f32.xlu0 %v1665_v56  ;;  %v853_v56 = vmul.f32 %v769_v19, %v769_v19  ;;  %v1701_v24 = vsel %vm1472_vm0, %v3764_v34, 0.0  ;;  %3777 = vpow2.f32 %v1372_v21  ;;  %v965_v36 = vsub.f32 0.0, %v881_v41 }
 0x1f0   :  { %v1704_v59 = vsel %vm1472_vm0, %v3766_v51, 0.0  ;;  %3779 = vpow2.f32 %v1310_v50  ;;  %v1324_v22 = vmul.f32 1.442695, %v1230_v35  ;;  %v888_v5 = vmul.f32 %v804_v42, %v804_v42 }
 0x1f1   :  { %3781 = vpow2.f32 %v1318_v28  ;;  %v937_v10 = vsub.f32 0.0, %v853_v56  ;;  %v1262_v7 = vmul.f32 %v4579_v60, %v968_v53  ;;  %v940_v54 = vsub.f32 0.0, %v856_v55 }
 0x1f2   :  { %1681 = vadd.xlane.f32.xlu1 %v1680_v16  ;;  %v3768_v32 = vpop.eup %3767  ;;  %v801_v16 = vsub.f32 %v4567_v29, %v4507_v43  ;;  %v776_v63 = vsub.f32 %v4562_v1, %v4515_v38  ;;  %v1259_v19 = vmul.f32 %v4557_v17, %v965_v36  ;;  %v773_v4 = vsub.f32 %v4567_v29, %v4509_v31 }
 0x1f3   :  { %1678 = vadd.xlane.f32.xlu0 %v1677_v37  ;;  %v3770_v61 = vpop.eup %3769  ;;  %v1374_v37 = vmul.f32 1.442695, %v1255_v46  ;;  %v1716_v13 = vsel %vm1472_vm0, %v3768_v32, 0.0  ;;  %v805_v25 = vsub.f32 %v4567_v29, %v4511_v30  ;;  %3783 = vpow2.f32 %v1324_v22 }
 0x1f4   :  { %v3772_v0 = vpop.eup %3771  ;;  %v1713_v43 = vsel %vm1472_vm0, %v3770_v61, 0.0  ;;  %v885_v11 = vmul.f32 %v801_v16, %v801_v16  ;;  %v1231_v21 = vmul.f32 %v4574_v9, %v937_v10  ;;  %v972_v41 = vsub.f32 0.0, %v888_v5 }
 0x1f5   :  { %v808_v34 = vsub.f32 %v4562_v1, %v4517_v39  ;;  %3785 = vpow2.f32 %v1374_v37  ;;  %v1388_v17 = vmul.f32 1.442695, %v1262_v7  ;;  %v860_v31 = vmul.f32 %v776_v63, %v776_v63 }
 0x1f6   :  { %1693 = vadd.xlane.f32.xlu1 %v1692_v8  ;;  %v3774_v8 = vpop.eup %3773  ;;  %v1491_v50 = vsel %vm1472_vm0, %v3772_v0, 0.0  ;;  %v1382_v51 = vmul.f32 1.442695, %v1259_v19  ;;  %v969_v28 = vsub.f32 0.0, %v885_v11  ;;  %v857_v35 = vmul.f32 %v773_v4, %v773_v4 }
 0x1f7   :  { %1690 = vadd.xlane.f32.xlu0 %v1689_v23  ;;  %v1234_v23 = vmul.f32 %v4587_v6, %v940_v54  ;;  %v3776_v30 = vpop.eup %3775  ;;  %v1479_v56 = vsel %vm1472_vm0, %v3774_v8, 0.0  ;;  %v889_v42 = vmul.f32 %v805_v25, %v805_v25  ;;  %v1326_v46 = vmul.f32 1.442695, %v1231_v21 }
 0x1f8   :  { %v1266_v53 = vmul.f32 %v4591_v2, %v972_v41  ;;  %v892_v55 = vmul.f32 %v808_v34, %v808_v34  ;;  %v777_v32 = vsub.f32 %v4567_v29, %v4515_v38  ;;  %3787 = vpow2.f32 %v1388_v17 }
 0x1f9   :  { %v3778_v9 = vpop.eup %3777  ;;  %v1332_v36 = vmul.f32 1.442695, %v1234_v23  ;;  %v944_v16 = vsub.f32 0.0, %v860_v31  ;;  %v780_v61 = vsub.f32 %v4562_v1, %v4519_v40  ;;  %v1587_v22 = vsel %vm1472_vm0, %v3776_v30, 0.0 }
 0x1fa   :  { %1702 = vadd.xlane.f32.xlu1 %v1701_v24  ;;  %v3780_v24 = vpop.eup %3779  ;;  %3789 = vpow2.f32 %v1382_v51  ;;  %v1263_v10 = vmul.f32 %v4579_v60, %v969_v28  ;;  %v941_v5 = vsub.f32 0.0, %v857_v35  ;;  %v1575_v37 = vsel %vm1472_vm0, %v3778_v9, 0.0 }
 0x1fb   :  { %1705 = vadd.xlane.f32.xlu0 %v1704_v59  ;;  %v3782_v59 = vpop.eup %3781  ;;  %v973_v7 = vsub.f32 0.0, %v889_v42  ;;  %3791 = vpow2.f32 %v1326_v46  ;;  %v1396_v38 = vmul.f32 1.442695, %v1266_v53  ;;  %v976_v54 = vsub.f32 0.0, %v892_v55 }
 0x1fc   :  { %v861_v63 = vmul.f32 %v777_v32, %v777_v32  ;;  %3793 = vpow2.f32 %v1332_v36  ;;  %v1238_v0 = vmul.f32 %v4618_v3, %v944_v16  ;;  %v812_v19 = vsub.f32 %v4562_v1, %v4521_v44 }
 0x1fd   :  { %v3784_v11 = vpop.eup %3783  ;;  %v1494_v60 = vsel %vm1472_vm0, %v3782_v59, 0.0  ;;  %v1390_v4 = vmul.f32 1.442695, %v1263_v10  ;;  %v809_v25 = vsub.f32 %v4567_v29, %v4517_v39  ;;  %v1482_v21 = vsel %vm1472_vm0, %v3780_v24, 0.0 }
 0x1fe   :  { %1714 = vadd.xlane.f32.xlu1 %v1713_v43  ;;  %v864_v43 = vmul.f32 %v780_v61, %v780_v61  ;;  %v1267_v41 = vmul.f32 %v4591_v2, %v973_v7  ;;  %v781_v34 = vsub.f32 %v4567_v29, %v4519_v40  ;;  %v1270_v17 = vmul.f32 %v4622_v18, %v976_v54 }
 0x1ff   :  { %1717 = vadd.xlane.f32.xlu0 %v1716_v13  ;;  %v1235_v13 = vmul.f32 %v4587_v6, %v941_v5  ;;  %v3786_v8 = vpop.eup %3785  ;;  %v945_v23 = vsub.f32 0.0, %v861_v63  ;;  %v784_v31 = vsub.f32 %v4562_v1, %v4523_v45  ;;  %3795 = vpow2.f32 %v1396_v38 }
 0x200   :  { %v1340_v6 = vmul.f32 1.442695, %v1238_v0  ;;  %v896_v39 = vmul.f32 %v812_v19, %v812_v19  ;;  %v1578_v51 = vsel %vm1472_vm0, %v3786_v8, 0.0  ;;  %3797 = vpow2.f32 %v1390_v4 }
 0x201   :  { %v1334_v28 = vmul.f32 1.442695, %v1235_v13  ;;  %v893_v35 = vmul.f32 %v809_v25, %v809_v25  ;;  %v1503_v30 = vsel %vm1472_vm0, %v3784_v11, 0.0  ;;  %v1398_v40 = vmul.f32 1.442695, %v1267_v41 }
 0x202   :  { %1492 = vadd.xlane.f32.xlu1 %v1491_v50  ;;  %v948_v50 = vsub.f32 0.0, %v864_v43  ;;  %v3788_v2 = vpop.eup %3787  ;;  %v1404_v9 = vmul.f32 1.442695, %v1270_v17  ;;  %v1239_v46 = vmul.f32 %v4618_v3, %v945_v23  ;;  %v868_v53 = vmul.f32 %v784_v31, %v784_v31 }
 0x203   :  { %1480 = vadd.xlane.f32.xlu0 %v1479_v56  ;;  %v865_v56 = vmul.f32 %v781_v34, %v781_v34  ;;  %3799 = vpow2.f32 %v1340_v6  ;;  %v980_v32 = vsub.f32 0.0, %v896_v39  ;;  %v816_v24 = vsub.f32 %v4562_v1, %v4525_v47 }
 0x204   :  { %v3790_v42 = vpop.eup %3789  ;;  %v1242_v55 = vmul.f32 %v4640_v26, %v948_v50  ;;  %v1599_v16 = vsel %vm1472_vm0, %v3788_v2, 0.0  ;;  %3801 = vpow2.f32 %v1334_v28  ;;  %v977_v61 = vsub.f32 0.0, %v893_v35 }
 0x205   :  { %v3792_v36 = vpop.eup %3791  ;;  %v813_v59 = vsub.f32 %v4567_v29, %v4521_v44  ;;  %v1590_v10 = vsel %vm1472_vm0, %v3790_v42, 0.0  ;;  %3803 = vpow2.f32 %v1398_v40  ;;  %v949_v3 = vsub.f32 0.0, %v865_v56 }
 0x206   :  { %1588 = vadd.xlane.f32.xlu1 %v1587_v22  ;;  %v3794_v22 = vpop.eup %3793  ;;  %3805 = vpow2.f32 %v1404_v9  ;;  %v1342_v5 = vmul.f32 1.442695, %v1239_v46  ;;  %v785_v7 = vsub.f32 %v4567_v29, %v4523_v45  ;;  %v1348_v38 = vmul.f32 1.442695, %v1242_v55 }
 0x207   :  { %1576 = vadd.xlane.f32.xlu0 %v1575_v37  ;;  %v952_v37 = vsub.f32 0.0, %v868_v53  ;;  %v1274_v54 = vmul.f32 %v4651_v62, %v980_v32  ;;  %v900_v63 = vmul.f32 %v816_v24, %v816_v24  ;;  %v788_v44 = vsub.f32 %v4562_v1, %v4527_v48 }
 0x208   :  { %v1515_v0 = vsel %vm1472_vm0, %v3794_v22, 0.0  ;;  %v1271_v43 = vmul.f32 %v4622_v18, %v977_v61  ;;  %v897_v19 = vmul.f32 %v813_v59, %v813_v59  ;;  %v817_v11 = vsub.f32 %v4567_v29, %v4525_v47  ;;  %v6724_v61 = vld [vmem:[#allocation8_spill] sm:$0xff]  ;;  %v6725_v22 = vld [vmem:[#allocation7_spill] sm:$0xff] }
 0x209   :  { %v1506_v4 = vsel %vm1472_vm0, %v3792_v36, 0.0  ;;  %v1243_v45 = vmul.f32 %v4640_v26, %v949_v3  ;;  %v820_v13 = vsub.f32 %v4562_v1, %v4529_v49  ;;  %3807 = vpow2.f32 %v1342_v5 }
 0x20a   :  { %1495 = vadd.xlane.f32.xlu1 %v1494_v60  ;;  %v3796_v60 = vpop.eup %3795  ;;  %v1246_v8 = vmul.f32 %v4667_v52, %v952_v37  ;;  %3809 = vpow2.f32 %v1348_v38  ;;  %v1412_v18 = vmul.f32 1.442695, %v1274_v54  ;;  %v984_v41 = vsub.f32 0.0, %v900_v63 }
 0x20b   :  { %1483 = vadd.xlane.f32.xlu0 %v1482_v21  ;;  %v3798_v25 = vpop.eup %3797  ;;  %v869_v21 = vmul.f32 %v785_v7, %v785_v7  ;;  %v872_v34 = vmul.f32 %v788_v44, %v788_v44  ;;  %v1611_v47 = vsel %vm1472_vm0, %v3796_v60, 0.0  ;;  %v1406_v17 = vmul.f32 1.442695, %v1271_v43  ;;  %v6726_v7 = vld [vmem:[#allocation6_spill] sm:$0xff] }
 0x20c   :  { %v981_v23 = vsub.f32 0.0, %v897_v19  ;;  %v901_v31 = vmul.f32 %v817_v11, %v817_v11  ;;  %v1602_v26 = vsel %vm1472_vm0, %v3798_v25, 0.0  ;;  %v1350_v50 = vmul.f32 1.442695, %v1243_v45 }
 0x20d   :  { %v3800_v6 = vpop.eup %3799  ;;  %v904_v39 = vmul.f32 %v820_v13, %v820_v13  ;;  %v1356_v28 = vmul.f32 1.442695, %v1246_v8  ;;  %v953_v35 = vsub.f32 0.0, %v869_v21  ;;  %v789_v2 = vsub.f32 %v4567_v29, %v4527_v48 }
 0x20e   :  { %1579 = vadd.xlane.f32.xlu1 %v1578_v51  ;;  %v3802_v51 = vpop.eup %3801  ;;  %3811 = vpow2.f32 %v1412_v18  ;;  %v1278_v40 = vmul.f32 %v4674_v12, %v984_v41  ;;  %v956_v56 = vsub.f32 0.0, %v872_v34  ;;  %v821_v42 = vsub.f32 %v4567_v29, %v4529_v49 }
 0x20f   :  { %1504 = vadd.xlane.f32.xlu0 %v1503_v30  ;;  %v3804_v30 = vpop.eup %3803  ;;  %v1527_v46 = vsel %vm1472_vm0, %v3800_v6, 0.0  ;;  %3813 = vpow2.f32 %v1406_v17  ;;  %v1275_v53 = vmul.f32 %v4651_v62, %v981_v23  ;;  %v985_v55 = vsub.f32 0.0, %v901_v31 }
 0x210   :  { %v3806_v9 = vpop.eup %3805  ;;  %v1518_v32 = vsel %vm1472_vm0, %v3802_v51, 0.0  ;;  %3815 = vpow2.f32 %v1350_v50  ;;  %v988_v48 = vsub.f32 0.0, %v904_v39  ;;  %v1247_v24 = vmul.f32 %v4667_v52, %v953_v35 }
 0x211   :  { %3817 = vpow2.f32 %v1356_v28  ;;  %v873_v36 = vmul.f32 %v789_v2, %v789_v2  ;;  %v1250_v49 = vmul.f32 %v6724_v61, %v956_v56  ;;  %v905_v59 = vmul.f32 %v821_v42, %v821_v42 }
 0x212   :  { %1600 = vadd.xlane.f32.xlu1 %v1599_v16  ;;  %v1420_v16 = vmul.f32 1.442695, %v1278_v40  ;;  %v1623_v62 = vsel %vm1472_vm0, %v3806_v9, 0.0  ;;  %v1414_v5 = vmul.f32 1.442695, %v1275_v53  ;;  %v1279_v37 = vmul.f32 %v4674_v12, %v985_v55 }
 0x213   :  { %1591 = vadd.xlane.f32.xlu0 %v1590_v10  ;;  %v828_v10 = vsub.f32 %v4562_v1, %v6725_v22  ;;  %v3808_v3 = vpop.eup %3807  ;;  %v824_v38 = vsub.f32 %v4562_v1, %v6726_v7  ;;  %v1614_v52 = vsel %vm1472_vm0, %v3804_v30, 0.0  ;;  %v1282_v63 = vmul.f32 %v4701_v33, %v988_v48 }
 0x214   :  { %v3810_v54 = vpop.eup %3809  ;;  %v1358_v44 = vmul.f32 1.442695, %v1247_v24  ;;  %v825_v43 = vsub.f32 %v4567_v29, %v6726_v7  ;;  %v829_v19 = vsub.f32 %v4567_v29, %v6725_v22  ;;  %3819 = vpow2.f32 %v1420_v16 }
 0x215   :  { %v1364_v12 = vmul.f32 1.442695, %v1250_v49  ;;  %v989_v11 = vsub.f32 0.0, %v905_v59  ;;  %v912_v60 = vmul.f32 %v828_v10, %v828_v10  ;;  %3821 = vpow2.f32 %v1414_v5 }
 0x216   :  { %1516 = vadd.xlane.f32.xlu1 %v1515_v0  ;;  %v957_v0 = vsub.f32 0.0, %v873_v36  ;;  %v1422_v45 = vmul.f32 1.442695, %v1279_v37  ;;  %v908_v13 = vmul.f32 %v824_v38, %v824_v38  ;;  %v1530_v8 = vsel %vm1472_vm0, %v3808_v3, 0.0 }
 0x217   :  { %1507 = vadd.xlane.f32.xlu0 %v1506_v4  ;;  %v1539_v4 = vsel %vm1472_vm0, %v3810_v54, 0.0  ;;  %v1428_v21 = vmul.f32 1.442695, %v1282_v63  ;;  %3823 = vpow2.f32 %v1358_v44  ;;  %v909_v34 = vmul.f32 %v825_v43, %v825_v43  ;;  %v6727_v63 = vld [vmem:[#allocation9_spill] sm:$0xff] }
 0x218   :  { %v3812_v25 = vpop.eup %3811  ;;  %v1251_v41 = vmul.f32 %v6724_v61, %v957_v0  ;;  %3825 = vpow2.f32 %v1364_v12  ;;  %v1283_v23 = vmul.f32 %v4701_v33, %v989_v11  ;;  %v996_v31 = vsub.f32 0.0, %v912_v60  ;;  %v6728_v60 = vld [vmem:[#allocation10_spill] sm:$0xff] }
 0x219   :  { %v3814_v18 = vpop.eup %3813  ;;  %v833_v6 = vsub.f32 %v4567_v29, %v4633_v14  ;;  %v1635_v50 = vsel %vm1472_vm0, %v3812_v25, 0.0  ;;  %3827 = vpow2.f32 %v1422_v45  ;;  %v992_v39 = vsub.f32 0.0, %v908_v13 }
 0x21a   :  { %1612 = vadd.xlane.f32.xlu1 %v1611_v47  ;;  %v913_v47 = vmul.f32 %v829_v19, %v829_v19  ;;  %v3816_v17 = vpop.eup %3815  ;;  %v832_v51 = vsub.f32 %v4562_v1, %v4633_v14  ;;  %v1626_v28 = vsel %vm1472_vm0, %v3814_v18, 0.0  ;;  %3829 = vpow2.f32 %v1428_v21 }
 0x21b   :  { %1603 = vadd.xlane.f32.xlu0 %v1602_v26  ;;  %v3818_v26 = vpop.eup %3817  ;;  %v836_v35 = vsub.f32 %v4562_v1, %v4655_v15  ;;  %v1366_v33 = vmul.f32 1.442695, %v1251_v41  ;;  %v993_v2 = vsub.f32 0.0, %v909_v34  ;;  %v837_v40 = vsub.f32 %v4567_v29, %v4655_v15 }
 0x21c   :  { %v997_v30 = vsub.f32 0.0, %v913_v47  ;;  %v1430_v56 = vmul.f32 1.442695, %v1283_v23  ;;  %v1290_v42 = vmul.f32 %v4717_v57, %v996_v31  ;;  %v917_v9 = vmul.f32 %v833_v6, %v833_v6 }
 0x21d   :  { %v840_v14 = vsub.f32 %v4562_v1, %v4682_v27  ;;  %v1286_v53 = vmul.f32 %v4711_v20, %v992_v39  ;;  %v916_v55 = vmul.f32 %v832_v51, %v832_v51  ;;  %v1542_v24 = vsel %vm1472_vm0, %v3816_v17, 0.0 }
 0x21e   :  { %1528 = vadd.xlane.f32.xlu1 %v1527_v46  ;;  %v1551_v46 = vsel %vm1472_vm0, %v3818_v26, 0.0  ;;  %v3820_v48 = vpop.eup %3819  ;;  %v920_v15 = vmul.f32 %v836_v35, %v836_v35  ;;  %3831 = vpow2.f32 %v1366_v33  ;;  %v1287_v16 = vmul.f32 %v4711_v20, %v993_v2 }
 0x21f   :  { %1519 = vadd.xlane.f32.xlu0 %v1518_v32  ;;  %v841_v32 = vsub.f32 %v4567_v29, %v4682_v27  ;;  %v3822_v36 = vpop.eup %3821  ;;  %v1291_v1 = vmul.f32 %v4717_v57, %v997_v30  ;;  %v921_v61 = vmul.f32 %v837_v40, %v837_v40  ;;  %3833 = vpow2.f32 %v1430_v56 }
 0x220   :  { %v1444_v49 = vmul.f32 1.442695, %v1290_v42  ;;  %v1001_v59 = vsub.f32 0.0, %v917_v9  ;;  %v924_v22 = vmul.f32 %v840_v14, %v840_v14  ;;  %v1647_v29 = vsel %vm1472_vm0, %v3820_v48, 0.0 }
 0x221   :  { %v3824_v10 = vpop.eup %3823  ;;  %v1436_v27 = vmul.f32 1.442695, %v1286_v53  ;;  %v1000_v3 = vsub.f32 0.0, %v916_v55  ;;  %v1638_v37 = vsel %vm1472_vm0, %v3822_v36, 0.0  ;;  %v1004_v7 = vsub.f32 0.0, %v920_v15 }
 0x222   :  { %1624 = vadd.xlane.f32.xlu1 %v1623_v62  ;;  %v925_v62 = vmul.f32 %v841_v32, %v841_v32  ;;  %v3826_v5 = vpop.eup %3825  ;;  %v1438_v20 = vmul.f32 1.442695, %v1287_v16  ;;  %v1005_v57 = vsub.f32 0.0, %v921_v61  ;;  %3835 = vpow2.f32 %v1444_v49 }
 0x223   :  { %1615 = vadd.xlane.f32.xlu0 %v1614_v52  ;;  %v3828_v38 = vpop.eup %3827  ;;  %v1446_v52 = vmul.f32 1.442695, %v1291_v1  ;;  %v1295_v44 = vmul.f32 %v6727_v63, %v1001_v59  ;;  %v1008_v0 = vsub.f32 0.0, %v924_v22  ;;  %v1563_v43 = vsel %vm1472_vm0, %v3826_v5, 0.0 }
 0x224   :  { %v3830_v54 = vpop.eup %3829  ;;  %3837 = vpow2.f32 %v1436_v27  ;;  %v1294_v19 = vmul.f32 %v6727_v63, %v1000_v3  ;;  %v1009_v12 = vsub.f32 0.0, %v925_v62  ;;  %v1554_v11 = vsel %vm1472_vm0, %v3824_v10, 0.0 }
 0x225   :  { %v1299_v45 = vmul.f32 %v6728_v60, %v1005_v57  ;;  %3839 = vpow2.f32 %v1446_v52  ;;  %v1454_v13 = vmul.f32 1.442695, %v1295_v44  ;;  %v1302_v25 = vmul.f32 %v4750_v58, %v1008_v0 }
 0x226   :  { %1540 = vadd.xlane.f32.xlu1 %v1539_v4  ;;  %v1298_v4 = vmul.f32 %v6728_v60, %v1004_v7  ;;  %v1659_v21 = vsel %vm1472_vm0, %v3830_v54, 0.0  ;;  %3841 = vpow2.f32 %v1438_v20  ;;  %v1452_v18 = vmul.f32 1.442695, %v1294_v19 }
 0x227   :  { %1531 = vadd.xlane.f32.xlu0 %v1530_v8  ;;  %v1303_v41 = vmul.f32 %v4750_v58, %v1009_v12  ;;  %v1650_v47 = vsel %vm1472_vm0, %v3828_v38, 0.0  ;;  %v1462_v31 = vmul.f32 1.442695, %v1299_v45  ;;  %3843 = vpow2.f32 %v1454_v13 }
 0x228   :  { %v3832_v8 = vpop.eup %3831  ;;  %v1460_v17 = vmul.f32 1.442695, %v1298_v4  ;;  %v1468_v26 = vmul.f32 1.442695, %v1302_v25  ;;  %3845 = vpow2.f32 %v1452_v18  ;;  %v2565_v14 = vlaneseq }
 0x229   :  { %v3834_v34 = vpop.eup %3833  ;;  %v1470_v39 = vmul.f32 1.442695, %v1303_v41  ;;  %v1566_v58 = vsel %vm1472_vm0, %v3832_v8, 0.0 }
 0x22a   :  { %1636 = vadd.xlane.f32.xlu1 %v1635_v50  ;;  %v1662_v50 = vsel %vm1472_vm0, %v3834_v34, 0.0  ;;  %3847 = vpow2.f32 %v1460_v17  ;;  %v2566_v36 = vand.u32 127, %v2565_v14  ;;  %v4937_v16 = vshrl.u32 %v2565_v14, 7 }
 0x22b   :  { %1627 = vadd.xlane.f32.xlu0 %v1626_v28  ;;  %3849 = vpow2.f32 %v1462_v31 }
 0x22c   :  { %v3836_v51 = vpop.eup %3835  ;;  %3851 = vpow2.f32 %v1468_v26  ;;  %6729 = vst [vmem:[#allocation8_spill] sm:$0xff] %v4937_v16  ;;  %v4952_v20 = vsub.s32 %v2566_v36, %v4937_v16 }
 0x22d   :  { %v1683_v2 = vsel %vm1472_vm0, %v3836_v51, 0.0  ;;  %3853 = vpow2.f32 %v1470_v39 }
 0x22e   :  { %1552 = vadd.xlane.f32.xlu1 %v1551_v46  ;;  %v3838_v28 = vpop.eup %3837 }
 0x22f   :  { %1543 = vadd.xlane.f32.xlu0 %v1542_v24  ;;  %v3840_v30 = vpop.eup %3839  ;;  %v1671_v40 = vsel %vm1472_vm0, %v3838_v28, 0.0 }
 0x230   :  { %v3842_v56 = vpop.eup %3841  ;;  %v1686_v55 = vsel %vm1472_vm0, %v3840_v30, 0.0 }
 0x231   :  { %v3844_v32 = vpop.eup %3843  ;;  %v1674_v48 = vsel %vm1472_vm0, %v3842_v56, 0.0 }
 0x232   :  { %1648 = vadd.xlane.f32.xlu1 %v1647_v29  ;;  %v3846_v24 = vpop.eup %3845  ;;  %v1698_v10 = vsel %vm1472_vm0, %v3844_v32, 0.0 }
 0x233   :  { %1639 = vadd.xlane.f32.xlu0 %v1638_v37  ;;  %v1695_v3 = vsel %vm1472_vm0, %v3846_v24, 0.0  ;;  %v6750_v24 = vmov 0 }
 0x234   :  { %v3848_v1 = vpop.eup %3847 }
 0x235   :  { %v3850_v59 = vpop.eup %3849  ;;  %v1707_v52 = vsel %vm1472_vm0, %v3848_v1, 0.0 }
 0x236   :  { %1564 = vadd.xlane.f32.xlu1 %v1563_v43  ;;  %v3852_v29 = vpop.eup %3851  ;;  %v1710_v63 = vsel %vm1472_vm0, %v3850_v59, 0.0 }
 0x237   :  { %1555 = vadd.xlane.f32.xlu0 %v1554_v11  ;;  %v3854_v62 = vpop.eup %3853  ;;  %v1719_v11 = vsel %vm1472_vm0, %v3852_v29, 0.0 }
 0x238   :  { %v1722_v60 = vsel %vm1472_vm0, %v3854_v62, 0.0 }
 0x23a   :  { %1660 = vadd.xlane.f32.xlu1 %v1659_v21 }
 0x23b   :  { %1651 = vadd.xlane.f32.xlu0 %v1650_v47  ;;  %v4915_v23 = vpop.xlane.xlu1 %1474 }
 0x23c   :  { %v4917_v6 = vpop.xlane.xlu0 %1477  ;;  %v1725_v42 = vadd.f32 1.0, %v4915_v23  ;;  %v1728_v27 = vmul.f32 -0.5, %v4915_v23  ;;  %v1731_v5 = vand.u32 2147483647, %v4915_v23 }
 0x23d   :  { %v1734_v46 = vadd.f32 1.0, %v4917_v6  ;;  %v1737_v37 = vmul.f32 -0.5, %v4917_v6  ;;  %v1740_v44 = vand.u32 2147483647, %v4917_v6 }
 0x23e   :  { %1663 = vadd.xlane.f32.xlu1 %v1662_v50  ;;  %3855 = vlog2.f32 %v1725_v42  ;;  %v1729_v19 = vadd.f32 1.0, %v1728_v27  ;;  %vm4965_vm14 = vcmp.lt.f32.partialorder %v1731_v5, 0.0004427343 }
 0x23f   :  { %1567 = vadd.xlane.f32.xlu0 %v1566_v58  ;;  %v4921_v35 = vpop.xlane.xlu1 %1489  ;;  %3857 = vlog2.f32 %v1734_v46  ;;  %v1738_v45 = vadd.f32 1.0, %v1737_v37  ;;  %vm4977_vm15 = vcmp.lt.f32.partialorder %v1740_v44, 0.0004427343 }
 0x240   :  { %v4923_v33 = vpop.xlane.xlu0 %1486  ;;  %v1770_v61 = vadd.f32 1.0, %v4921_v35  ;;  %v1773_v0 = vmul.f32 -0.5, %v4921_v35  ;;  %v1776_v8 = vand.u32 2147483647, %v4921_v35  ;;  %v4983_v39 = vmul.f32 %v1729_v19, %v4915_v23 }
 0x241   :  { %v1761_v22 = vadd.f32 1.0, %v4923_v33  ;;  %v1764_v43 = vmul.f32 -0.5, %v4923_v33  ;;  %v1767_v26 = vand.u32 2147483647, %v4923_v33  ;;  %v4988_v28 = vmul.f32 %v1738_v45, %v4917_v6 }
 0x242   :  { %1684 = vadd.xlane.f32.xlu1 %v1683_v2  ;;  %3859 = vlog2.f32 %v1770_v61  ;;  %v1774_v17 = vadd.f32 1.0, %v1773_v0  ;;  %vm4996_vm1 = vcmp.lt.f32.partialorder %v1776_v8, 0.0004427343 }
 0x243   :  { %1672 = vadd.xlane.f32.xlu0 %v1671_v40  ;;  %v4928_v9 = vpop.xlane.xlu1 %1573  ;;  %3861 = vlog2.f32 %v1761_v22  ;;  %v1765_v31 = vadd.f32 1.0, %v1764_v43  ;;  %vm5011_vm3 = vcmp.lt.f32.partialorder %v1767_v26, 0.0004427343 }
 0x244   :  { %v4931_v53 = vpop.xlane.xlu0 %1570  ;;  %v2022_v7 = vadd.f32 1.0, %v4928_v9  ;;  %v2025_v13 = vmul.f32 -0.5, %v4928_v9  ;;  %v2028_v30 = vand.u32 2147483647, %v4928_v9  ;;  %v5006_v32 = vmul.f32 %v1774_v17, %v4921_v35 }
 0x245   :  { %v2013_v57 = vadd.f32 1.0, %v4931_v53  ;;  %v2016_v21 = vmul.f32 -0.5, %v4931_v53  ;;  %v2019_v46 = vand.u32 2147483647, %v4931_v53 }
 0x246   :  { %1687 = vadd.xlane.f32.xlu1 %v1686_v55  ;;  %3863 = vlog2.f32 %v2022_v7  ;;  %v2026_v2 = vadd.f32 1.0, %v2025_v13  ;;  %vm5020_vm4 = vcmp.lt.f32.partialorder %v2028_v30, 0.0004427343 }
 0x247   :  { %1675 = vadd.xlane.f32.xlu0 %v1674_v48  ;;  %v4935_v15 = vpop.xlane.xlu1 %1585  ;;  %3865 = vlog2.f32 %v2013_v57  ;;  %v2017_v14 = vadd.f32 1.0, %v2016_v21  ;;  %v5009_v48 = vmul.f32 %v1765_v31, %v4923_v33  ;;  %vm5035_vm5 = vcmp.lt.f32.partialorder %v2019_v46, 0.0004427343 }
 0x248   :  { %v4940_v49 = vpop.xlane.xlu0 %1582  ;;  %v2058_v12 = vadd.f32 1.0, %v4935_v15  ;;  %v3856_v34 = vpop.eup %3855  ;;  %v2061_v51 = vmul.f32 -0.5, %v4935_v15  ;;  %v2064_v61 = vand.u32 2147483647, %v4935_v15  ;;  %v5018_v29 = vmul.f32 %v2026_v2, %v4928_v9 }
 0x249   :  { %v2049_v18 = vadd.f32 1.0, %v4940_v49  ;;  %v3858_v50 = vpop.eup %3857  ;;  %v2052_v58 = vmul.f32 -0.5, %v4940_v49  ;;  %v4994_v42 = vmul.f32 0.6931472, %v3856_v34  ;;  %v5033_v5 = vmul.f32 %v2017_v14, %v4931_v53 }
 0x24a   :  { %1699 = vadd.xlane.f32.xlu1 %v1698_v10  ;;  %3867 = vlog2.f32 %v2058_v12  ;;  %v5003_v55 = vmul.f32 0.6931472, %v3858_v50  ;;  %v2062_v1 = vadd.f32 1.0, %v2061_v51  ;;  %v2055_v37 = vand.u32 2147483647, %v4940_v49 }
 0x24b   :  { %1696 = vadd.xlane.f32.xlu0 %v1695_v3  ;;  %v4949_v38 = vpop.xlane.xlu1 %1501  ;;  %3869 = vlog2.f32 %v2049_v18  ;;  %v2053_v59 = vadd.f32 1.0, %v2052_v58  ;;  %vm5056_vm6 = vcmp.lt.f32.partialorder %v2064_v61, 0.0004427343 }
 0x24c   :  { %v4955_v54 = vpop.xlane.xlu0 %1498  ;;  %v1806_v40 = vadd.f32 1.0, %v4949_v38  ;;  %v3860_v36 = vpop.eup %3859  ;;  %v1809_v33 = vmul.f32 -0.5, %v4949_v38  ;;  %v5054_v12 = vmul.f32 %v2062_v1, %v4935_v15  ;;  %v1812_v13 = vand.u32 2147483647, %v4949_v38 }
 0x24d   :  { %v1797_v22 = vadd.f32 1.0, %v4955_v54  ;;  %v3862_v10 = vpop.eup %3861  ;;  %v5047_v44 = vmul.f32 0.6931472, %v3860_v36  ;;  %v1800_v53 = vmul.f32 -0.5, %v4955_v54  ;;  %vm5069_vm7 = vcmp.lt.f32.partialorder %v2055_v37, 0.0004427343 }
 0x24e   :  { %1711 = vadd.xlane.f32.xlu1 %v1710_v63  ;;  %3871 = vlog2.f32 %v1806_v40  ;;  %v5051_v19 = vmul.f32 0.6931472, %v3862_v10  ;;  %6742 = vst [vmem:[#allocation7_spill] sm:$0xff] %v5054_v12  ;;  %v1810_v45 = vadd.f32 1.0, %v1809_v33  ;;  %v1803_v30 = vand.u32 2147483647, %v4955_v54 }
 0x24f   :  { %1708 = vadd.xlane.f32.xlu0 %v1707_v52  ;;  %v4970_v25 = vpop.xlane.xlu1 %1597  ;;  %3873 = vlog2.f32 %v1797_v22  ;;  %v1801_v51 = vadd.f32 1.0, %v1800_v53  ;;  %vm5102_vm8 = vcmp.lt.f32.partialorder %v1812_v13, 0.0004427343  ;;  %v6755_v53 = vmov 0 }
 0x250   :  { %v4975_v41 = vpop.xlane.xlu0 %1594  ;;  %v2094_v7 = vadd.f32 1.0, %v4970_v25  ;;  %v3864_v52 = vpop.eup %3863  ;;  %v2097_v8 = vmul.f32 -0.5, %v4970_v25  ;;  %v1769_v2 = vsel %vm5011_vm3, %v5009_v48, %v5051_v19  ;;  %v5093_v36 = vmul.f32 %v1810_v45, %v4949_v38 }
 0x251   :  { %v2085_v27 = vadd.f32 1.0, %v4975_v41  ;;  %v3866_v43 = vpop.eup %3865  ;;  %v5067_v34 = vmul.f32 0.6931472, %v3864_v52  ;;  %v2091_v61 = vand.u32 2147483647, %v4975_v41  ;;  %v6751_v24 = vsel %vm5102_vm8, 4294967295, %v6750_v24 }
 0x252   :  { %1723 = vadd.xlane.f32.xlu1 %v1722_v60  ;;  %v5061_v60 = vmul.f32 %v2053_v59, %v4940_v49  ;;  %v2088_v49 = vmul.f32 -0.5, %v4975_v41  ;;  %v5081_v50 = vmul.f32 0.6931472, %v3866_v43  ;;  %6749 = vst [vmem:[#allocation10_spill] sm:$0xff] %v5093_v36  ;;  %v2098_v1 = vadd.f32 1.0, %v2097_v8  ;;  %6752 = vst [vmem:[#allocation11_spill] sm:$0xff] %v6751_v24 }
 0x253   :  { %1720 = vadd.xlane.f32.xlu0 %v1719_v11  ;;  %v4992_v56 = vpop.xlane.xlu1 %1510  ;;  %v6743_v11 = vmov 0  ;;  %3875 = vlog2.f32 %v2085_v27  ;;  %v2100_v22 = vand.u32 2147483647, %v4970_v25  ;;  %vm5119_vm9 = vcmp.lt.f32.partialorder %v1803_v30, 0.0004427343 }
 0x254   :  { %v5001_v6 = vpop.xlane.xlu0 %1513  ;;  %v1833_v0 = vadd.f32 1.0, %v4992_v56  ;;  %v6744_v11 = vsel %vm5056_vm6, 4294967295, %v6743_v11  ;;  %v3868_v18 = vpop.eup %3867  ;;  %3877 = vlog2.f32 %v2094_v7  ;;  %v1836_v40 = vmul.f32 -0.5, %v4992_v56 }
 0x255   :  { %6745 = vst [vmem:[#allocation6_spill] sm:$0xff] %v6744_v11  ;;  %v1842_v17 = vadd.f32 1.0, %v5001_v6  ;;  %v3870_v58 = vpop.eup %3869  ;;  %v5090_v46 = vmul.f32 0.6931472, %v3868_v18  ;;  %v2089_v10 = vadd.f32 1.0, %v2088_v49  ;;  %v5116_v7 = vmul.f32 %v1801_v51, %v4955_v54 }
 0x256   :  { %3879 = vlog2.f32 %v1833_v0  ;;  %v5113_v37 = vmul.f32 0.6931472, %v3870_v58  ;;  %v1839_v52 = vand.u32 2147483647, %v4992_v56  ;;  %v6756_v53 = vsel %vm5119_vm9, 4294967295, %v6755_v53 }
 0x257   :  { %v5026_v3 = vpop.xlane.xlu1 %1609  ;;  %6748 = vst [vmem:[#allocation9_spill] sm:$0xff] %v5090_v46  ;;  %3881 = vlog2.f32 %v1842_v17  ;;  %6754 = vst [vmem:[#allocation13_spill] sm:$0xff] %v5116_v7  ;;  %v1837_v0 = vadd.f32 1.0, %v1836_v40  ;;  %v1845_v43 = vmul.f32 -0.5, %v5001_v6  ;;  %v5130_v54 = vmul.f32 %v2098_v1, %v4970_v25 }
 0x258   :  { %v5041_v57 = vpop.xlane.xlu0 %1606  ;;  %v2130_v14 = vadd.f32 1.0, %v5026_v3  ;;  %v3872_v33 = vpop.eup %3871  ;;  %6753 = vst [vmem:[#allocation12_spill] sm:$0xff] %v5113_v37  ;;  %6757 = vst [vmem:[#allocation14_spill] sm:$0xff] %v6756_v53  ;;  %vm5132_vm10 = vcmp.lt.f32.partialorder %v2091_v61, 0.0004427343  ;;  %v6762_v51 = vmov 0  ;;  %v2090_v58 = vmul.f32 %v2089_v10, %v4975_v41 }
 0x259   :  { %v2121_v19 = vadd.f32 1.0, %v5041_v57  ;;  %6758 = vst [vmem:[#allocation15_spill] sm:$0xff] %v5130_v54  ;;  %v3874_v49 = vpop.eup %3873  ;;  %v5139_v17 = vmul.f32 0.6931472, %v3872_v33  ;;  %vm5141_vm11 = vcmp.lt.f32.partialorder %v2100_v22, 0.0004427343  ;;  %v1838_v33 = vmul.f32 %v1837_v0, %v4992_v56 }
 0x25a   :  { %3883 = vlog2.f32 %v2130_v14  ;;  %v6763_v51 = vsel %vm5141_vm11, 4294967295, %v6762_v51  ;;  %v2133_v25 = vmul.f32 -0.5, %v5026_v3  ;;  %vm5154_vm12 = vcmp.lt.f32.partialorder %v1839_v52, 0.0004427343 }
 0x25b   :  { %v5065_v21 = vpop.xlane.xlu1 %1525  ;;  %6761 = vst [vmem:[#allocation16_spill] sm:$0xff] %v5139_v17  ;;  %6764 = vst [vmem:[#allocation17_spill] sm:$0xff] %v6763_v51  ;;  %v1848_v22 = vand.u32 2147483647, %v5001_v6  ;;  %v2124_v41 = vmul.f32 -0.5, %v5041_v57  ;;  %v1846_v45 = vadd.f32 1.0, %v1845_v43  ;;  %3885 = vlog2.f32 %v2121_v19 }
 0x25c   :  { %v5075_v31 = vpop.xlane.xlu0 %1522  ;;  %v1878_v8 = vadd.f32 1.0, %v5065_v21  ;;  %v5162_v48 = vrot.slane %v1769_v2, %v4952_v20  ;;  %v5164_v63 = vmul.f32 0.6931472, %v3874_v49  ;;  %v2136_v52 = vand.u32 2147483647, %v5026_v3 }
 0x25d   :  { %v1869_v30 = vadd.f32 1.0, %v5075_v31  ;;  %v3876_v14 = vpop.eup %3875  ;;  %v2134_v16 = vadd.f32 1.0, %v2133_v25  ;;  %v1881_v46 = vmul.f32 -0.5, %v5065_v21  ;;  %vm5179_vm13 = vcmp.lt.f32.partialorder %v1848_v22, 0.0004427343 }
 0x25e   :  { %v3878_v10 = vpop.eup %3877  ;;  %6767 = vst [vmem:[#allocation18_spill] sm:$0xff] %v5164_v63  ;;  %3887 = vlog2.f32 %v1878_v8  ;;  %v2087_v26 = vmul.f32 0.6931472, %v3876_v14  ;;  %v2125_v19 = vadd.f32 1.0, %v2124_v41  ;;  %v1847_v25 = vmul.f32 %v1846_v45, %v5001_v6 }
 0x25f   :  { %v5096_v59 = vpop.xlane.xlu1 %1621  ;;  %3889 = vlog2.f32 %v1869_v30  ;;  %v5177_v0 = vmul.f32 0.6931472, %v3878_v10  ;;  %v2127_v30 = vand.u32 2147483647, %v5041_v57  ;;  %v1872_v14 = vmul.f32 -0.5, %v5075_v31 }
 0x260   :  { %v5107_v38 = vpop.xlane.xlu0 %1618  ;;  %v3880_v27 = vpop.eup %3879  ;;  %v2166_v1 = vadd.f32 1.0, %v5096_v59  ;;  %vm5190_vm0 = vcmp.lt.f32.partialorder %v2136_v52, 0.0004427343  ;;  %v2093_v6 = vsel %vm5132_vm10, %v2090_v58, %v2087_v26  ;;  %v2135_v45 = vmul.f32 %v2134_v16, %v5026_v3 }
 0x261   :  { %6768 = vst [vmem:[#allocation19_spill] sm:$0xff] %v5177_v0  ;;  %v3882_v8 = vpop.eup %3881  ;;  %v1835_v49 = vmul.f32 0.6931472, %v3880_v27  ;;  %v2157_v22 = vadd.f32 1.0, %v5107_v38  ;;  %v1882_v17 = vadd.f32 1.0, %v1881_v46  ;;  %v5208_v2 = vmul.f32 %v2125_v19, %v5041_v57 }
 0x262   :  { %3891 = vlog2.f32 %v2166_v1  ;;  %v1884_v36 = vand.u32 2147483647, %v5065_v21  ;;  %v1844_v52 = vmul.f32 0.6931472, %v3882_v8  ;;  %vm5213_vm3 = vcmp.lt.f32.partialorder %v2127_v30, 0.0004427343 }
 0x263   :  { %v5137_v18 = vpop.xlane.xlu1 %1537  ;;  %v1841_v26 = vsel %vm5154_vm12, %v1838_v33, %v1835_v49  ;;  %v1873_v3 = vadd.f32 1.0, %v1872_v14  ;;  %v1875_v46 = vand.u32 2147483647, %v5075_v31  ;;  %v2169_v13 = vmul.f32 -0.5, %v5096_v59 }
 0x264   :  { %v5148_v40 = vpop.xlane.xlu0 %1534  ;;  %v3884_v27 = vpop.eup %3883  ;;  %v1914_v63 = vadd.f32 1.0, %v5137_v18  ;;  %v5220_v58 = vrot.slane %v2093_v6, %v4952_v20  ;;  %3893 = vlog2.f32 %v2157_v22  ;;  %v2160_v57 = vmul.f32 -0.5, %v5107_v38 }
 0x265   :  { %v2132_v8 = vmul.f32 0.6931472, %v3884_v27  ;;  %v3886_v61 = vpop.eup %3885  ;;  %v1883_v33 = vmul.f32 %v1882_v17, %v5065_v21  ;;  %vm5226_vm10 = vcmp.lt.f32.partialorder %v1884_v36, 0.0004427343  ;;  %v2172_v30 = vand.u32 2147483647, %v5096_v59 }
 0x266   :  { %6775 = vst [vmem:[#allocation20_spill] sm:$0xff] %v5220_v58  ;;  %v1905_v14 = vadd.f32 1.0, %v5148_v40  ;;  %v5235_v22 = vrot.slane %v1841_v26, %v4952_v20  ;;  %v1850_v27 = vsel %vm5179_vm13, %v1847_v25, %v1844_v52  ;;  %3895 = vlog2.f32 %v1914_v63 }
 0x267   :  { %v5168_v62 = vpop.xlane.xlu1 %1633  ;;  %v1874_v17 = vmul.f32 %v1873_v3, %v5075_v31  ;;  %vm5241_vm12 = vcmp.lt.f32.partialorder %v1875_v46, 0.0004427343  ;;  %v2170_v0 = vadd.f32 1.0, %v2169_v13  ;;  %v2163_v54 = vand.u32 2147483647, %v5107_v38 }
 0x268   :  { %v5171_v56 = vpop.xlane.xlu0 %1630  ;;  %v3888_v6 = vpop.eup %3887  ;;  %6778 = vst [vmem:[#allocation21_spill] sm:$0xff] %v5235_v22  ;;  %v2202_v21 = vadd.f32 1.0, %v5168_v62  ;;  %v2138_v26 = vsel %vm5190_vm0, %v2135_v45, %v2132_v8  ;;  %v2123_v22 = vmul.f32 0.6931472, %v3886_v61  ;;  %v2161_v51 = vadd.f32 1.0, %v2160_v57 }
 0x269   :  { %v3890_v36 = vpop.eup %3889  ;;  %v1917_v43 = vmul.f32 -0.5, %v5137_v18  ;;  %v5252_v25 = vrot.slane %v1850_v27, %v4952_v20  ;;  %v1880_v31 = vmul.f32 0.6931472, %v3888_v6  ;;  %3897 = vlog2.f32 %v1905_v14 }
 0x26a   :  { %v2193_v52 = vadd.f32 1.0, %v5171_v56  ;;  %v1871_v13 = vmul.f32 0.6931472, %v3890_v36  ;;  %vm5257_vm13 = vcmp.lt.f32.partialorder %v2172_v30, 0.0004427343  ;;  %3899 = vlog2.f32 %v2202_v21 }
 0x26b   :  { %v5195_v41 = vpop.xlane.xlu1 %1549  ;;  %6781 = vst [vmem:[#allocation22_spill] sm:$0xff] %v5252_v25  ;;  %v5263_v8 = vrot.slane %v2138_v26, %v4952_v20  ;;  %v2171_v57 = vmul.f32 %v2170_v0, %v5096_v59  ;;  %v1920_v61 = vand.u32 2147483647, %v5137_v18  ;;  %v1908_v14 = vmul.f32 -0.5, %v5148_v40 }
 0x26c   :  { %v5201_v24 = vpop.xlane.xlu0 %1546  ;;  %v3892_v46 = vpop.eup %3891  ;;  %v1950_v45 = vadd.f32 1.0, %v5195_v41  ;;  %v2129_v6 = vsel %vm5213_vm3, %v5208_v2, %v2123_v22  ;;  %v2162_v30 = vmul.f32 %v2161_v51, %v5107_v38  ;;  %vm5272_vm0 = vcmp.lt.f32.partialorder %v2163_v54, 0.0004427343 }
 0x26d   :  { %6784 = vst [vmem:[#allocation23_spill] sm:$0xff] %v5263_v8  ;;  %v1918_v21 = vadd.f32 1.0, %v1917_v43  ;;  %v2205_v36 = vmul.f32 -0.5, %v5168_v62  ;;  %v1886_v59 = vsel %vm5226_vm10, %v1883_v33, %v1880_v31  ;;  %v2168_v0 = vmul.f32 0.6931472, %v3892_v46 }
 0x26e   :  { %v1911_v8 = vand.u32 2147483647, %v5148_v40  ;;  %3901 = vlog2.f32 %v2193_v52  ;;  %v3894_v2 = vpop.eup %3893  ;;  %v1877_v38 = vsel %vm5241_vm12, %v1874_v17, %v1871_v13  ;;  %v2196_v54 = vmul.f32 -0.5, %v5171_v56 }
 0x26f   :  { %v5223_v19 = vpop.xlane.xlu1 %1645  ;;  %3903 = vlog2.f32 %v1950_v45  ;;  %v1941_v51 = vadd.f32 1.0, %v5201_v24  ;;  %v5289_v22 = vrot.slane %v2129_v6, %v4952_v20  ;;  %vm5291_vm3 = vcmp.lt.f32.partialorder %v1920_v61, 0.0004427343 }
 0x270   :  { %v5232_v1 = vpop.xlane.xlu0 %1642  ;;  %v1909_v49 = vadd.f32 1.0, %v1908_v14  ;;  %v2208_v43 = vand.u32 2147483647, %v5168_v62  ;;  %v3896_v31 = vpop.eup %3895  ;;  %v5297_v52 = vrot.slane %v1886_v59, %v4952_v20  ;;  %v1919_v58 = vmul.f32 %v1918_v21, %v5137_v18 }
 0x271   :  { %6787 = vst [vmem:[#allocation24_spill] sm:$0xff] %v5289_v22  ;;  %v2206_v17 = vadd.f32 1.0, %v2205_v36  ;;  %v1953_v46 = vmul.f32 -0.5, %v5195_v41  ;;  %v5304_v45 = vrot.slane %v1877_v38, %v4952_v20  ;;  %v2174_v61 = vsel %vm5257_vm13, %v2171_v57, %v2168_v0 }
 0x272   :  { %6790 = vst [vmem:[#allocation25_spill] sm:$0xff] %v5297_v52  ;;  %v2159_v14 = vmul.f32 0.6931472, %v3894_v2  ;;  %vm5308_vm10 = vcmp.lt.f32.partialorder %v1911_v8, 0.0004427343  ;;  %v2238_v59 = vadd.f32 1.0, %v5223_v19  ;;  %3905 = vlog2.f32 %v1941_v51 }
 0x273   :  { %v5249_v63 = vpop.xlane.xlu1 %1561  ;;  %6791 = vst [vmem:[#allocation26_spill] sm:$0xff] %v5304_v45  ;;  %v2197_v18 = vadd.f32 1.0, %v2196_v54  ;;  %v2199_v21 = vand.u32 2147483647, %v5171_v56  ;;  %v1956_v36 = vand.u32 2147483647, %v5195_v41  ;;  %v3898_v38 = vpop.eup %3897  ;;  %v1910_v10 = vmul.f32 %v1909_v49, %v5148_v40 }
 0x274   :  { %v5255_v3 = vpop.xlane.xlu0 %1558  ;;  %v1916_v45 = vmul.f32 0.6931472, %v3896_v31  ;;  %vm5318_vm12 = vcmp.lt.f32.partialorder %v2208_v43, 0.0004427343  ;;  %v2229_v8 = vadd.f32 1.0, %v5232_v1  ;;  %v3900_v0 = vpop.eup %3899  ;;  %v5324_v2 = vrot.slane %v2174_v61, %v4952_v20 }
 0x275   :  { %v2207_v54 = vmul.f32 %v2206_v17, %v5168_v62  ;;  %v1954_v22 = vadd.f32 1.0, %v1953_v46  ;;  %v1944_v25 = vmul.f32 -0.5, %v5201_v24  ;;  %v2165_v40 = vsel %vm5272_vm0, %v2162_v30, %v2159_v14 }
 0x276   :  { %6796 = vst [vmem:[#allocation27_spill] sm:$0xff] %v5324_v2  ;;  %3907 = vlog2.f32 %v2238_v59  ;;  %v2241_v49 = vmul.f32 -0.5, %v5223_v19  ;;  %v1986_v43 = vadd.f32 1.0, %v5249_v63  ;;  %v1907_v31 = vmul.f32 0.6931472, %v3898_v38 }
 0x277   :  { %v5277_v26 = vpop.xlane.xlu1 %1657  ;;  %v2198_v7 = vmul.f32 %v2197_v18, %v5171_v56  ;;  %vm5335_vm13 = vcmp.lt.f32.partialorder %v2199_v21, 0.0004427343  ;;  %vm5339_vm2 = vcmp.lt.f32.partialorder %v1956_v36, 0.0004427343  ;;  %v1922_v30 = vsel %vm5291_vm3, %v1919_v58, %v1916_v45 }
 0x278   :  { %v5282_v16 = vpop.xlane.xlu0 %1654  ;;  %v3902_v27 = vpop.eup %3901  ;;  %v2204_v46 = vmul.f32 0.6931472, %v3900_v0  ;;  %3909 = vlog2.f32 %v2229_v8  ;;  %v1977_v14 = vadd.f32 1.0, %v5255_v3  ;;  %v5349_v56 = vrot.slane %v2165_v40, %v4952_v20 }
 0x279   :  { %v3904_v59 = vpop.eup %3903  ;;  %v1955_v18 = vmul.f32 %v1954_v22, %v5195_v41  ;;  %v1945_v21 = vadd.f32 1.0, %v1944_v25  ;;  %v1947_v36 = vand.u32 2147483647, %v5201_v24  ;;  %v2242_v2 = vadd.f32 1.0, %v2241_v49 }
 0x27a   :  { %6801 = vst [vmem:[#allocation28_spill] sm:$0xff] %v5349_v56  ;;  %v2244_v53 = vand.u32 2147483647, %v5223_v19  ;;  %v2232_v33 = vmul.f32 -0.5, %v5232_v1  ;;  %3911 = vlog2.f32 %v1986_v43  ;;  %v5358_v58 = vrot.slane %v1922_v30, %v4952_v20 }
 0x27b   :  { %v5301_v13 = vpop.xlane.xlu1 %1669  ;;  %v1913_v45 = vsel %vm5308_vm10, %v1910_v10, %v1907_v31  ;;  %v2195_v8 = vmul.f32 0.6931472, %v3902_v27  ;;  %v1989_v41 = vmul.f32 -0.5, %v5249_v63  ;;  %v2210_v25 = vsel %vm5318_vm12, %v2207_v54, %v2204_v46 }
 0x27c   :  { %v5313_v52 = vpop.xlane.xlu0 %1666  ;;  %6802 = vst [vmem:[#allocation29_spill] sm:$0xff] %v5358_v58  ;;  %v1952_v22 = vmul.f32 0.6931472, %v3904_v59  ;;  %3913 = vlog2.f32 %v1977_v14  ;;  %v2274_v0 = vadd.f32 1.0, %v5277_v26  ;;  %v3906_v40 = vpop.eup %3905  ;;  %v1946_v49 = vmul.f32 %v1945_v21, %v5201_v24 }
 0x27d   :  { %vm5367_vm0 = vcmp.lt.f32.partialorder %v1947_v36, 0.0004427343  ;;  %v2235_v6 = vand.u32 2147483647, %v5232_v1  ;;  %v2265_v10 = vadd.f32 1.0, %v5282_v16  ;;  %v5376_v57 = vrot.slane %v1913_v45, %v4952_v20 }
 0x27e   :  { %v2243_v54 = vmul.f32 %v2242_v2, %v5223_v19  ;;  %vm5379_vm3 = vcmp.lt.f32.partialorder %v2244_v53, 0.0004427343  ;;  %v2233_v24 = vadd.f32 1.0, %v2232_v33  ;;  %v1980_v30 = vmul.f32 -0.5, %v5255_v3 }
 0x27f   :  { %v5328_v51 = vpop.xlane.xlu1 %1681  ;;  %6805 = vst [vmem:[#allocation30_spill] sm:$0xff] %v5376_v57  ;;  %v5385_v46 = vrot.slane %v2210_v25, %v4952_v20  ;;  %v2201_v14 = vsel %vm5335_vm13, %v2198_v7, %v2195_v8  ;;  %v1990_v59 = vadd.f32 1.0, %v1989_v41  ;;  %v1992_v21 = vand.u32 2147483647, %v5249_v63 }
 0x280   :  { %v5343_v17 = vpop.xlane.xlu0 %1678  ;;  %v3908_v45 = vpop.eup %3907  ;;  %v1958_v53 = vsel %vm5339_vm2, %v1955_v18, %v1952_v22  ;;  %v1943_v19 = vmul.f32 0.6931472, %v3906_v40  ;;  %3915 = vlog2.f32 %v2274_v0  ;;  %v2310_v2 = vadd.f32 1.0, %v5301_v13 }
 0x281   :  { %6808 = vst [vmem:[#allocation31_spill] sm:$0xff] %v5385_v46  ;;  %vm5395_vm10 = vcmp.lt.f32.partialorder %v2235_v6, 0.0004427343  ;;  %v2277_v61 = vmul.f32 -0.5, %v5277_v26  ;;  %3917 = vlog2.f32 %v2265_v10  ;;  %v2301_v7 = vadd.f32 1.0, %v5313_v52 }
 0x282   :  { %v3910_v8 = vpop.eup %3909  ;;  %v5402_v41 = vrot.slane %v2201_v14, %v4952_v20  ;;  %v2234_v62 = vmul.f32 %v2233_v24, %v5232_v1  ;;  %v1981_v18 = vadd.f32 1.0, %v1980_v30  ;;  %v1983_v25 = vand.u32 2147483647, %v5255_v3 }
 0x283   :  { %v5353_v38 = vpop.xlane.xlu1 %1693  ;;  %v5407_v22 = vrot.slane %v1958_v53, %v4952_v20  ;;  %v2240_v0 = vmul.f32 0.6931472, %v3908_v45  ;;  %v1991_v40 = vmul.f32 %v1990_v59, %v5249_v63  ;;  %vm5410_vm2 = vcmp.lt.f32.partialorder %v1992_v21, 0.0004427343 }
 0x284   :  { %v5373_v31 = vpop.xlane.xlu0 %1690  ;;  %6811 = vst [vmem:[#allocation32_spill] sm:$0xff] %v5402_v41  ;;  %v3912_v46 = vpop.eup %3911  ;;  %v1949_v14 = vsel %vm5367_vm0, %v1946_v49, %v1943_v19  ;;  %v2280_v1 = vand.u32 2147483647, %v5277_v26  ;;  %v2268_v24 = vmul.f32 -0.5, %v5282_v16  ;;  %3919 = vlog2.f32 %v2310_v2 }
 0x285   :  { %6812 = vst [vmem:[#allocation33_spill] sm:$0xff] %v5407_v22  ;;  %v2231_v30 = vmul.f32 0.6931472, %v3910_v8  ;;  %v2278_v53 = vadd.f32 1.0, %v2277_v61  ;;  %3921 = vlog2.f32 %v2301_v7  ;;  %v2346_v63 = vadd.f32 1.0, %v5328_v51 }
 0x286   :  { %v3914_v21 = vpop.eup %3913  ;;  %v1982_v45 = vmul.f32 %v1981_v18, %v5255_v3  ;;  %vm5424_vm12 = vcmp.lt.f32.partialorder %v1983_v25, 0.0004427343  ;;  %v2271_v49 = vand.u32 2147483647, %v5282_v16  ;;  %v2313_v43 = vmul.f32 -0.5, %v5301_v13 }
 0x287   :  { %v5390_v36 = vpop.xlane.xlu1 %1702  ;;  %v5431_v19 = vrot.slane %v1949_v14, %v4952_v20  ;;  %v2246_v2 = vsel %vm5379_vm3, %v2243_v54, %v2240_v0  ;;  %v1988_v61 = vmul.f32 0.6931472, %v3912_v46  ;;  %v2337_v7 = vadd.f32 1.0, %v5343_v17 }
 0x288   :  { %v5414_v10 = vpop.xlane.xlu0 %1705  ;;  %vm5436_vm13 = vcmp.lt.f32.partialorder %v2280_v1, 0.0004427343  ;;  %v2269_v3 = vadd.f32 1.0, %v2268_v24  ;;  %v2316_v18 = vand.u32 2147483647, %v5301_v13  ;;  %v2304_v25 = vmul.f32 -0.5, %v5313_v52 }
 0x289   :  { %6817 = vst [vmem:[#allocation34_spill] sm:$0xff] %v5431_v19  ;;  %v2237_v41 = vsel %vm5395_vm10, %v2234_v62, %v2231_v30  ;;  %v1979_v14 = vmul.f32 0.6931472, %v3914_v21  ;;  %v2279_v19 = vmul.f32 %v2278_v53, %v5277_v26  ;;  %3923 = vlog2.f32 %v2346_v63 }
 0x28a   :  { %v3916_v27 = vpop.eup %3915  ;;  %v5448_v46 = vrot.slane %v2246_v2, %v4952_v20  ;;  %vm5450_vm0 = vcmp.lt.f32.partialorder %v2271_v49, 0.0004427343  ;;  %v2314_v1 = vadd.f32 1.0, %v2313_v43  ;;  %v2349_v24 = vmul.f32 -0.5, %v5328_v51 }
 0x28b   :  { %v5421_v59 = vpop.xlane.xlu1 %1714  ;;  %v3918_v58 = vpop.eup %3917  ;;  %v1994_v33 = vsel %vm5410_vm2, %v1991_v40, %v1988_v61  ;;  %v2307_v26 = vand.u32 2147483647, %v5313_v52  ;;  %3925 = vlog2.f32 %v2337_v7  ;;  %v2382_v62 = vadd.f32 1.0, %v5353_v38 }
 0x28c   :  { %v5445_v54 = vpop.xlane.xlu0 %1717  ;;  %6820 = vst [vmem:[#allocation35_spill] sm:$0xff] %v5448_v46  ;;  %v5462_v53 = vrot.slane %v2237_v41, %v4952_v20  ;;  %v2270_v63 = vmul.f32 %v2269_v3, %v5282_v16  ;;  %vm5465_vm3 = vcmp.lt.f32.partialorder %v2316_v18, 0.0004427343  ;;  %v2305_v49 = vadd.f32 1.0, %v2304_v25 }
 0x28d   :  { %v1985_v40 = vsel %vm5424_vm12, %v1982_v45, %v1979_v14  ;;  %v2276_v6 = vmul.f32 0.6931472, %v3916_v27  ;;  %v2352_v43 = vand.u32 2147483647, %v5328_v51  ;;  %v2373_v2 = vadd.f32 1.0, %v5373_v31 }
 0x28e   :  { %6823 = vst [vmem:[#allocation36_spill] sm:$0xff] %v5462_v53  ;;  %v3920_v61 = vpop.eup %3919  ;;  %v5474_v7 = vrot.slane %v1994_v33, %v4952_v20  ;;  %v2267_v41 = vmul.f32 0.6931472, %v3918_v58  ;;  %v2315_v16 = vmul.f32 %v2314_v1, %v5301_v13  ;;  %v2350_v3 = vadd.f32 1.0, %v2349_v24 }
 0x28f   :  { %v5459_v30 = vpop.xlane.xlu1 %1492  ;;  %v3922_v18 = vpop.eup %3921  ;;  %vm5477_vm10 = vcmp.lt.f32.partialorder %v2307_v26, 0.0004427343  ;;  %v2340_v22 = vmul.f32 -0.5, %v5343_v17  ;;  %3927 = vlog2.f32 %v2382_v62  ;;  %v2409_v45 = vadd.f32 1.0, %v5390_v36 }
 0x290   :  { %6826 = vst [vmem:[#allocation37_spill] sm:$0xff] %v5474_v7  ;;  %v5483_v25 = vpop.xlane.xlu0 %1480  ;;  %v5486_v14 = vrot.slane %v1985_v40, %v4952_v20  ;;  %v2306_v58 = vmul.f32 %v2305_v49, %v5313_v52  ;;  %v2343_v13 = vand.u32 2147483647, %v5343_v17  ;;  %v2385_v27 = vmul.f32 -0.5, %v5353_v38 }
 0x291   :  { %v2282_v1 = vsel %vm5436_vm13, %v2279_v19, %v2276_v6  ;;  %v2312_v24 = vmul.f32 0.6931472, %v3920_v61  ;;  %vm5493_vm2 = vcmp.lt.f32.partialorder %v2352_v43, 0.0004427343  ;;  %3929 = vlog2.f32 %v2373_v2 }
 0x292   :  { %6829 = vst [vmem:[#allocation38_spill] sm:$0xff] %v5486_v14  ;;  %v2376_v26 = vmul.f32 -0.5, %v5373_v31  ;;  %v2273_v52 = vsel %vm5450_vm0, %v2270_v63, %v2267_v41  ;;  %v2303_v49 = vmul.f32 0.6931472, %v3922_v18  ;;  %v2351_v40 = vmul.f32 %v2350_v3, %v5328_v51 }
 0x293   :  { %v5498_v62 = vpop.xlane.xlu1 %1588  ;;  %v2418_v7 = vadd.f32 1.0, %v5414_v10  ;;  %v3924_v8 = vpop.eup %3923  ;;  %v2341_v19 = vadd.f32 1.0, %v2340_v22  ;;  %3931 = vlog2.f32 %v2409_v45  ;;  %v2412_v6 = vmul.f32 -0.5, %v5390_v36 }
 0x294   :  { %v2445_v43 = vadd.f32 1.0, %v5421_v59  ;;  %v5507_v2 = vrot.slane %v2282_v1, %v4952_v20  ;;  %vm5509_vm12 = vcmp.lt.f32.partialorder %v2343_v13, 0.0004427343  ;;  %v2386_v0 = vadd.f32 1.0, %v2385_v27  ;;  %v5520_v45 = vpop.xlane.xlu0 %1576 }
 0x295   :  { %v2388_v63 = vand.u32 2147483647, %v5353_v38  ;;  %v3926_v51 = vpop.eup %3925  ;;  %v5515_v41 = vrot.slane %v2273_v52, %v4952_v20  ;;  %v2318_v3 = vsel %vm5465_vm3, %v2315_v16, %v2312_v24  ;;  %v2377_v18 = vadd.f32 1.0, %v2376_v26 }
 0x296   :  { %6832 = vst [vmem:[#allocation39_spill] sm:$0xff] %v5507_v2  ;;  %v2379_v22 = vand.u32 2147483647, %v5373_v31  ;;  %v2309_v13 = vsel %vm5477_vm10, %v2306_v58, %v2303_v49  ;;  %v2348_v1 = vmul.f32 0.6931472, %v3924_v8  ;;  %3933 = vlog2.f32 %v2418_v7 }
 0x297   :  { %6835 = vst [vmem:[#allocation40_spill] sm:$0xff] %v5515_v41  ;;  %v2454_v27 = vadd.f32 1.0, %v5445_v54  ;;  %v2413_v14 = vadd.f32 1.0, %v2412_v6  ;;  %v2415_v2 = vand.u32 2147483647, %v5390_v36  ;;  %v2421_v52 = vmul.f32 -0.5, %v5414_v10  ;;  %v5527_v21 = vpop.xlane.xlu1 %1495 }
 0x298   :  { %3935 = vlog2.f32 %v2445_v43  ;;  %v2339_v16 = vmul.f32 0.6931472, %v3926_v51  ;;  %v2342_v24 = vmul.f32 %v2341_v19, %v5343_v17  ;;  %v2387_v26 = vmul.f32 %v2386_v0, %v5353_v38 }
 0x299   :  { %vm5531_vm13 = vcmp.lt.f32.partialorder %v2388_v63, 0.0004427343  ;;  %v3928_v7 = vpop.eup %3927  ;;  %v5536_v58 = vrot.slane %v2318_v3, %v4952_v20  ;;  %vm5538_vm0 = vcmp.lt.f32.partialorder %v2379_v22, 0.0004427343  ;;  %v2448_v8 = vmul.f32 -0.5, %v5421_v59  ;;  %v5556_v22 = vpop.xlane.xlu0 %1483 }
 0x29a   :  { %v1779_v6 = vadd.f32 1.0, %v5459_v30  ;;  %v5545_v17 = vrot.slane %v2309_v13, %v4952_v20  ;;  %v2354_v38 = vsel %vm5493_vm2, %v2351_v40, %v2348_v1  ;;  %v2424_v19 = vand.u32 2147483647, %v5414_v10 }
 0x29b   :  { %6838 = vst [vmem:[#allocation41_spill] sm:$0xff] %v5536_v58  ;;  %3937 = vlog2.f32 %v2454_v27  ;;  %v3930_v43 = vpop.eup %3929  ;;  %v2378_v0 = vmul.f32 %v2377_v18, %v5373_v31  ;;  %v2414_v63 = vmul.f32 %v2413_v14, %v5390_v36  ;;  %vm5552_vm3 = vcmp.lt.f32.partialorder %v2415_v2, 0.0004427343  ;;  %v5566_v2 = vpop.xlane.xlu1 %1579 }
 0x29c   :  { %6841 = vst [vmem:[#allocation42_spill] sm:$0xff] %v5545_v17  ;;  %v2422_v3 = vadd.f32 1.0, %v2421_v52  ;;  %v2345_v13 = vsel %vm5509_vm12, %v2342_v24, %v2339_v16  ;;  %v2384_v33 = vmul.f32 0.6931472, %v3928_v7  ;;  %v2457_v40 = vmul.f32 -0.5, %v5445_v54 }
 0x29d   :  { %v1743_v1 = vadd.f32 1.0, %v5483_v25  ;;  %v3932_v27 = vpop.eup %3931  ;;  %v5563_v31 = vrot.slane %v2354_v38, %v4952_v20  ;;  %v2449_v36 = vadd.f32 1.0, %v2448_v8  ;;  %v2451_v14 = vand.u32 2147483647, %v5421_v59 }
 0x29e   :  { %3939 = vlog2.f32 %v1779_v6  ;;  %v2375_v18 = vmul.f32 0.6931472, %v3930_v43  ;;  %vm5568_vm10 = vcmp.lt.f32.partialorder %v2424_v19, 0.0004427343  ;;  %v1782_v61 = vmul.f32 -0.5, %v5459_v30 }
 0x29f   :  { %6844 = vst [vmem:[#allocation43_spill] sm:$0xff] %v5563_v31  ;;  %v2067_v16 = vadd.f32 1.0, %v5498_v62  ;;  %v5575_v24 = vrot.slane %v2345_v13, %v4952_v20  ;;  %v2423_v7 = vmul.f32 %v2422_v3, %v5414_v10  ;;  %v2460_v8 = vand.u32 2147483647, %v5445_v54  ;;  %v5589_v13 = vpop.xlane.xlu0 %1504 }
 0x2a0   :  { %v2031_v6 = vadd.f32 1.0, %v5520_v45  ;;  %v3934_v38 = vpop.eup %3933  ;;  %v2390_v19 = vsel %vm5531_vm13, %v2387_v26, %v2384_v33  ;;  %v2411_v43 = vmul.f32 0.6931472, %v3932_v27  ;;  %v2458_v58 = vadd.f32 1.0, %v2457_v40  ;;  %v5601_v27 = vpop.xlane.xlu1 %1600 }
 0x2a1   :  { %6847 = vst [vmem:[#allocation44_spill] sm:$0xff] %v5575_v24  ;;  %3941 = vlog2.f32 %v1743_v1  ;;  %v2450_v31 = vmul.f32 %v2449_v36, %v5421_v59  ;;  %vm5583_vm2 = vcmp.lt.f32.partialorder %v2451_v14, 0.0004427343  ;;  %v1785_v10 = vand.u32 2147483647, %v5459_v30 }
 0x2a2   :  { %v3936_v17 = vpop.eup %3935  ;;  %v1746_v3 = vmul.f32 -0.5, %v5483_v25  ;;  %v2381_v46 = vsel %vm5538_vm0, %v2378_v0, %v2375_v18  ;;  %v1783_v26 = vadd.f32 1.0, %v1782_v61  ;;  %3943 = vlog2.f32 %v2067_v16 }
 0x2a3   :  { %v2070_v33 = vmul.f32 -0.5, %v5498_v62  ;;  %v5595_v40 = vrot.slane %v2390_v19, %v4952_v20  ;;  %v2420_v59 = vmul.f32 0.6931472, %v3934_v38  ;;  %vm5597_vm12 = vcmp.lt.f32.partialorder %v2460_v8, 0.0004427343 }
 0x2a4   :  { %3945 = vlog2.f32 %v2031_v6  ;;  %v2417_v49 = vsel %vm5552_vm3, %v2414_v63, %v2411_v43  ;;  %v2447_v0 = vmul.f32 0.6931472, %v3936_v17  ;;  %v2459_v14 = vmul.f32 %v2458_v58, %v5445_v54 }
 0x2a5   :  { %6850 = vst [vmem:[#allocation45_spill] sm:$0xff] %v5595_v40  ;;  %v3938_v36 = vpop.eup %3937  ;;  %v1749_v18 = vand.u32 2147483647, %v5483_v25  ;;  %v5608_v61 = vrot.slane %v2381_v46, %v4952_v20  ;;  %vm5610_vm13 = vcmp.lt.f32.partialorder %v1785_v10, 0.0004427343  ;;  %v1747_v8 = vadd.f32 1.0, %v1746_v3  ;;  %v5627_v46 = vpop.xlane.xlu0 %1591 }
 0x2a6   :  { %v2034_v6 = vmul.f32 -0.5, %v5520_v45  ;;  %v1788_v38 = vadd.f32 1.0, %v5527_v21  ;;  %v5617_v51 = vmul.f32 %v1783_v26, %v5459_v30  ;;  %v2071_v17 = vadd.f32 1.0, %v2070_v33 }
 0x2a7   :  { %6853 = vst [vmem:[#allocation46_spill] sm:$0xff] %v5608_v61  ;;  %v2073_v54 = vand.u32 2147483647, %v5498_v62  ;;  %v1752_v58 = vadd.f32 1.0, %v5556_v22  ;;  %v5622_v19 = vrot.slane %v2417_v49, %v4952_v20  ;;  %v2426_v43 = vsel %vm5568_vm10, %v2423_v7, %v2420_v59 }
 0x2a8   :  { %v3940_v63 = vpop.eup %3939  ;;  %v2456_v10 = vmul.f32 0.6931472, %v3938_v36  ;;  %v2040_v3 = vadd.f32 1.0, %v5566_v2  ;;  %v2453_v30 = vsel %vm5583_vm2, %v2450_v31, %v2447_v0  ;;  %vm5631_vm0 = vcmp.lt.f32.partialorder %v1749_v18, 0.0004427343  ;;  %v5642_v36 = vpop.xlane.xlu1 %1516 }
 0x2a9   :  { %6856 = vst [vmem:[#allocation47_spill] sm:$0xff] %v5622_v19  ;;  %v2037_v33 = vand.u32 2147483647, %v5520_v45  ;;  %v1791_v49 = vmul.f32 -0.5, %v5527_v21  ;;  %v1815_v19 = vadd.f32 1.0, %v5589_v13  ;;  %v5639_v52 = vmul.f32 %v1747_v8, %v5483_v25 }
 0x2aa   :  { %v2035_v7 = vadd.f32 1.0, %v2034_v6  ;;  %3947 = vlog2.f32 %v1788_v38  ;;  %v1755_v59 = vmul.f32 -0.5, %v5556_v22  ;;  %v5645_v31 = vrot.slane %v2426_v43, %v4952_v20 }
 0x2ab   :  { %v3942_v41 = vpop.eup %3941  ;;  %v5647_v0 = vmul.f32 0.6931472, %v3940_v63  ;;  %v5650_v18 = vmul.f32 %v2071_v17, %v5498_v62  ;;  %vm5652_vm3 = vcmp.lt.f32.partialorder %v2073_v54, 0.0004427343  ;;  %v6861_v40 = vmov 0 }
 0x2ac   :  { %6859 = vst [vmem:[#allocation48_spill] sm:$0xff] %v5645_v31  ;;  %v6862_v40 = vsel %vm5652_vm3, 4294967295, %v6861_v40  ;;  %3949 = vlog2.f32 %v1752_v58  ;;  %v5657_v25 = vrot.slane %v2453_v30, %v4952_v20  ;;  %v2462_v8 = vsel %vm5597_vm12, %v2459_v14, %v2456_v10  ;;  %v3944_v38 = vpop.eup %3943  ;;  %v5673_v10 = vpop.xlane.xlu0 %1507 }
 0x2ad   :  { %6860 = vst [vmem:[#allocation49_spill] sm:$0xff] %v5650_v18  ;;  %6863 = vst [vmem:[#allocation50_spill] sm:$0xff] %v6862_v40  ;;  %3951 = vlog2.f32 %v2040_v3  ;;  %v2043_v6 = vmul.f32 -0.5, %v5566_v2  ;;  %vm5662_vm10 = vcmp.lt.f32.partialorder %v2037_v33, 0.0004427343  ;;  %v1792_v62 = vadd.f32 1.0, %v1791_v49 }
 0x2ae   :  { %6864 = vst [vmem:[#allocation51_spill] sm:$0xff] %v5657_v25  ;;  %3953 = vlog2.f32 %v1815_v19  ;;  %v1818_v17 = vmul.f32 -0.5, %v5589_v13  ;;  %v3946_v54 = vpop.eup %3945  ;;  %v5667_v58 = vmul.f32 0.6931472, %v3942_v41  ;;  %v5670_v43 = vmul.f32 %v2035_v7, %v5520_v45  ;;  %v5688_v41 = vpop.xlane.xlu1 %1612 }
 0x2af   :  { %v1794_v1 = vand.u32 2147483647, %v5527_v21  ;;  %v1756_v14 = vadd.f32 1.0, %v1755_v59  ;;  %v5676_v3 = vrot.slane %v2462_v8, %v4952_v20  ;;  %v1787_v19 = vsel %vm5610_vm13, %v5617_v51, %v5647_v0 }
 0x2b0   :  { %v2103_v30 = vadd.f32 1.0, %v5601_v27  ;;  %v2106_v33 = vmul.f32 -0.5, %v5601_v27  ;;  %v5684_v49 = vmul.f32 0.6931472, %v3944_v38  ;;  %v1758_v45 = vand.u32 2147483647, %v5556_v22  ;;  %v5717_v61 = vpop.xlane.xlu0 %1603 }
 0x2b1   :  { %6867 = vst [vmem:[#allocation52_spill] sm:$0xff] %v5676_v3  ;;  %v2044_v7 = vadd.f32 1.0, %v2043_v6  ;;  %v2079_v59 = vmul.f32 -0.5, %v5627_v46  ;;  %v5690_v8 = vmul.f32 0.6931472, %v3946_v54  ;;  %v1793_v3 = vmul.f32 %v1792_v62, %v5527_v21 }
 0x2b2   :  { %6868 = vst [vmem:[#allocation53_spill] sm:$0xff] %v5684_v49  ;;  %v2046_v16 = vand.u32 2147483647, %v5566_v2  ;;  %v1819_v51 = vadd.f32 1.0, %v1818_v17  ;;  %vm5698_vm2 = vcmp.lt.f32.partialorder %v1794_v1, 0.0004427343  ;;  %v5703_v6 = vmul.f32 %v1756_v14, %v5556_v22  ;;  %v5734_v49 = vpop.xlane.xlu1 %1528 }
 0x2b3   :  { %v2076_v54 = vadd.f32 1.0, %v5627_v46  ;;  %v1854_v25 = vmul.f32 -0.5, %v5642_v36  ;;  %3955 = vlog2.f32 %v2103_v30  ;;  %v2107_v21 = vadd.f32 1.0, %v2106_v33 }
 0x2b4   :  { %v1851_v62 = vadd.f32 1.0, %v5642_v36  ;;  %v1827_v17 = vmul.f32 -0.5, %v5673_v10  ;;  %v3948_v31 = vpop.eup %3947  ;;  %v5714_v0 = vmul.f32 %v2044_v7, %v5566_v2  ;;  %v1821_v22 = vand.u32 2147483647, %v5589_v13 }
 0x2b5   :  { %v2080_v14 = vadd.f32 1.0, %v2079_v59  ;;  %vm5723_vm12 = vcmp.lt.f32.partialorder %v1758_v45, 0.0004427343  ;;  %v5728_v1 = vmul.f32 %v1819_v51, %v5589_v13  ;;  %v2109_v2 = vand.u32 2147483647, %v5601_v27 }
 0x2b6   :  { %v3950_v30 = vpop.eup %3949  ;;  %v1824_v7 = vadd.f32 1.0, %v5673_v10  ;;  %3957 = vlog2.f32 %v2076_v54  ;;  %v2082_v53 = vand.u32 2147483647, %v5627_v46  ;;  %v1855_v57 = vadd.f32 1.0, %v1854_v25 }
 0x2b7   :  { %v3952_v59 = vpop.eup %3951  ;;  %v2139_v56 = vadd.f32 1.0, %v5688_v41  ;;  %v1790_v33 = vmul.f32 0.6931472, %v3948_v31  ;;  %v5737_v18 = vmul.f32 %v2107_v21, %v5601_v27  ;;  %3959 = vlog2.f32 %v1851_v62  ;;  %v5758_v62 = vpop.xlane.xlu0 %1519 }
 0x2b8   :  { %v3954_v45 = vpop.eup %3953  ;;  %v1828_v13 = vadd.f32 1.0, %v1827_v17  ;;  %v1754_v51 = vmul.f32 0.6931472, %v3950_v30  ;;  %v5740_v40 = vmul.f32 %v2080_v14, %v5627_v46  ;;  %v1857_v54 = vand.u32 2147483647, %v5642_v36 }
 0x2b9   :  { %v1830_v12 = vand.u32 2147483647, %v5673_v10  ;;  %3961 = vlog2.f32 %v1824_v7  ;;  %v2142_v25 = vmul.f32 -0.5, %v5688_v41  ;;  %v2145_v11 = vand.u32 2147483647, %v5688_v41 }
 0x2ba   :  { %v1887_v31 = vadd.f32 1.0, %v5734_v49  ;;  %v5747_v37 = vmul.f32 0.6931472, %v3952_v59  ;;  %v5749_v27 = vmul.f32 0.6931472, %v3954_v45  ;;  %v5756_v46 = vmul.f32 %v1855_v57, %v5642_v36 }
 0x2bb   :  { %vm5751_vm13 = vcmp.lt.f32.partialorder %v1821_v22, 0.0004427343  ;;  %3963 = vlog2.f32 %v2139_v56  ;;  %v5761_v17 = vmul.f32 %v1828_v13, %v5673_v10  ;;  %v1796_v14 = vsel %vm5698_vm2, %v1793_v3, %v1790_v33  ;;  %v5790_v33 = vpop.xlane.xlu1 %1624  ;;  %v5819_v47 = vpop.xlane.xlu0 %1615 }
 0x2bc   :  { %v6875_v22 = vsel %vm4996_vm1, %v5006_v32, %v5047_v44  ;;  %v2594_v7 = vrot.slane %v1787_v19, %v4952_v20  ;;  %vm5772_vm11 = vcmp.lt.f32.partialorder %v2046_v16, 0.0004427343  ;;  %vm5776_vm8 = vcmp.lt.f32.partialorder %v2109_v2, 0.0004427343 }
 0x2bd   :  { %v2590_v30 = vrot.slane %v6875_v22, %v4952_v20  ;;  %v2112_v36 = vadd.f32 1.0, %v5717_v61  ;;  %v2115_v3 = vmul.f32 -0.5, %v5717_v61  ;;  %v1890_v23 = vmul.f32 -0.5, %v5734_v49  ;;  %v3956_v32 = vpop.eup %3955 }
 0x2be   :  { %v2598_v38 = vrot.slane %v1796_v14, %v4952_v20  ;;  %3965 = vlog2.f32 %v1887_v31  ;;  %vm2903_vm1 = vcmask 1041409   ;;  %vm2905_vm2 = vcmask 1042434  }
 0x2bf   :  { %vm2907_vm9 = vcmask 1043459   ;;  %v1860_v44 = vadd.f32 1.0, %v5758_v62  ;;  %v2909_v19 = vsel %vm2903_vm1, %v2590_v30, %v5162_v48  ;;  %vm2990_vm3 = vcmask 60416   ;;  %v5876_v57 = vpop.xlane.xlu0 %1531 }
 0x2c0   :  { %v1760_v16 = vsel %vm5723_vm12, %v5703_v6, %v1754_v51  ;;  %vm5792_vm6 = vcmp.lt.f32.partialorder %v1857_v54, 0.0004427343  ;;  %v2910_v59 = vsel %vm2905_vm2, %v2594_v7, %v2909_v19  ;;  %v6882_v45 = vsel %vm4965_vm14, %v4983_v39, %v4994_v42  ;;  %v3958_v54 = vpop.eup %3957 }
 0x2c1   :  { %v2570_v48 = vrot.slane %v6882_v45, %v4952_v20  ;;  %v6883_v24 = vsel %vm4977_vm15, %v4988_v28, %v5003_v55  ;;  %v6884_v13 = vsel %vm5631_vm0, %v5639_v52, %v5667_v58  ;;  %v5815_v4 = vmul.f32 0.6931472, %v3956_v32  ;;  %v3960_v14 = vpop.eup %3959  ;;  %v6903_v52 = vld [vmem:[#allocation50_spill] sm:$0xff] }
 0x2c2   :  { %v2574_v6 = vrot.slane %v6883_v24, %v4952_v20  ;;  %v2578_v51 = vrot.slane %v6884_v13, %v4952_v20  ;;  %v2143_v31 = vadd.f32 1.0, %v2142_v25  ;;  %v2911_v39 = vsel %vm2907_vm9, %v2598_v38, %v2910_v59 }
 0x2c3   :  { %v2582_v42 = vrot.slane %v1760_v16, %v4952_v20  ;;  %3967 = vlog2.f32 %v2112_v36  ;;  %v1863_v28 = vmul.f32 -0.5, %v5758_v62  ;;  %v2994_v55 = vsel %vm2990_vm3, %v2911_v39, 0.0  ;;  %v3962_v7 = vpop.eup %3961 }
 0x2c4   :  { %v2904_v26 = vsel %vm2903_vm1, %v2574_v6, %v2570_v48  ;;  %vm5824_vm14 = vcmp.lt.f32.partialorder %v2082_v53, 0.0004427343  ;;  %v2116_v58 = vadd.f32 1.0, %v2115_v3  ;;  %v2118_v25 = vand.u32 2147483647, %v5717_v61  ;;  %2995 = vadd.xlane.f32.xlu1 %v2994_v55  ;;  %v5847_v48 = vpop.xlane.xlu1 %1540 }
 0x2c5   :  { %v1893_v22 = vand.u32 2147483647, %v5734_v49  ;;  %v2906_v30 = vsel %vm2905_vm2, %v2578_v51, %v2904_v26  ;;  %v1823_v36 = vsel %vm5751_vm13, %v5728_v1, %v5749_v27  ;;  %v1891_v38 = vadd.f32 1.0, %v1890_v23  ;;  %v3964_v32 = vpop.eup %3963 }
 0x2c6   :  { %3969 = vlog2.f32 %v1860_v44  ;;  %v2908_v53 = vsel %vm2907_vm9, %v2582_v42, %v2906_v30  ;;  %v5836_v19 = vmul.f32 0.6931472, %v3960_v14  ;;  %v5839_v3 = vmul.f32 %v2143_v31, %v5688_v41 }
 0x2c7   :  { %vm5841_vm15 = vcmp.lt.f32.partialorder %v2145_v11, 0.0004427343  ;;  %v2991_v59 = vsel %vm2990_vm3, %v2908_v53, 0.0  ;;  %v2175_v45 = vadd.f32 1.0, %v5790_v33  ;;  %v2111_v23 = vsel %vm5776_vm8, %v5737_v18, %v5815_v4  ;;  %v6896_v53 = vld [vmem:[#allocation12_spill] sm:$0xff] }
 0x2c8   :  { %v2078_v44 = vmul.f32 0.6931472, %v3958_v54  ;;  %v1864_v24 = vadd.f32 1.0, %v1863_v28  ;;  %2992 = vadd.xlane.f32.xlu0 %v2991_v59  ;;  %v2048_v11 = vsel %vm5772_vm11, %v5714_v0, %v5747_v37  ;;  %v5858_v41 = vmul.f32 %v2116_v58, %v5717_v61  ;;  %v3966_v54 = vpop.eup %3965  ;;  %v5911_v55 = vpop.xlane.xlu1 %1636  ;;  %v6931_v18 = vld [vmem:[#allocation20_spill] sm:$0xff] }
 0x2c9   :  { %vm5860_vm0 = vcmp.lt.f32.partialorder %v1893_v22, 0.0004427343  ;;  %v6891_v13 = vsel %vm5035_vm5, %v5033_v5, %v5081_v50  ;;  %v6892_v37 = vsel %vm5020_vm4, %v5018_v29, %v5067_v34  ;;  %v5879_v31 = vmul.f32 %v1891_v38, %v5734_v49 }
 0x2ca   :  { %v2698_v51 = vrot.slane %v6891_v13, %v4952_v20  ;;  %v2702_v0 = vrot.slane %v6892_v37, %v4952_v20  ;;  %v1866_v39 = vand.u32 2147483647, %v5758_v62  ;;  %v6893_v5 = vsel %vm5662_vm10, %v5670_v43, %v5690_v8 }
 0x2cb   :  { %v2706_v9 = vrot.slane %v6893_v5, %v4952_v20  ;;  %v2710_v35 = vrot.slane %v2048_v11, %v4952_v20  ;;  %v1859_v29 = vsel %vm5792_vm6, %v5756_v46, %v5836_v19  ;;  %v1826_v34 = vmul.f32 0.6931472, %v3962_v7  ;;  %v6901_v11 = vld [vmem:[#allocation9_spill] sm:$0xff] }
 0x2cc   :  { %vm5895_vm4 = vcmp.lt.f32.partialorder %v1830_v12, 0.0004427343  ;;  %3971 = vlog2.f32 %v2175_v45  ;;  %v2930_v63 = vsel %vm2903_vm1, %v2702_v0, %v2698_v51  ;;  %v5900_v49 = vmul.f32 0.6931472, %v3964_v32  ;;  %v6898_v45 = vld [vmem:[#allocation6_spill] sm:$0xff] }
 0x2cd   :  { %v5903_v43 = vmul.f32 %v1864_v24, %v5758_v62  ;;  %v2148_v8 = vadd.f32 1.0, %v5819_v47  ;;  %v2931_v42 = vsel %vm2905_vm2, %v2706_v9, %v2930_v63  ;;  %v2178_v14 = vmul.f32 -0.5, %v5790_v33  ;;  %v3968_v26 = vpop.eup %3967  ;;  %v6900_v24 = vld [vmem:[#allocation7_spill] sm:$0xff] }
 0x2ce   :  { %v2181_v10 = vand.u32 2147483647, %v5790_v33  ;;  %v2932_v12 = vsel %vm2907_vm9, %v2710_v35, %v2931_v42  ;;  %v1923_v28 = vadd.f32 1.0, %v5847_v48  ;;  %v5913_v58 = vmul.f32 0.6931472, %v3966_v54  ;;  %v5939_v54 = vpop.xlane.xlu0 %1627 }
 0x2cf   :  { %v3015_v22 = vsel %vm2990_vm3, %v2932_v12, 0.0  ;;  %v1896_v30 = vadd.f32 1.0, %v5876_v57  ;;  %v2084_v7 = vsel %vm5824_vm14, %v5740_v40, %v2078_v44  ;;  %v2151_v38 = vmul.f32 -0.5, %v5819_v47  ;;  %v6905_v40 = vld [vmem:[#allocation49_spill] sm:$0xff] }
 0x2d0   :  { %3016 = vadd.xlane.f32.xlu0 %v3015_v22  ;;  %v6897_v32 = vsel %vm5069_vm7, %v5061_v60, %v6896_v53  ;;  %vm6899_vm5 = vnez %v6898_v45  ;;  %vm6904_vm11 = vnez %v6903_v52  ;;  %v6906_v44 = vld [vmem:[#allocation53_spill] sm:$0xff]  ;;  %v3970_v15 = vpop.eup %3969  ;;  %v2147_v60 = vsel %vm5841_vm15, %v5839_v3, %v5900_v49  ;;  %v5968_v53 = vpop.xlane.xlu1 %1552  ;;  %v6944_v49 = vld [vmem:[#allocation24_spill] sm:$0xff] }
 0x2d1   :  { %v2714_v59 = vrot.slane %v6897_v32, %v4952_v20  ;;  %v6902_v13 = vsel %vm6899_vm5, %v6900_v24, %v6901_v11  ;;  %v6907_v37 = vsel %vm6904_vm11, %v6905_v40, %v6906_v44  ;;  %3973 = vlog2.f32 %v2148_v8  ;;  %v6914_v11 = vld [vmem:[#allocation13_spill] sm:$0xff]  ;;  %v6917_v40 = vld [vmem:[#allocation11_spill] sm:$0xff]  ;;  %v6919_v44 = vld [vmem:[#allocation10_spill] sm:$0xff] }
 0x2d2   :  { %v2718_v51 = vrot.slane %v6902_v13, %v4952_v20  ;;  %v2722_v0 = vrot.slane %v6907_v37, %v4952_v20  ;;  %v1926_v5 = vmul.f32 -0.5, %v5847_v48  ;;  %v2726_v9 = vrot.slane %v2084_v7, %v4952_v20  ;;  %v6915_v13 = vld [vmem:[#allocation18_spill] sm:$0xff]  ;;  %v6920_v37 = vld [vmem:[#allocation16_spill] sm:$0xff] }
 0x2d3   :  { %v2114_v35 = vmul.f32 0.6931472, %v3968_v26  ;;  %v2179_v63 = vadd.f32 1.0, %v2178_v14  ;;  %3975 = vlog2.f32 %v1923_v28  ;;  %vm5950_vm7 = vcmp.lt.f32.partialorder %v2118_v25, 0.0004427343 }
 0x2d4   :  { %v2933_v42 = vsel %vm2903_vm1, %v2718_v51, %v2714_v59  ;;  %v1895_v8 = vsel %vm5860_vm0, %v5879_v31, %v5913_v58  ;;  %v2154_v22 = vand.u32 2147483647, %v5819_v47  ;;  %3977 = vlog2.f32 %v1896_v30 }
 0x2d5   :  { %v2934_v26 = vsel %vm2905_vm2, %v2722_v0, %v2933_v42  ;;  %v5960_v14 = vmul.f32 0.6931472, %v3970_v15  ;;  %vm5962_vm10 = vcmp.lt.f32.partialorder %v2181_v10, 0.0004427343  ;;  %v2152_v61 = vadd.f32 1.0, %v2151_v38  ;;  %v6912_v38 = vld [vmem:[#allocation14_spill] sm:$0xff] }
 0x2d6   :  { %v2935_v25 = vsel %vm2907_vm9, %v2726_v9, %v2934_v26  ;;  %v2211_v7 = vadd.f32 1.0, %v5911_v55  ;;  %v1927_v32 = vadd.f32 1.0, %v1926_v5  ;;  %v1899_v59 = vmul.f32 -0.5, %v5876_v57  ;;  %v3972_v10 = vpop.eup %3971 }
 0x2d7   :  { %v3018_v30 = vsel %vm2990_vm3, %v2935_v25, 0.0  ;;  %v1832_v45 = vsel %vm5895_vm4, %v5761_v17, %v1826_v34  ;;  %v2184_v24 = vadd.f32 1.0, %v5939_v54  ;;  %vm6913_vm12 = vnez %v6912_v38  ;;  %v5994_v34 = vpop.xlane.xlu0 %1543  ;;  %v6926_v38 = vld [vmem:[#allocation17_spill] sm:$0xff] }
 0x2d8   :  { %3019 = vadd.xlane.f32.xlu1 %v3018_v30  ;;  %v6916_v51 = vsel %vm6913_vm12, %v6914_v11, %v6915_v13  ;;  %vm6918_vm14 = vnez %v6917_v40  ;;  %v2610_v17 = vrot.slane %v1823_v36, %v4952_v20  ;;  %v1929_v50 = vand.u32 2147483647, %v5847_v48  ;;  %v6928_v11 = vld [vmem:[#allocation15_spill] sm:$0xff] }
 0x2d9   :  { %v2602_v52 = vrot.slane %v6916_v51, %v4952_v20  ;;  %v6921_v0 = vsel %vm6918_vm14, %v6919_v44, %v6920_v37  ;;  %v2214_v5 = vmul.f32 -0.5, %v5911_v55  ;;  %v2614_v9 = vrot.slane %v1832_v45, %v4952_v20  ;;  %v6929_v13 = vld [vmem:[#allocation19_spill] sm:$0xff] }
 0x2da   :  { %v2606_v15 = vrot.slane %v6921_v0, %v4952_v20  ;;  %v1959_v42 = vadd.f32 1.0, %v5968_v53  ;;  %v6001_v26 = vmul.f32 %v2179_v63, %v5790_v33  ;;  %3979 = vlog2.f32 %v2211_v7 }
 0x2db   :  { %v2187_v21 = vmul.f32 -0.5, %v5939_v54  ;;  %vm6007_vm13 = vcmp.lt.f32.partialorder %v1866_v39, 0.0004427343  ;;  %v6011_v27 = vmul.f32 0.6931472, %v3972_v10  ;;  %v6014_v36 = vmul.f32 %v2152_v61, %v5819_v47  ;;  %v6022_v39 = vpop.xlane.xlu1 %1648  ;;  %v3974_v45 = vpop.eup %3973 }
 0x2dc   :  { %v2912_v25 = vsel %vm2903_vm1, %v2606_v15, %v2602_v52  ;;  %v1900_v30 = vadd.f32 1.0, %v1899_v59  ;;  %v6018_v63 = vmul.f32 %v1927_v32, %v5847_v48  ;;  %v1902_v7 = vand.u32 2147483647, %v5876_v57  ;;  %v6045_v44 = vpop.xlane.xlu0 %1639 }
 0x2dd   :  { %v2913_v33 = vsel %vm2905_vm2, %v2610_v17, %v2912_v25  ;;  %3981 = vlog2.f32 %v2184_v24  ;;  %vm6024_vm4 = vcmp.lt.f32.partialorder %v1929_v50, 0.0004427343  ;;  %v2215_v47 = vadd.f32 1.0, %v2214_v5  ;;  %v3976_v48 = vpop.eup %3975 }
 0x2de   :  { %v2914_v62 = vsel %vm2907_vm9, %v2614_v9, %v2913_v33  ;;  %v2217_v61 = vand.u32 2147483647, %v5911_v55  ;;  %3983 = vlog2.f32 %v1959_v42  ;;  %v2188_v32 = vadd.f32 1.0, %v2187_v21  ;;  %v3978_v37 = vpop.eup %3977 }
 0x2df   :  { %v2997_v59 = vsel %vm2990_vm3, %v2914_v62, 0.0  ;;  %v2120_v24 = vsel %vm5950_vm7, %v5858_v41, %v2114_v35  ;;  %vm6927_vm5 = vnez %v6926_v38  ;;  %v2738_v40 = vrot.slane %v2111_v23, %v4952_v20  ;;  %v6082_v33 = vpop.xlane.xlu1 %1564 }
 0x2e0   :  { %2998 = vadd.xlane.f32.xlu0 %v2997_v59  ;;  %v6930_v51 = vsel %vm6927_vm5, %v6928_v11, %v6929_v13  ;;  %v2183_v41 = vsel %vm5962_vm10, %v6001_v26, %v6011_v27  ;;  %v6052_v35 = vmul.f32 %v1900_v30, %v5876_v57  ;;  %v1962_v12 = vmul.f32 -0.5, %v5968_v53  ;;  %v6936_v11 = vld [vmem:[#allocation21_spill] sm:$0xff]  ;;  %v6937_v13 = vld [vmem:[#allocation22_spill] sm:$0xff] }
 0x2e1   :  { %v2734_v52 = vrot.slane %v6930_v51, %v4952_v20  ;;  %v2742_v0 = vrot.slane %v2120_v24, %v4952_v20  ;;  %v2150_v56 = vmul.f32 0.6931472, %v3974_v45  ;;  %v1932_v15 = vadd.f32 1.0, %v5994_v34  ;;  %v6951_v51 = vld [vmem:[#allocation25_spill] sm:$0xff] }
 0x2e2   :  { %v2247_v23 = vadd.f32 1.0, %v6022_v39  ;;  %vm6060_vm8 = vcmp.lt.f32.partialorder %v2154_v22, 0.0004427343  ;;  %v6064_v50 = vmul.f32 0.6931472, %v3976_v48  ;;  %v6067_v57 = vmul.f32 %v2215_v47, %v5911_v55  ;;  %v6097_v48 = vpop.xlane.xlu0 %1555 }
 0x2e3   :  { %v2936_v4 = vsel %vm2903_vm1, %v2734_v52, %v6931_v18  ;;  %v2190_v5 = vand.u32 2147483647, %v5939_v54  ;;  %v6071_v42 = vmul.f32 0.6931472, %v3978_v37  ;;  %vm6073_vm11 = vcmp.lt.f32.partialorder %v2217_v61, 0.0004427343 }
 0x2e4   :  { %v2937_v9 = vsel %vm2905_vm2, %v2738_v40, %v2936_v4  ;;  %v6078_v22 = vmul.f32 %v2188_v32, %v5939_v54  ;;  %v1965_v25 = vand.u32 2147483647, %v5968_v53  ;;  %v1963_v55 = vadd.f32 1.0, %v1962_v12  ;;  %v3980_v47 = vpop.eup %3979  ;;  %v6128_v4 = vpop.xlane.xlu1 %1660 }
 0x2e5   :  { %v2938_v30 = vsel %vm2907_vm9, %v2742_v0, %v2937_v9  ;;  %v1935_v62 = vmul.f32 -0.5, %v5994_v34  ;;  %3985 = vlog2.f32 %v2247_v23  ;;  %v2220_v61 = vadd.f32 1.0, %v6045_v44 }
 0x2e6   :  { %v3021_v45 = vsel %vm2990_vm3, %v2938_v30, 0.0  ;;  %3987 = vlog2.f32 %v1932_v15  ;;  %v1868_v54 = vsel %vm6007_vm13, %v5903_v43, %v5960_v14  ;;  %v2626_v59 = vrot.slane %v1859_v29, %v4952_v20 }
 0x2e7   :  { %3022 = vadd.xlane.f32.xlu1 %v3021_v45  ;;  %v2250_v32 = vmul.f32 -0.5, %v6022_v39  ;;  %v2223_v24 = vmul.f32 -0.5, %v6045_v44  ;;  %v2630_v38 = vrot.slane %v1868_v54, %v4952_v20  ;;  %v2915_v1 = vsel %vm2903_vm1, %v6937_v13, %v6936_v11  ;;  %v3982_v43 = vpop.eup %3981 }
 0x2e8   :  { %v1931_v2 = vsel %vm6024_vm4, %v6018_v63, %v6064_v50  ;;  %vm6109_vm6 = vcmp.lt.f32.partialorder %v1965_v25, 0.0004427343  ;;  %v2916_v19 = vsel %vm2905_vm2, %v2626_v59, %v2915_v1  ;;  %v1995_v29 = vadd.f32 1.0, %v6082_v33  ;;  %v3984_v14 = vpop.eup %3983 }
 0x2e9   :  { %vm6115_vm7 = vcmp.lt.f32.partialorder %v1902_v7, 0.0004427343  ;;  %v6119_v52 = vmul.f32 0.6931472, %v3980_v47  ;;  %v1936_v40 = vadd.f32 1.0, %v1935_v62  ;;  %v2917_v12 = vsel %vm2907_vm9, %v2630_v38, %v2916_v19  ;;  %v6144_v62 = vpop.xlane.xlu0 %1651 }
 0x2ea   :  { %v1938_v37 = vand.u32 2147483647, %v5994_v34  ;;  %v6124_v0 = vmul.f32 %v1963_v55, %v5968_v53  ;;  %v2253_v15 = vand.u32 2147483647, %v6022_v39  ;;  %3989 = vlog2.f32 %v2220_v61 }
 0x2eb   :  { %v3000_v18 = vsel %vm2990_vm3, %v2917_v12, 0.0  ;;  %v6130_v7 = vmul.f32 0.6931472, %v3982_v43  ;;  %v2251_v23 = vadd.f32 1.0, %v2250_v32  ;;  %v2224_v9 = vadd.f32 1.0, %v2223_v24 }
 0x2ec   :  { %3001 = vadd.xlane.f32.xlu0 %v3000_v18  ;;  %3991 = vlog2.f32 %v1995_v29  ;;  %v6132_v25 = vmul.f32 0.6931472, %v3984_v14  ;;  %v1998_v30 = vmul.f32 -0.5, %v6082_v33  ;;  %v2156_v53 = vsel %vm6060_vm8, %v6014_v36, %v2150_v56 }
 0x2ed   :  { %v2754_v55 = vrot.slane %v2147_v60, %v4952_v20  ;;  %v2219_v45 = vsel %vm6073_vm11, %v6067_v57, %v6119_v52  ;;  %v6151_v47 = vmul.f32 %v1936_v40, %v5994_v34  ;;  %v1971_v17 = vmul.f32 -0.5, %v6097_v48  ;;  %v6945_v60 = vld [vmem:[#allocation23_spill] sm:$0xff] }
 0x2ee   :  { %v2758_v36 = vrot.slane %v2156_v53, %v4952_v20  ;;  %vm6155_vm12 = vcmp.lt.f32.partialorder %v2253_v15, 0.0004427343  ;;  %v1968_v3 = vadd.f32 1.0, %v6097_v48  ;;  %v2939_v56 = vsel %vm2903_vm1, %v6945_v60, %v6944_v49  ;;  %v6193_v15 = vpop.xlane.xlu0 %1567  ;;  %v6950_v53 = vld [vmem:[#allocation26_spill] sm:$0xff]  ;;  %v6983_v52 = vld [vmem:[#allocation35_spill] sm:$0xff] }
 0x2ef   :  { %v2283_v61 = vadd.f32 1.0, %v6128_v4  ;;  %v3986_v54 = vpop.eup %3985  ;;  %vm6164_vm15 = vcmp.lt.f32.partialorder %v2190_v5, 0.0004427343  ;;  %v6169_v59 = vmul.f32 %v2251_v23, %v6022_v39  ;;  %v2226_v32 = vand.u32 2147483647, %v6045_v44  ;;  %v6182_v39 = vpop.xlane.xlu1 %1663 }
 0x2f0   :  { %v2001_v24 = vand.u32 2147483647, %v6082_v33  ;;  %v2940_v38 = vsel %vm2905_vm2, %v2754_v55, %v2939_v56  ;;  %v3988_v11 = vpop.eup %3987  ;;  %v1967_v13 = vsel %vm6109_vm6, %v6124_v0, %v6132_v25  ;;  %v6179_v5 = vmul.f32 %v2224_v9, %v6045_v44  ;;  %v6974_v0 = vld [vmem:[#allocation34_spill] sm:$0xff]  ;;  %v6975_v25 = vld [vmem:[#allocation33_spill] sm:$0xff] }
 0x2f1   :  { %v1999_v1 = vadd.f32 1.0, %v1998_v30  ;;  %v2941_v43 = vsel %vm2907_vm9, %v2758_v36, %v2940_v38  ;;  %v1972_v19 = vadd.f32 1.0, %v1971_v17  ;;  %3993 = vlog2.f32 %v2283_v61 }
 0x2f2   :  { %v3024_v29 = vsel %vm2990_vm3, %v2941_v43, 0.0  ;;  %v2256_v14 = vadd.f32 1.0, %v6144_v62  ;;  %v6186_v40 = vmul.f32 0.6931472, %v3986_v54  ;;  %3995 = vlog2.f32 %v1968_v3 }
 0x2f3   :  { %3025 = vadd.xlane.f32.xlu1 %v3024_v29  ;;  %v2286_v12 = vmul.f32 -0.5, %v6128_v4  ;;  %v1904_v44 = vsel %vm6115_vm7, %v6052_v35, %v6071_v42  ;;  %vm6195_vm14 = vcmp.lt.f32.partialorder %v2001_v24, 0.0004427343  ;;  %v2259_v23 = vmul.f32 -0.5, %v6144_v62  ;;  %v6230_v61 = vpop.xlane.xlu1 %1684 }
 0x2f4   :  { %v2642_v9 = vrot.slane %v1895_v8, %v4952_v20  ;;  %v2646_v30 = vrot.slane %v1904_v44, %v4952_v20  ;;  %v2918_v35 = vsel %vm2903_vm1, %v6951_v51, %v6950_v53  ;;  %v3990_v42 = vpop.eup %3989  ;;  %v1934_v55 = vmul.f32 0.6931472, %v3988_v11  ;;  %v6956_v44 = vld [vmem:[#allocation28_spill] sm:$0xff] }
 0x2f5   :  { %v6211_v17 = vmul.f32 %v1999_v1, %v6082_v33  ;;  %v1974_v36 = vand.u32 2147483647, %v6097_v48  ;;  %v2292_v3 = vadd.f32 1.0, %v6182_v39  ;;  %vm6215_vm13 = vcmp.lt.f32.partialorder %v1938_v37, 0.0004427343 }
 0x2f6   :  { %v3992_v6 = vpop.eup %3991  ;;  %v6220_v31 = vmul.f32 %v1972_v19, %v6097_v48  ;;  %v2289_v58 = vand.u32 2147483647, %v6128_v4  ;;  %3997 = vlog2.f32 %v2256_v14  ;;  %v2919_v8 = vsel %vm2905_vm2, %v2642_v9, %v2918_v35  ;;  %v6243_v19 = vpop.xlane.xlu0 %1672 }
 0x2f7   :  { %v2255_v33 = vsel %vm6155_vm12, %v6169_v59, %v6186_v40  ;;  %v2287_v60 = vadd.f32 1.0, %v2286_v12  ;;  %v2920_v56 = vsel %vm2907_vm9, %v2646_v30, %v2919_v8  ;;  %v2004_v37 = vadd.f32 1.0, %v6193_v15 }
 0x2f8   :  { %v6232_v54 = vmul.f32 0.6931472, %v3990_v42  ;;  %v2260_v48 = vadd.f32 1.0, %v2259_v23  ;;  %v3003_v24 = vsel %vm2990_vm3, %v2920_v56, 0.0  ;;  %v2295_v38 = vmul.f32 -0.5, %v6182_v39  ;;  %v6957_v23 = vld [vmem:[#allocation27_spill] sm:$0xff] }
 0x2f9   :  { %v6236_v11 = vmul.f32 0.6931472, %v3992_v6  ;;  %3004 = vadd.xlane.f32.xlu0 %v3003_v24  ;;  %3999 = vlog2.f32 %v2292_v3  ;;  %v2007_v1 = vmul.f32 -0.5, %v6193_v15  ;;  %v2192_v43 = vsel %vm6164_vm15, %v6078_v22, %v6130_v7  ;;  %v6280_v3 = vpop.xlane.xlu1 %1687 }
 0x2fa   :  { %vm6245_vm0 = vcmp.lt.f32.partialorder %v2289_v58, 0.0004427343  ;;  %v2770_v14 = vrot.slane %v2183_v41, %v4952_v20  ;;  %v2774_v12 = vrot.slane %v2192_v43, %v4952_v20  ;;  %v2942_v34 = vsel %vm2903_vm1, %v6957_v23, %v6956_v44  ;;  %v6290_v24 = vpop.xlane.xlu0 %1675 }
 0x2fb   :  { %v2355_v22 = vadd.f32 1.0, %v6230_v61  ;;  %v6261_v7 = vmul.f32 %v2287_v60, %v6128_v4  ;;  %v2262_v9 = vand.u32 2147483647, %v6144_v62  ;;  %4001 = vlog2.f32 %v2004_v37  ;;  %v3994_v30 = vpop.eup %3993 }
 0x2fc   :  { %v2358_v28 = vmul.f32 -0.5, %v6230_v61  ;;  %vm6265_vm5 = vcmp.lt.f32.partialorder %v2226_v32, 0.0004427343  ;;  %v2298_v27 = vand.u32 2147483647, %v6182_v39  ;;  %v2943_v41 = vsel %vm2905_vm2, %v2770_v14, %v2942_v34  ;;  %v3996_v51 = vpop.eup %3995  ;;  %v6960_v14 = vld [vmem:[#allocation30_spill] sm:$0xff] }
 0x2fd   :  { %4003 = vlog2.f32 %v2355_v22  ;;  %v2319_v53 = vadd.f32 1.0, %v6243_v19  ;;  %v2003_v4 = vsel %vm6195_vm14, %v6211_v17, %v6236_v11  ;;  %v6277_v35 = vmul.f32 %v2260_v48, %v6144_v62 }
 0x2fe   :  { %v2296_v32 = vadd.f32 1.0, %v2295_v38  ;;  %v2944_v42 = vsel %vm2907_vm9, %v2774_v12, %v2943_v41  ;;  %v2008_v6 = vadd.f32 1.0, %v2007_v1  ;;  %v2361_v8 = vand.u32 2147483647, %v6230_v61  ;;  %v6961_v12 = vld [vmem:[#allocation29_spill] sm:$0xff] }
 0x2ff   :  { %v3027_v58 = vsel %vm2990_vm3, %v2944_v42, 0.0  ;;  %4005 = vlog2.f32 %v2319_v53  ;;  %v6284_v60 = vmul.f32 0.6931472, %v3994_v30  ;;  %v2359_v56 = vadd.f32 1.0, %v2358_v28  ;;  %v6327_v53 = vpop.xlane.xlu1 %1699 }
 0x300   :  { %3028 = vadd.xlane.f32.xlu1 %v3027_v58  ;;  %v2322_v37 = vmul.f32 -0.5, %v6243_v19  ;;  %v1940_v48 = vsel %vm6215_vm13, %v6151_v47, %v1934_v55  ;;  %v3998_v38 = vpop.eup %3997  ;;  %v2658_v1 = vrot.slane %v1931_v2, %v4952_v20  ;;  %v2921_v44 = vsel %vm2903_vm1, %v6961_v12, %v6960_v14  ;;  %v6968_v12 = vld [vmem:[#allocation32_spill] sm:$0xff] }
 0x301   :  { %v2662_v43 = vrot.slane %v1940_v48, %v4952_v20  ;;  %v2364_v23 = vadd.f32 1.0, %v6280_v3  ;;  %v6303_v49 = vmul.f32 0.6931472, %v3996_v51  ;;  %v6306_v47 = vmul.f32 %v2296_v32, %v6182_v39 }
 0x302   :  { %v2325_v55 = vand.u32 2147483647, %v6243_v19  ;;  %v2367_v10 = vmul.f32 -0.5, %v6280_v3  ;;  %vm6310_vm10 = vcmp.lt.f32.partialorder %v1974_v36, 0.0004427343  ;;  %v2922_v2 = vsel %vm2905_vm2, %v2658_v1, %v2921_v44  ;;  %v6969_v44 = vld [vmem:[#allocation31_spill] sm:$0xff] }
 0x303   :  { %v2010_v50 = vand.u32 2147483647, %v6193_v15  ;;  %4007 = vlog2.f32 %v2364_v23  ;;  %v2328_v34 = vadd.f32 1.0, %v6290_v24  ;;  %v4000_v22 = vpop.eup %3999  ;;  %v2291_v28 = vsel %vm6245_vm0, %v6261_v7, %v6284_v60 }
 0x304   :  { %v6321_v30 = vmul.f32 0.6931472, %v3998_v38  ;;  %v6324_v36 = vmul.f32 %v2008_v6, %v6193_v15  ;;  %v2923_v41 = vsel %vm2907_vm9, %v2662_v43, %v2922_v2  ;;  %v6330_v51 = vmul.f32 %v2359_v56, %v6230_v61  ;;  %v1697_v56 = vpop.xlane.xlu0 %1696 }
 0x305   :  { %vm6332_vm4 = vcmp.lt.f32.partialorder %v2361_v8, 0.0004427343  ;;  %v2323_v42 = vadd.f32 1.0, %v2322_v37  ;;  %v3006_v58 = vsel %vm2990_vm3, %v2923_v41, 0.0  ;;  %v2331_v48 = vmul.f32 -0.5, %v6290_v24  ;;  %v4002_v38 = vpop.eup %4001 }
 0x306   :  { %vm6338_vm8 = vcmp.lt.f32.partialorder %v2325_v55, 0.0004427343  ;;  %3007 = vadd.xlane.f32.xlu0 %v3006_v58  ;;  %v2368_v1 = vadd.f32 1.0, %v2367_v10  ;;  %v2370_v43 = vand.u32 2147483647, %v6280_v3  ;;  %v2228_v61 = vsel %vm6265_vm5, %v6179_v5, %v6232_v54 }
 0x307   :  { %v2786_v8 = vrot.slane %v2219_v45, %v4952_v20  ;;  %v4004_v37 = vpop.eup %4003  ;;  %4009 = vlog2.f32 %v2328_v34  ;;  %v2790_v14 = vrot.slane %v2228_v61, %v4952_v20  ;;  %v2945_v23 = vsel %vm2903_vm1, %v6969_v44, %v6968_v12 }
 0x308   :  { %v2400_v55 = vadd.f32 1.0, %v6327_v53  ;;  %v6358_v26 = vmul.f32 0.6931472, %v4000_v22  ;;  %v2332_v5 = vadd.f32 1.0, %v2331_v48  ;;  %v2403_v54 = vmul.f32 -0.5, %v6327_v53 }
 0x309   :  { %v2946_v21 = vsel %vm2905_vm2, %v2786_v8, %v2945_v23  ;;  %v4006_v57 = vpop.eup %4005  ;;  %vm6364_vm11 = vcmp.lt.f32.partialorder %v2262_v9, 0.0004427343  ;;  %v6368_v45 = vmul.f32 0.6931472, %v4002_v38  ;;  %v6371_v10 = vmul.f32 %v2323_v42, %v6243_v19  ;;  %v6381_v9 = vpop.xlane.xlu1 %1711  ;;  %v6992_v23 = vld [vmem:[#allocation40_spill] sm:$0xff] }
 0x30a   :  { %v2947_v2 = vsel %vm2907_vm9, %v2790_v14, %v2946_v21  ;;  %4011 = vlog2.f32 %v2400_v55  ;;  %v6374_v34 = vmul.f32 0.6931472, %v4004_v37  ;;  %v6377_v22 = vmul.f32 %v2368_v1, %v6280_v3  ;;  %v1709_v37 = vpop.xlane.xlu0 %1708 }
 0x30b   :  { %v2334_v41 = vand.u32 2147483647, %v6290_v24  ;;  %v3030_v62 = vsel %vm2990_vm3, %v2947_v2, 0.0  ;;  %v6383_v58 = vmul.f32 0.6931472, %v4006_v57  ;;  %v2404_v48 = vadd.f32 1.0, %v2403_v54 }
 0x30c   :  { %3031 = vadd.xlane.f32.xlu1 %v3030_v62  ;;  %v2391_v19 = vadd.f32 1.0, %v1697_v56  ;;  %v2394_v42 = vmul.f32 -0.5, %v1697_v56  ;;  %v6386_v38 = vmul.f32 %v2332_v5, %v6290_v24  ;;  %v2406_v61 = vand.u32 2147483647, %v6327_v53 }
 0x30d   :  { %v1976_v1 = vsel %vm6310_vm10, %v6220_v31, %v6303_v49  ;;  %v2674_v8 = vrot.slane %v1967_v13, %v4952_v20  ;;  %v4008_v14 = vpop.eup %4007  ;;  %v2397_v24 = vand.u32 2147483647, %v1697_v56  ;;  %vm6402_vm7 = vcmp.lt.f32.partialorder %v2298_v27, 0.0004427343  ;;  %v1724_v2 = vpop.xlane.xlu1 %1723 }
 0x30e   :  { %4013 = vlog2.f32 %v2391_v19  ;;  %v2395_v12 = vadd.f32 1.0, %v2394_v42  ;;  %v2678_v44 = vrot.slane %v1976_v1, %v4952_v20  ;;  %v2363_v46 = vsel %vm6332_vm4, %v6330_v51, %v6374_v34  ;;  %v1721_v16 = vpop.xlane.xlu0 %1720 }
 0x30f   :  { %v2924_v13 = vsel %vm2903_vm1, %v6975_v25, %v6974_v0  ;;  %v2436_v31 = vadd.f32 1.0, %v6381_v9  ;;  %v2439_v49 = vmul.f32 -0.5, %v6381_v9  ;;  %v2327_v39 = vsel %vm6338_vm8, %v6371_v10, %v6383_v58  ;;  %v7002_v25 = vld [vmem:[#allocation42_spill] sm:$0xff] }
 0x310   :  { %v6420_v27 = vmul.f32 %v2404_v48, %v6327_v53  ;;  %v2925_v63 = vsel %vm2905_vm2, %v2674_v8, %v2924_v13  ;;  %v2427_v55 = vadd.f32 1.0, %v1709_v37  ;;  %vm6425_vm6 = vcmp.lt.f32.partialorder %v2010_v50, 0.0004427343  ;;  %v6997_v53 = vld [vmem:[#allocation37_spill] sm:$0xff] }
 0x311   :  { %v6429_v21 = vmul.f32 0.6931472, %v4008_v14  ;;  %v2926_v54 = vsel %vm2907_vm9, %v2678_v44, %v2925_v63  ;;  %4015 = vlog2.f32 %v2436_v31  ;;  %v2440_v57 = vadd.f32 1.0, %v2439_v49  ;;  %v4010_v62 = vpop.eup %4009  ;;  %v6982_v44 = vld [vmem:[#allocation36_spill] sm:$0xff] }
 0x312   :  { %v6432_v19 = vmul.f32 %v2395_v12, %v1697_v56  ;;  %vm6434_vm15 = vcmp.lt.f32.partialorder %v2397_v24, 0.0004427343  ;;  %v3009_v15 = vsel %vm2990_vm3, %v2926_v54, 0.0  ;;  %4017 = vlog2.f32 %v2427_v55 }
 0x313   :  { %v2430_v50 = vmul.f32 -0.5, %v1709_v37  ;;  %3010 = vadd.xlane.f32.xlu0 %v3009_v15  ;;  %v2442_v48 = vand.u32 2147483647, %v6381_v9  ;;  %v2433_v42 = vand.u32 2147483647, %v1709_v37  ;;  %v2264_v1 = vsel %vm6364_vm11, %v6277_v35, %v6321_v30 }
 0x314   :  { %v2802_v56 = vrot.slane %v2255_v33, %v4952_v20  ;;  %v4012_v8 = vpop.eup %4011  ;;  %vm6452_vm13 = vcmp.lt.f32.partialorder %v2370_v43, 0.0004427343  ;;  %v2806_v24 = vrot.slane %v2264_v1, %v4952_v20  ;;  %v2948_v35 = vsel %vm2903_vm1, %v6983_v52, %v6982_v44 }
 0x315   :  { %v2431_v12 = vadd.f32 1.0, %v2430_v50  ;;  %v2472_v30 = vadd.f32 1.0, %v1724_v2  ;;  %v2330_v0 = vmul.f32 0.6931472, %v4010_v62  ;;  %v6461_v59 = vmul.f32 %v2440_v57, %v6381_v9 }
 0x316   :  { %v2949_v40 = vsel %vm2905_vm2, %v2802_v56, %v2948_v35  ;;  %v2475_v33 = vmul.f32 -0.5, %v1724_v2  ;;  %vm6464_vm12 = vcmp.lt.f32.partialorder %v2334_v41, 0.0004427343  ;;  %v2402_v43 = vmul.f32 0.6931472, %v4012_v8 }
 0x317   :  { %vm6468_vm5 = vcmp.lt.f32.partialorder %v2433_v42, 0.0004427343  ;;  %v2950_v13 = vsel %vm2907_vm9, %v2806_v24, %v2949_v40  ;;  %4019 = vlog2.f32 %v2472_v30  ;;  %vm6473_vm10 = vcmp.lt.f32.partialorder %v2406_v61, 0.0004427343  ;;  %v7001_v40 = vld [vmem:[#allocation43_spill] sm:$0xff] }
 0x318   :  { %v3033_v9 = vsel %vm2990_vm3, %v2950_v13, 0.0  ;;  %v2476_v49 = vadd.f32 1.0, %v2475_v33  ;;  %v2463_v63 = vadd.f32 1.0, %v1721_v16  ;;  %v2466_v41 = vmul.f32 -0.5, %v1721_v16  ;;  %v4014_v55 = vpop.eup %4013  ;;  %v7003_v13 = vld [vmem:[#allocation41_spill] sm:$0xff] }
 0x319   :  { %v2432_v54 = vmul.f32 %v2431_v12, %v1709_v37  ;;  %3034 = vadd.xlane.f32.xlu1 %v3033_v9  ;;  %v2478_v57 = vand.u32 2147483647, %v1724_v2  ;;  %v2300_v62 = vsel %vm6402_vm7, %v6306_v47, %v6358_v26  ;;  %v2818_v61 = vrot.slane %v2291_v28, %v4952_v20  ;;  %v6993_v47 = vld [vmem:[#allocation39_spill] sm:$0xff] }
 0x31a   :  { %v2393_v15 = vmul.f32 0.6931472, %v4014_v55  ;;  %4021 = vlog2.f32 %v2463_v63  ;;  %v2467_v50 = vadd.f32 1.0, %v2466_v41  ;;  %v2469_v42 = vand.u32 2147483647, %v1721_v16  ;;  %v7004_v63 = vld [vmem:[#allocation46_spill] sm:$0xff] }
 0x31b   :  { %vm6488_vm11 = vcmp.lt.f32.partialorder %v2442_v48, 0.0004427343  ;;  %v2477_v1 = vmul.f32 %v2476_v49, %v1724_v2  ;;  %v2822_v56 = vrot.slane %v2300_v62, %v4952_v20  ;;  %v2951_v26 = vsel %vm2903_vm1, %v6993_v47, %v6992_v23  ;;  %v4016_v7 = vpop.eup %4015  ;;  %v7005_v41 = vld [vmem:[#allocation45_spill] sm:$0xff] }
 0x31c   :  { %v2012_v29 = vsel %vm6425_vm6, %v6324_v36, %v6368_v45  ;;  %v2399_v60 = vsel %vm6434_vm15, %v6432_v19, %v2393_v15  ;;  %v2468_v28 = vmul.f32 %v2467_v50, %v1721_v16  ;;  %v2952_v48 = vsel %vm2905_vm2, %v2818_v61, %v2951_v26  ;;  %v4018_v8 = vpop.eup %4017  ;;  %v6996_v19 = vld [vmem:[#allocation38_spill] sm:$0xff]  ;;  %v7000_v16 = vld [vmem:[#allocation44_spill] sm:$0xff]  ;;  %v7006_v50 = vld [vmem:[#allocation47_spill] sm:$0xff] }
 0x31d   :  { %v2690_v2 = vrot.slane %v2003_v4, %v4952_v20  ;;  %v2438_v12 = vmul.f32 0.6931472, %v4016_v7  ;;  %vm6510_vm0 = vcmp.lt.f32.partialorder %v2478_v57, 0.0004427343  ;;  %v2953_v36 = vsel %vm2907_vm9, %v2822_v56, %v2952_v48  ;;  %v7009_v26 = vld [vmem:[#allocation52_spill] sm:$0xff] }
 0x31e   :  { %v2694_v45 = vrot.slane %v2012_v29, %v4952_v20  ;;  %v2927_v24 = vsel %vm2903_vm1, %v6997_v53, %v6996_v19  ;;  %v2429_v44 = vmul.f32 0.6931472, %v4018_v8  ;;  %vm6519_vm7 = vcmp.lt.f32.partialorder %v2469_v42, 0.0004427343  ;;  %v7007_v42 = vld [vmem:[#allocation48_spill] sm:$0xff]  ;;  %v3054_v19 = vld [vmem:[%s6675_s4] sm:$0xff] }
 0x31f   :  { %v3036_v17 = vsel %vm2990_vm3, %v2953_v36, 0.0  ;;  %v2928_v11 = vsel %vm2905_vm2, %v2690_v2, %v2927_v24  ;;  %v2372_v4 = vsel %vm6452_vm13, %v6377_v22, %v6429_v21  ;;  %v2850_v35 = vrot.slane %v2363_v46, %v4952_v20  ;;  %v3285_v36 = vld [vmem:[%s6678_s7] sm:$0x1f]  ;;  %v3057_v53 = vld [vmem:[%s6676_s5 + $0x8] sm:$0x3] }
 0x320   :  { %3037 = vadd.xlane.f32.xlu1 %v3036_v17  ;;  %v2929_v52 = vsel %vm2907_vm9, %v2694_v45, %v2928_v11  ;;  %v2854_v30 = vrot.slane %v2372_v4, %v4952_v20  ;;  %v2957_v33 = vsel %vm2903_vm1, %v7001_v40, %v7000_v16  ;;  %v2435_v14 = vsel %vm6468_vm5, %v2432_v54, %v2429_v44  ;;  %v3371_v45 = vld [vmem:[#allocation2] sm:$0x1] }
 0x321   :  { %v3012_v22 = vsel %vm2990_vm3, %v2929_v52, 0.0  ;;  %v2336_v21 = vsel %vm6464_vm12, %v6386_v38, %v2330_v0  ;;  %v2834_v51 = vrot.slane %v2327_v39, %v4952_v20  ;;  %v4020_v32 = vpop.eup %4019  ;;  %v2958_v34 = vsel %vm2905_vm2, %v2850_v35, %v2957_v33 }
 0x322   :  { %3013 = vadd.xlane.f32.xlu0 %v3012_v22  ;;  %v2838_v46 = vrot.slane %v2336_v21, %v4952_v20  ;;  %v2954_v9 = vsel %vm2903_vm1, %v7003_v13, %v7002_v25  ;;  %v2408_v38 = vsel %vm6473_vm10, %v6420_v27, %v2402_v43  ;;  %v2474_v0 = vmul.f32 0.6931472, %v4020_v32 }
 0x323   :  { %v2959_v6 = vsel %vm2907_vm9, %v2854_v30, %v2958_v34  ;;  %v2955_v10 = vsel %vm2905_vm2, %v2834_v51, %v2954_v9  ;;  %v2866_v58 = vrot.slane %v2399_v60, %v4952_v20  ;;  %v2870_v49 = vrot.slane %v2408_v38, %v4952_v20 }
 0x324   :  { %v3042_v39 = vsel %vm2990_vm3, %v2959_v6, 0.0  ;;  %v2956_v3 = vsel %vm2907_vm9, %v2838_v46, %v2955_v10  ;;  %v2960_v55 = vsel %vm2903_vm1, %v7005_v41, %v7004_v63  ;;  %v4022_v54 = vpop.eup %4021  ;;  %v2444_v31 = vsel %vm6488_vm11, %v6461_v59, %v2438_v12  ;;  %v7008_v59 = vld [vmem:[#allocation51_spill] sm:$0xff] }
 0x325   :  { %3043 = vadd.xlane.f32.xlu1 %v3042_v39  ;;  %v3039_v27 = vsel %vm2990_vm3, %v2956_v3, 0.0  ;;  %v2961_v43 = vsel %vm2905_vm2, %v2866_v58, %v2960_v55  ;;  %v2882_v57 = vrot.slane %v2435_v14, %v4952_v20  ;;  %v2465_v62 = vmul.f32 0.6931472, %v4022_v54 }
 0x326   :  { %3040 = vadd.xlane.f32.xlu0 %v3039_v27  ;;  %v2962_v61 = vsel %vm2907_vm9, %v2870_v49, %v2961_v43  ;;  %v2886_v15 = vrot.slane %v2444_v31, %v4952_v20  ;;  %v2963_v56 = vsel %vm2903_vm1, %v7007_v42, %v7006_v50  ;;  %v2480_v37 = vsel %vm6510_vm0, %v2477_v1, %v2474_v0 }
 0x327   :  { %v3045_v23 = vsel %vm2990_vm3, %v2962_v61, 0.0  ;;  %v2964_v47 = vsel %vm2905_vm2, %v2882_v57, %v2963_v56  ;;  %v2966_v29 = vsel %vm2903_vm1, %v7009_v26, %v7008_v59  ;;  %v2471_v7 = vsel %vm6519_vm7, %v2468_v28, %v2465_v62  ;;  %v3056_v28 = vld [vmem:[%s6676_s5] sm:$0xff] }
 0x328   :  { %v2965_v60 = vsel %vm2907_vm9, %v2886_v15, %v2964_v47  ;;  %v2902_v48 = vrot.slane %v2480_v37, %v4952_v20  ;;  %v2898_v8 = vrot.slane %v2471_v7, %v4952_v20  ;;  %vm3197_vm14 = vcmask 171008  }
 0x329   :  { %v3048_v2 = vsel %vm2990_vm3, %v2965_v60, 0.0  ;;  %3592 = vmatprep.mubr.msk.f32.mxu0 %vm3197_vm14, %v3054_v19  ;;  %vm3178_vm4 = vcmask 1045509   ;;  %vm3182_vm8 = vcmask 1047559   ;;  %vm3180_vm6 = vcmask 1046534   ;;  %v3055_v19 = vld [vmem:[%s6675_s4 + $0x8] sm:$0x3] }
 0x32a   :  { %3046 = vadd.xlane.f32.xlu0 %v3045_v23  ;;  %3049 = vadd.xlane.f32.xlu1 %v3048_v2  ;;  %v2967_v12 = vsel %vm2905_vm2, %v2898_v8, %v2966_v29  ;;  %vm3204_vm15 = vcmask 1044480   ;;  %vm3291_vm13 = vcmask 80896   ;;  %vm7011_vm12 = vmmov 0  }
 0x32b   :  { %v2968_v1 = vsel %vm2907_vm9, %v2902_v48, %v2967_v12  ;;  %vm3381_vm5 = vcmask 39936   ;;  %vm3459_vm10 = vcmask 24576  }
 0x32c   :  { %v3051_v5 = vsel %vm2990_vm3, %v2968_v1, 0.0  ;;  %vm3176_vm3 = vcmask 1044484  }
 0x32e   :  { %3052 = vadd.xlane.f32.xlu0 %v3051_v5 }
 0x33b   :  { %3060 = vperm.xlu1 %3638, %v3056_v28  }
 0x33f   :  { %3288 = vperm.xlu1 %3638, %v3285_v36  }
 0x343   :  { %3374 = vperm.xlu1 %3638, %v3371_v45  }
 0x344   :  { %3065 = vperm.xlu0 %3637, %v3057_v53  }
 0x351   :  { %v2996_v24 = vpop.xlane.xlu1 %2995 }
 0x352   :  { %v3096_v51 = vrot.slane %v2996_v24, %v4952_v20 }
 0x355   :  { %v2993_v44 = vpop.xlane.xlu0 %2992 }
 0x356   :  { %v3092_v32 = vrot.slane %v2993_v44, %v4952_v20 }
 0x358   :  { %v3173_v3 = vsel %vm2903_vm1, %v3096_v51, %v3092_v32  ;;  %v7012_v51 = vld [vmem:[#allocation8_spill] sm:$0xff] }
 0x359   :  { %v3379_v32 = vsub.s32 0, %v7012_v51 }
 0x35d   :  { %v3017_v17 = vpop.xlane.xlu0 %3016 }
 0x35e   :  { %v3124_v34 = vrot.slane %v3017_v17, %v4952_v20 }
 0x365   :  { %v3020_v18 = vpop.xlane.xlu1 %3019 }
 0x366   :  { %v3128_v33 = vrot.slane %v3020_v18, %v4952_v20 }
 0x368   :  { %v3184_v9 = vsel %vm2903_vm1, %v3128_v33, %v3124_v34 }
 0x36d   :  { %v2999_v4 = vpop.xlane.xlu0 %2998 }
 0x36e   :  { %v3100_v25 = vrot.slane %v2999_v4, %v4952_v20 }
 0x370   :  { %v3174_v41 = vsel %vm2905_vm2, %v3100_v25, %v3173_v3 }
 0x374   :  { %v3023_v11 = vpop.xlane.xlu1 %3022 }
 0x375   :  { %v3132_v22 = vrot.slane %v3023_v11, %v4952_v20 }
 0x377   :  { %v3185_v10 = vsel %vm2905_vm2, %v3132_v22, %v3184_v9 }
 0x379   :  { %v3002_v35 = vpop.xlane.xlu0 %3001 }
 0x37a   :  { %v3104_v38 = vrot.slane %v3002_v35, %v4952_v20  ;;  %v3284_v35 = vld [vmem:[%s6677_s6] sm:$0x1f]  ;;  %s4052_s6 = smov [#allocation3]  }
 0x37b   :  { %s3467_s17 = sshll.u32 %s4052_s6, 4  ;;  %s3468_s17 = int_to_ptr.vmem [resolvable:$true] %s3467_s17 }
 0x37c   :  { %v3175_v43 = vsel %vm2907_vm9, %v3104_v38, %v3174_v41  ;;  %s4023_s18 = scalar_lea.vmem %s3468_s17, 16  ;;  %p4028_p1 = scmp.lt.s32.totalorder %s3468_s17, %s3468_s17 }
 0x37d   :  { %p4024_p0 = scmp.ne.s32.totalorder %s3468_s17, %s4023_s18 }
 0x380   :  { %v3026_v52 = vpop.xlane.xlu1 %3025 }
 0x381   :  { %v3136_v46 = vrot.slane %v3026_v52, %v4952_v20 }
 0x383   :  { %v3186_v49 = vsel %vm2907_vm9, %v3136_v46, %v3185_v10 }
 0x386   :  { %v3005_v16 = vpop.xlane.xlu0 %3004 }
 0x387   :  { %v3108_v58 = vrot.slane %v3005_v16, %v4952_v20 }
 0x389   :  { %v3177_v62 = vsel %vm3176_vm3, %v3108_v58, %v3175_v43 }
 0x38d   :  { %v3029_v30 = vpop.xlane.xlu1 %3028 }
 0x38e   :  { %v3140_v13 = vrot.slane %v3029_v30, %v4952_v20  ;;  %v7010_v30 = vmov 0.0  }
 0x390   :  { %v3187_v55 = vsel %vm3176_vm3, %v3140_v13, %v3186_v49 }
 0x393   :  { %v3008_v14 = vpop.xlane.xlu0 %3007 }
 0x394   :  { %v3112_v63 = vrot.slane %v3008_v14, %v4952_v20 }
 0x396   :  { %v3179_v50 = vsel %vm3178_vm4, %v3112_v63, %v3177_v62 }
 0x399   :  { %v3032_v40 = vpop.xlane.xlu1 %3031 }
 0x39a   :  { %v3144_v0 = vrot.slane %v3032_v40, %v4952_v20 }
 0x39c   :  { %v3188_v31 = vsel %vm3178_vm4, %v3144_v0, %v3187_v55 }
 0x3a0   :  { %v3011_v6 = vpop.xlane.xlu0 %3010 }
 0x3a1   :  { %v3116_v54 = vrot.slane %v3011_v6, %v4952_v20 }
 0x3a3   :  { %v3181_v23 = vsel %vm3180_vm6, %v3116_v54, %v3179_v50 }
 0x3a6   :  { %v3035_v21 = vpop.xlane.xlu1 %3034 }
 0x3a7   :  { %v3148_v39 = vrot.slane %v3035_v21, %v4952_v20  ;;  %v3370_v21 = vld [vmem:[%s6679_s8] sm:$0x1]  ;;  %s4027_s8 = scalar_lea.vmem %s3468_s17, 32 }
 0x3a8   :  { %p4029_p2 = scmp.lt.s32.totalorder %s4027_s8, %s4023_s18 }
 0x3a9   :  { %v3189_v61 = vsel %vm3180_vm6, %v3148_v39, %v3188_v31 }
 0x3aa   :  { %p4030_p3 = por %p4029_p2, %p4028_p1 }
 0x3ac   :  { %p4031_p4 = pnand %p4030_p3, %p4024_p0 }
 0x3ad   :  { %v3038_v27 = vpop.xlane.xlu1 %3037 }
 0x3ae   :  { %v3152_v57 = vrot.slane %v3038_v27, %v4952_v20 }
 0x3af   :  { %v3014_v15 = vpop.xlane.xlu0 %3013 }
 0x3b0   :  { %v3120_v42 = vrot.slane %v3014_v15, %v4952_v20  ;;  %v3190_v56 = vsel %vm3182_vm8, %v3152_v57, %v3189_v61 }
 0x3b2   :  { %v3183_v47 = vsel %vm3182_vm8, %v3120_v42, %v3181_v23  ;;  %v3044_v59 = vpop.xlane.xlu1 %3043 }
 0x3b3   :  { %v3623_v37 = vpack.c.bf16 %v3190_v56, %v3183_v47  ;;  %v3041_v26 = vpop.xlane.xlu0 %3040  ;;  %v3160_v29 = vrot.slane %v3044_v59, %v4952_v20 }
 0x3b4   :  { %v3156_v7 = vrot.slane %v3041_v26, %v4952_v20 }
 0x3b5   :  { %3624 = vmatprep.subr.bf16.mxu0 %v3623_v37 }
 0x3b6   :  { %3626 = vmatpush3.bf16.msra.mxu0 %v3623_v37  ;;  %v3191_v12 = vsel %vm2903_vm1, %v3160_v29, %v3156_v7  ;;  %vm3295_vm1 = vcmask 1041408  }
 0x3b7   :  { %v3047_v60 = vpop.xlane.xlu0 %3046  ;;  %v3050_v48 = vpop.xlane.xlu1 %3049 }
 0x3b8   :  { %v3164_v2 = vrot.slane %v3047_v60, %v4952_v20  ;;  %v3168_v8 = vrot.slane %v3050_v48, %v4952_v20 }
 0x3ba   :  { %v3192_v5 = vsel %vm2905_vm2, %v3164_v2, %v3191_v12 }
 0x3bb   :  { %v3053_v1 = vpop.xlane.xlu0 %3052  ;;  %v3193_v36 = vsel %vm2907_vm9, %v3168_v8, %v3192_v5  ;;  %v3061_v44 = vpop.permute.xlu1 %3060  ;;  %vm4051_vm9 = vmmov 1  }
 0x3bc   :  { %v3172_v28 = vrot.slane %v3053_v1, %v4952_v20  ;;  %vm3629_vm2 = vmpackc.low %vm3295_vm1, %vm4051_vm9 }
 0x3be   :  { %v3194_v45 = vsel %vm3176_vm3, %v3172_v28, %v3193_v36 }
 0x3bf   :  { %3590 = vmatprep.subr.msk.mxu0 %vm3204_vm15, %v3194_v45  ;;  %v3289_v16 = vpop.permute.xlu1 %3288 }
 0x3c0   :  { %3591 = vmatpush3.msk.msra.mxu0 %vm3204_vm15, %v3194_v45 }
 0x3c1   :  { %3593 = vmatmul.mubr.msk.f32.vlgmr.msra.gmra.mrb[4].mxu0 %vm3197_vm14, %v3055_v19 }
 0x3c3   :  { %v3066_v53 = vpop.permute.xlu0 %3065  ;;  %v3375_v34 = vpop.permute.xlu1 %3374 }
 0x3c4   :  { %v3380_v46 = vrot.slane %v3375_v34, %v3379_v32 }
 0x494   :  { %v3594_v24 = vpop.f32.mrb[4].mxu0 }
 0x495   :  { %v3279_v18 = vadd.f32 %v3594_v24, %v3066_v53  ;;  %v3273_v20 = vpop.f32.mrb[5].mxu0 }
 0x496   :  { %v3274_v17 = vadd.f32 %v3273_v20, %v3061_v44 }
 0x497   :  { %v3283_v11 = vmax.f32 %v3279_v18, 0.0 }
 0x498   :  { %v3282_v4 = vmax.f32 %v3274_v17, 0.0 }
 0x49a   :  { %v3628_v52 = vpack.c.bf16 %v3283_v11, %v3282_v4 }
 0x49c   :  { %3630 = vmatpush3.bf16.msk.msra.mxu1 %vm3629_vm2, %v3628_v52 }
 0x49d   :  { %3602 = vmatprep.subr.mxu1 %v7010_v30 }
 0x49f   :  { %3600 = vmatmul.mubr.msk.f32.vlgmr.msra.gmra.mrb[4].mxu1 %vm3291_vm13, %v3284_v35 }
 0x4a0   :  { %3604 = vmatprep.mubr.msk.f32.mxu1 %vm7011_vm12, %v7010_v30 }
 0x572   :  { %v3365_v40 = vpop.f32.mrb[4].mxu1 }
 0x573   :  { %v3366_v33 = vadd.f32 %v3365_v40, %v3289_v16  ;;  %v3601_v14 = vpop.f32.mrb[5].mxu1 }
 0x575   :  { %v3369_v22 = vmax.f32 %v3366_v33, 0.0 }
 0x577   :  { %3603 = vmatpush3.msk.msra.mxu1 %vm3204_vm15, %v3369_v22 }
 0x578   :  { %3605 = vmatmul.mubr.msk.f32.vlgmr.msra.gmra.mrb[6].mxu1 %vm3381_vm5, %v3370_v21 }
 0x64b   :  { %v3454_v25 = vpop.f32.mrb[6].mxu1 }
 0x64c   :  { %v3455_v13 = vadd.f32 %v3454_v25, %v3380_v46  ;;  %v3606_v9 = vpop.f32.mrb[7].mxu1 }
 0x64e   :  { %v3458_v38 = vmax.f32 %v3455_v13, 0.0 }
 0x650   :  { %3460 = vst.msk [vmem:[#allocation3] sm:$0x1] %vm3459_vm10, %v3458_v38 }
 0x651   :  { %4034 = shalt.err (!%p4031_p4)
}
 0x652   :  { %s4035_s9 = scalar_lea.hbm %s6681_s10, 16 }
 0x653   :  { %p4036_p5 = scmp.ne.s32.totalorder %s6681_s10, %s4035_s9  ;;  %p4039_p6 = scmp.lt.u32.totalorder %s4035_s9, %s6681_s10 }
 0x655   :  { %p4041_p7 = pnand %p4039_p6, %p4036_p5 }
 0x657   :  { %4044 = shalt.err (!%p4041_p7)
}
 0x658   :  { %3470 = dma.vmem_to_hbm [thread:$0]  %s3468_s17, 16, %s6681_s10, [#allocation4]  }
 0x659   :  { %4045 = dma.done.wait [#allocation4], 16  }
 0x65a   :  { %4046 = vsyncadd [#allocation4], 4294967280 }
 0x65b   :  { %3474 = vsyncpa [#allocation4], 1 }

</bundles_post_ra>
